<compile_context>
chip_gen: v5e
topology: v5e:2x2
jax: 0.10.0
libtpu: 0.0.40
codegen_flags: <defaults>
</compile_context>

<pallas_src>
import numpy as np
import jax
import jax.numpy as jnp
from jax import lax
from jax.experimental import pallas as pl
from jax.experimental.pallas import tpu as pltpu


# ----------------------------------------------------------------------------
# Constant index structure (pure numpy; depends only on the fixed geometry).
# ----------------------------------------------------------------------------

def _band_select(parity, in_w, out_half_w, k=5):
    """m[w, j, kx] = 1  iff  w == 2*j + parity + kx  (conv-window bookkeeping)."""
    m = np.zeros((in_w, out_half_w, k), np.float32)
    for j in range(out_half_w):
        for kx in range(k):
            w = 2 * j + parity + kx
            if w < in_w:
                m[w, j, kx] = 1.0
    return m


def _row_select(out_rows, parity):
    """s[i, r] = 1 iff r == 2*i + parity  (max-pool row selection)."""
    s = np.zeros((out_rows, 2 * out_rows), np.float32)
    s[np.arange(out_rows), 2 * np.arange(out_rows) + parity] = 1.0
    return s


_M1 = np.stack([_band_select(0, 36, 16), _band_select(1, 36, 16)])   # (2,36,16,5)
_M2 = np.stack([_band_select(0, 16, 6), _band_select(1, 16, 6)])     # (2,16,6,5)
_S1 = np.stack([_row_select(16, 0), _row_select(16, 1)])             # (2,16,32)
_S2 = np.stack([_row_select(6, 0), _row_select(6, 1)])               # (2,6,12)


# ----------------------------------------------------------------------------
# Fused Pallas kernel: one grid step == one sample, everything VMEM-resident.
# ----------------------------------------------------------------------------

def _lenet5_kernel(x_ref, t1_ref, b1_ref, s1_ref, t2_ref, b2_ref, s2_ref,
                   w1r_ref, bf1_ref, wf2_ref, bf2_ref, wf3_ref, bf3_ref,
                   o_ref):
    f32 = jnp.float32

    # ---- conv1 (5x5, pad=2, 1->6): 5 banded GEMMs per output-column parity --
    # acc1[p][oh, j*6+co] == conv1(x)[oh, 2*j+p, co]   (oh: 0..31, j: 0..15)
    acc1 = [jnp.zeros((32, 96), f32) for _ in range(2)]
    for ky in range(5):
        rows = x_ref[0, ky:ky + 32, :]                                 # (32, 36)
        for p in range(2):
            acc1[p] = acc1[p] + jnp.dot(rows, t1_ref[p, ky],
                                        preferred_element_type=f32)
    # W-pool (parity max) + bias + ReLU
    a1 = jnp.maximum(jnp.maximum(acc1[0], acc1[1]) + b1_ref[...], 0.0)  # (32,96)
    # H-pool: 0/1 row-selection matmuls + elementwise max
    pool1 = jnp.maximum(jnp.dot(s1_ref[0], a1, preferred_element_type=f32),
                        jnp.dot(s1_ref[1], a1, preferred_element_type=f32))  # (16,96)

    # ---- conv2 (5x5 valid, 6->16): same banded-GEMM / parity scheme ---------
    acc2 = [jnp.zeros((12, 96), f32) for _ in range(2)]
    for ky in range(5):
        rows = pool1[ky:ky + 12, :]                                    # (12, 96)
        for p in range(2):
            acc2[p] = acc2[p] + jnp.dot(rows, t2_ref[p, ky],
                                        preferred_element_type=f32)
    a2 = jnp.maximum(jnp.maximum(acc2[0], acc2[1]) + b2_ref[...], 0.0)  # (12,96)
    pool2 = jnp.maximum(jnp.dot(s2_ref[0], a2, preferred_element_type=f32),
                        jnp.dot(s2_ref[1], a2, preferred_element_type=f32))  # (6,96)

    # ---- fc1 (576->576): PyTorch CHW flatten folded into the weight layout --
    h = jnp.zeros((1, 576), f32)
    for hh in range(6):
        h = h + jnp.dot(pool2[hh:hh + 1, :], w1r_ref[hh],
                        preferred_element_type=f32)
    h = jnp.maximum(h + bf1_ref[...], 0.0)

    # ---- fc2 (576->84) + ReLU ----
    h = jnp.maximum(jnp.dot(h, wf2_ref[...], preferred_element_type=f32)
                    + bf2_ref[...], 0.0)

    # ---- fc3 (84->1): lane reduction instead of a 1-wide matmul ----
    o_ref[0] = jnp.sum(h * wf3_ref[...], axis=-1, keepdims=True) + bf3_ref[...]


# ----------------------------------------------------------------------------
# Wrapper: host-side weight re-layout (weight-only glue) + single pallas_call.
# ----------------------------------------------------------------------------

def lenet5_forward(x, params):
    """x: (1, N, 1, 32, 32)  ->  (N, 1), matching the PyTorch module."""
    x = jnp.squeeze(x, axis=0).astype(jnp.float32)        # (N, 1, 32, 32)
    n = x.shape[0]
    xp = jnp.pad(x[:, 0], ((0, 0), (2, 2), (2, 2)))       # (N, 36, 36)

    # Banded conv-as-GEMM weights; columns ordered (parity | pooled-col, C_out).
    w1 = params["conv1_w"][:, 0]                                        # (6,5,5)
    t1 = jnp.einsum("pwjk,cyk->pywjc", _M1, w1).reshape(2, 5, 36, 96)
    b1 = jnp.tile(params["conv1_b"], 16).reshape(1, 96)
    t2 = jnp.einsum("pwjx,ciyx->pywijc", _M2,
                    params["conv2_w"]).reshape(2, 5, 96, 96)
    b2 = jnp.tile(params["conv2_b"], 6).reshape(1, 96)
    # fc1 weight re-laid-out so rows match the in-kernel (w*16 + c) lane order.
    w1r = jnp.transpose(params["fc1_w"].reshape(576, 16, 6, 6),
                        (2, 3, 1, 0)).reshape(6, 96, 576)
    bf1 = params["fc1_b"].reshape(1, 576)
    wf2 = params["fc2_w"].T                                             # (576,84)
    bf2 = params["fc2_b"].reshape(1, 84)
    wf3 = params["fc3_w"].reshape(1, 84)
    bf3 = params["fc3_b"].reshape(1, 1)
    s1 = jnp.asarray(_S1)
    s2 = jnp.asarray(_S2)

    def const_spec(shape):
        return pl.BlockSpec(shape, lambda i, _z=(0,) * len(shape): _z)

    out = pl.pallas_call(
        _lenet5_kernel,
        out_shape=jax.ShapeDtypeStruct((n, 1, 1), jnp.float32),
        grid=(n,),
        in_specs=[
            pl.BlockSpec((1, 36, 36), lambda i: (i, 0, 0)),   # per-sample input
            const_spec((2, 5, 36, 96)),                       # t1  (banded conv1)
            const_spec((1, 96)),                              # conv1 bias (tiled)
            const_spec((2, 16, 32)),                          # pool1 row select
            const_spec((2, 5, 96, 96)),                       # t2  (banded conv2)
            const_spec((1, 96)),                              # conv2 bias (tiled)
            const_spec((2, 6, 12)),                           # pool2 row select
            const_spec((6, 96, 576)),                         # fc1 weight (folded flatten)
            const_spec((1, 576)),                             # fc1 bias
            const_spec((576, 84)),                            # fc2 weight
            const_spec((1, 84)),                              # fc2 bias
            const_spec((1, 84)),                              # fc3 weight
            const_spec((1, 1)),                               # fc3 bias
        ],
        out_specs=pl.BlockSpec((1, 1, 1), lambda i: (i, 0, 0)),
        compiler_params=pltpu.CompilerParams(
            dimension_semantics=("parallel",)),
    )(xp, t1, b1, s1, t2, b2, s2, w1r, bf1, wf2, bf2, wf3, bf3)
    return out.reshape(n, 1)


# ----------------------------------------------------------------------------
# Pure-JAX reference (for a correctness check) and deterministic params.
# ----------------------------------------------------------------------------

def _reference_forward(x, params):
    with jax.default_matmul_precision("highest"):
        x = jnp.squeeze(x, axis=0).astype(jnp.float32)
        y = lax.conv_general_dilated(x, params["conv1_w"], (1, 1),
                                     ((2, 2), (2, 2)),
                                     dimension_numbers=("NCHW", "OIHW", "NCHW"))
        y = jax.nn.relu(y + params["conv1_b"][None, :, None, None])
        y = lax.reduce_window(y, -jnp.inf, lax.max,
                              (1, 1, 2, 2), (1, 1, 2, 2), "VALID")
        y = lax.conv_general_dilated(y, params["conv2_w"], (1, 1), "VALID",
                                     dimension_numbers=("NCHW", "OIHW", "NCHW"))
        y = jax.nn.relu(y + params["conv2_b"][None, :, None, None])
        y = lax.reduce_window(y, -jnp.inf, lax.max,
                              (1, 1, 2, 2), (1, 1, 2, 2), "VALID")
        y = y.reshape(y.shape[0], -1)
        y = jax.nn.relu(y @ params["fc1_w"].T + params["fc1_b"])
        y = jax.nn.relu(y @ params["fc2_w"].T + params["fc2_b"])
        return y @ params["fc3_w"].T + params["fc3_b"]


def init_params(key):
    def uniform(k, shape, fan_in):
        bound = 1.0 / (fan_in ** 0.5)
        return jax.random.uniform(k, shape, jnp.float32, -bound, bound)

    ks = jax.random.split(key, 10)
    return {
        "conv1_w": uniform(ks[0], (6, 1, 5, 5), 1 * 5 * 5),
        "conv1_b": uniform(ks[1], (6,), 1 * 5 * 5),
        "conv2_w": uniform(ks[2], (16, 6, 5, 5), 6 * 5 * 5),
        "conv2_b": uniform(ks[3], (16,), 6 * 5 * 5),
        "fc1_w": uniform(ks[4], (576, 576), 576),
        "fc1_b": uniform(ks[5], (576,), 576),
        "fc2_w": uniform(ks[6], (84, 576), 576),
        "fc2_b": uniform(ks[7], (84,), 576),
        "fc3_w": uniform(ks[8], (1, 84), 84),
        "fc3_b": uniform(ks[9], (1,), 84),
    }


if __name__ == "__main__":
    key = jax.random.PRNGKey(0)
    k_param, k_x = jax.random.split(key)
    params = init_params(k_param)

    # fc1's 576 = 16*6*6 input pins the spatial size at 32x32; batch N = 2.
    x = jax.random.normal(k_x, (1, 2, 1, 32, 32), jnp.float32)

    fwd = jax.jit(lenet5_forward)
    out = jax.block_until_ready(fwd(x, params))
    assert out.shape == (2, 1) and out.dtype == jnp.float32

    ref = jax.block_until_ready(_reference_forward(x, params))
    assert jnp.allclose(out, ref, atol=1e-2, rtol=1e-2), (
        "mismatch vs reference, max |diff| = "
        f"{float(jnp.max(jnp.abs(out - ref)))}")

    print("KERNEL_OK")
</pallas_src>

<mosaic_0001>
module attributes {stable_mosaic.version = 11 : i64} {
  func.func @_lenet5_kernel(%arg0: i32, %arg1: memref<1x36x36xf32, #tpu.memory_space<vmem>>, %arg2: memref<2x5x36x96xf32, #tpu.memory_space<vmem>>, %arg3: memref<1x96xf32, #tpu.memory_space<vmem>>, %arg4: memref<2x16x32xf32, #tpu.memory_space<vmem>>, %arg5: memref<2x5x96x96xf32, #tpu.memory_space<vmem>>, %arg6: memref<1x96xf32, #tpu.memory_space<vmem>>, %arg7: memref<2x6x12xf32, #tpu.memory_space<vmem>>, %arg8: memref<6x96x576xf32, #tpu.memory_space<vmem>>, %arg9: memref<1x576xf32, #tpu.memory_space<vmem>>, %arg10: memref<576x84xf32, #tpu.memory_space<vmem>>, %arg11: memref<1x84xf32, #tpu.memory_space<vmem>>, %arg12: memref<1x84xf32, #tpu.memory_space<vmem>>, %arg13: memref<1x1xf32, #tpu.memory_space<vmem>>, %arg14: memref<1x1x1xf32, #tpu.memory_space<vmem>>) attributes {dimension_semantics = [#tpu.dimension_semantics<parallel>], iteration_bounds = array<i64: 2>, scalar_prefetch = 0 : i64, scratch_operands = 0 : i64, tpu.core_type = #tpu.core_type<tc>, window_params = [{transform_indices = @transform_0, window_bounds = array<i64: 1, 36, 36>}, {pipeline_mode = #tpu.pipeline_mode<synchronous>, transform_indices = @transform_1, window_bounds = array<i64: 2, 5, 36, 96>}, {pipeline_mode = #tpu.pipeline_mode<synchronous>, transform_indices = @transform_2, window_bounds = array<i64: 1, 96>}, {pipeline_mode = #tpu.pipeline_mode<synchronous>, transform_indices = @transform_3, window_bounds = array<i64: 2, 16, 32>}, {pipeline_mode = #tpu.pipeline_mode<synchronous>, transform_indices = @transform_4, window_bounds = array<i64: 2, 5, 96, 96>}, {pipeline_mode = #tpu.pipeline_mode<synchronous>, transform_indices = @transform_5, window_bounds = array<i64: 1, 96>}, {pipeline_mode = #tpu.pipeline_mode<synchronous>, transform_indices = @transform_6, window_bounds = array<i64: 2, 6, 12>}, {pipeline_mode = #tpu.pipeline_mode<synchronous>, transform_indices = @transform_7, window_bounds = array<i64: 6, 96, 576>}, {pipeline_mode = #tpu.pipeline_mode<synchronous>, transform_indices = @transform_8, window_bounds = array<i64: 1, 576>}, {pipeline_mode = #tpu.pipeline_mode<synchronous>, transform_indices = @transform_9, window_bounds = array<i64: 576, 84>}, {pipeline_mode = #tpu.pipeline_mode<synchronous>, transform_indices = @transform_10, window_bounds = array<i64: 1, 84>}, {pipeline_mode = #tpu.pipeline_mode<synchronous>, transform_indices = @transform_11, window_bounds = array<i64: 1, 84>}, {pipeline_mode = #tpu.pipeline_mode<synchronous>, transform_indices = @transform_12, window_bounds = array<i64: 1, 1>}, {transform_indices = @transform_13, window_bounds = array<i64: 1, 1, 1>}]} {
    %cst = arith.constant 0.000000e+00 : f32
    %0 = vector.broadcast %cst : f32 to vector<32x96xf32>
    %cst_0 = arith.constant 0.000000e+00 : f32
    %1 = vector.broadcast %cst_0 : f32 to vector<32x96xf32>
    %c0 = arith.constant 0 : index
    %c0_1 = arith.constant 0 : index
    %c0_2 = arith.constant 0 : index
    %2 = vector.load %arg1[%c0, %c0_1, %c0_2] : memref<1x36x36xf32, #tpu.memory_space<vmem>>, vector<1x32x36xf32>
    %3 = vector.shape_cast %2 : vector<1x32x36xf32> to vector<32x36xf32>
    %c0_3 = arith.constant 0 : index
    %c0_4 = arith.constant 0 : index
    %c0_5 = arith.constant 0 : index
    %c0_6 = arith.constant 0 : index
    %4 = vector.load %arg2[%c0_3, %c0_4, %c0_5, %c0_6] : memref<2x5x36x96xf32, #tpu.memory_space<vmem>>, vector<1x1x36x96xf32>
    %5 = vector.shape_cast %4 : vector<1x1x36x96xf32> to vector<36x96xf32>
    %cst_7 = arith.constant dense<0.000000e+00> : vector<32x96xf32>
    %6 = tpu.matmul %3, %5, %cst_7 {dimension_numbers = #tpu.dot_dimension_numbers<[1], [0], [0], [1], [0, 0, 1, 1], [], []>} : vector<32x36xf32>, vector<36x96xf32>, vector<32x96xf32> -> vector<32x96xf32>
    %7 = arith.addf %0, %6 : vector<32x96xf32>
    %c1 = arith.constant 1 : index
    %c0_8 = arith.constant 0 : index
    %c0_9 = arith.constant 0 : index
    %c0_10 = arith.constant 0 : index
    %8 = vector.load %arg2[%c1, %c0_8, %c0_9, %c0_10] : memref<2x5x36x96xf32, #tpu.memory_space<vmem>>, vector<1x1x36x96xf32>
    %9 = vector.shape_cast %8 : vector<1x1x36x96xf32> to vector<36x96xf32>
    %cst_11 = arith.constant dense<0.000000e+00> : vector<32x96xf32>
    %10 = tpu.matmul %3, %9, %cst_11 {dimension_numbers = #tpu.dot_dimension_numbers<[1], [0], [0], [1], [0, 0, 1, 1], [], []>} : vector<32x36xf32>, vector<36x96xf32>, vector<32x96xf32> -> vector<32x96xf32>
    %11 = arith.addf %1, %10 : vector<32x96xf32>
    %c0_12 = arith.constant 0 : index
    %c1_13 = arith.constant 1 : index
    %c0_14 = arith.constant 0 : index
    %12 = vector.load %arg1[%c0_12, %c1_13, %c0_14] : memref<1x36x36xf32, #tpu.memory_space<vmem>>, vector<1x32x36xf32>
    %13 = vector.shape_cast %12 : vector<1x32x36xf32> to vector<32x36xf32>
    %c0_15 = arith.constant 0 : index
    %c1_16 = arith.constant 1 : index
    %c0_17 = arith.constant 0 : index
    %c0_18 = arith.constant 0 : index
    %14 = vector.load %arg2[%c0_15, %c1_16, %c0_17, %c0_18] : memref<2x5x36x96xf32, #tpu.memory_space<vmem>>, vector<1x1x36x96xf32>
    %15 = vector.shape_cast %14 : vector<1x1x36x96xf32> to vector<36x96xf32>
    %cst_19 = arith.constant dense<0.000000e+00> : vector<32x96xf32>
    %16 = tpu.matmul %13, %15, %cst_19 {dimension_numbers = #tpu.dot_dimension_numbers<[1], [0], [0], [1], [0, 0, 1, 1], [], []>} : vector<32x36xf32>, vector<36x96xf32>, vector<32x96xf32> -> vector<32x96xf32>
    %17 = arith.addf %7, %16 : vector<32x96xf32>
    %c1_20 = arith.constant 1 : index
    %c1_21 = arith.constant 1 : index
    %c0_22 = arith.constant 0 : index
    %c0_23 = arith.constant 0 : index
    %18 = vector.load %arg2[%c1_20, %c1_21, %c0_22, %c0_23] : memref<2x5x36x96xf32, #tpu.memory_space<vmem>>, vector<1x1x36x96xf32>
    %19 = vector.shape_cast %18 : vector<1x1x36x96xf32> to vector<36x96xf32>
    %cst_24 = arith.constant dense<0.000000e+00> : vector<32x96xf32>
    %20 = tpu.matmul %13, %19, %cst_24 {dimension_numbers = #tpu.dot_dimension_numbers<[1], [0], [0], [1], [0, 0, 1, 1], [], []>} : vector<32x36xf32>, vector<36x96xf32>, vector<32x96xf32> -> vector<32x96xf32>
    %21 = arith.addf %11, %20 : vector<32x96xf32>
    %c0_25 = arith.constant 0 : index
    %c2 = arith.constant 2 : index
    %c0_26 = arith.constant 0 : index
    %22 = vector.load %arg1[%c0_25, %c2, %c0_26] : memref<1x36x36xf32, #tpu.memory_space<vmem>>, vector<1x32x36xf32>
    %23 = vector.shape_cast %22 : vector<1x32x36xf32> to vector<32x36xf32>
    %c0_27 = arith.constant 0 : index
    %c2_28 = arith.constant 2 : index
    %c0_29 = arith.constant 0 : index
    %c0_30 = arith.constant 0 : index
    %24 = vector.load %arg2[%c0_27, %c2_28, %c0_29, %c0_30] : memref<2x5x36x96xf32, #tpu.memory_space<vmem>>, vector<1x1x36x96xf32>
    %25 = vector.shape_cast %24 : vector<1x1x36x96xf32> to vector<36x96xf32>
    %cst_31 = arith.constant dense<0.000000e+00> : vector<32x96xf32>
    %26 = tpu.matmul %23, %25, %cst_31 {dimension_numbers = #tpu.dot_dimension_numbers<[1], [0], [0], [1], [0, 0, 1, 1], [], []>} : vector<32x36xf32>, vector<36x96xf32>, vector<32x96xf32> -> vector<32x96xf32>
    %27 = arith.addf %17, %26 : vector<32x96xf32>
    %c1_32 = arith.constant 1 : index
    %c2_33 = arith.constant 2 : index
    %c0_34 = arith.constant 0 : index
    %c0_35 = arith.constant 0 : index
    %28 = vector.load %arg2[%c1_32, %c2_33, %c0_34, %c0_35] : memref<2x5x36x96xf32, #tpu.memory_space<vmem>>, vector<1x1x36x96xf32>
    %29 = vector.shape_cast %28 : vector<1x1x36x96xf32> to vector<36x96xf32>
    %cst_36 = arith.constant dense<0.000000e+00> : vector<32x96xf32>
    %30 = tpu.matmul %23, %29, %cst_36 {dimension_numbers = #tpu.dot_dimension_numbers<[1], [0], [0], [1], [0, 0, 1, 1], [], []>} : vector<32x36xf32>, vector<36x96xf32>, vector<32x96xf32> -> vector<32x96xf32>
    %31 = arith.addf %21, %30 : vector<32x96xf32>
    %c0_37 = arith.constant 0 : index
    %c3 = arith.constant 3 : index
    %c0_38 = arith.constant 0 : index
    %32 = vector.load %arg1[%c0_37, %c3, %c0_38] : memref<1x36x36xf32, #tpu.memory_space<vmem>>, vector<1x32x36xf32>
    %33 = vector.shape_cast %32 : vector<1x32x36xf32> to vector<32x36xf32>
    %c0_39 = arith.constant 0 : index
    %c3_40 = arith.constant 3 : index
    %c0_41 = arith.constant 0 : index
    %c0_42 = arith.constant 0 : index
    %34 = vector.load %arg2[%c0_39, %c3_40, %c0_41, %c0_42] : memref<2x5x36x96xf32, #tpu.memory_space<vmem>>, vector<1x1x36x96xf32>
    %35 = vector.shape_cast %34 : vector<1x1x36x96xf32> to vector<36x96xf32>
    %cst_43 = arith.constant dense<0.000000e+00> : vector<32x96xf32>
    %36 = tpu.matmul %33, %35, %cst_43 {dimension_numbers = #tpu.dot_dimension_numbers<[1], [0], [0], [1], [0, 0, 1, 1], [], []>} : vector<32x36xf32>, vector<36x96xf32>, vector<32x96xf32> -> vector<32x96xf32>
    %37 = arith.addf %27, %36 : vector<32x96xf32>
    %c1_44 = arith.constant 1 : index
    %c3_45 = arith.constant 3 : index
    %c0_46 = arith.constant 0 : index
    %c0_47 = arith.constant 0 : index
    %38 = vector.load %arg2[%c1_44, %c3_45, %c0_46, %c0_47] : memref<2x5x36x96xf32, #tpu.memory_space<vmem>>, vector<1x1x36x96xf32>
    %39 = vector.shape_cast %38 : vector<1x1x36x96xf32> to vector<36x96xf32>
    %cst_48 = arith.constant dense<0.000000e+00> : vector<32x96xf32>
    %40 = tpu.matmul %33, %39, %cst_48 {dimension_numbers = #tpu.dot_dimension_numbers<[1], [0], [0], [1], [0, 0, 1, 1], [], []>} : vector<32x36xf32>, vector<36x96xf32>, vector<32x96xf32> -> vector<32x96xf32>
    %41 = arith.addf %31, %40 : vector<32x96xf32>
    %c0_49 = arith.constant 0 : index
    %c4 = arith.constant 4 : index
    %c0_50 = arith.constant 0 : index
    %42 = vector.load %arg1[%c0_49, %c4, %c0_50] : memref<1x36x36xf32, #tpu.memory_space<vmem>>, vector<1x32x36xf32>
    %43 = vector.shape_cast %42 : vector<1x32x36xf32> to vector<32x36xf32>
    %c0_51 = arith.constant 0 : index
    %c4_52 = arith.constant 4 : index
    %c0_53 = arith.constant 0 : index
    %c0_54 = arith.constant 0 : index
    %44 = vector.load %arg2[%c0_51, %c4_52, %c0_53, %c0_54] : memref<2x5x36x96xf32, #tpu.memory_space<vmem>>, vector<1x1x36x96xf32>
    %45 = vector.shape_cast %44 : vector<1x1x36x96xf32> to vector<36x96xf32>
    %cst_55 = arith.constant dense<0.000000e+00> : vector<32x96xf32>
    %46 = tpu.matmul %43, %45, %cst_55 {dimension_numbers = #tpu.dot_dimension_numbers<[1], [0], [0], [1], [0, 0, 1, 1], [], []>} : vector<32x36xf32>, vector<36x96xf32>, vector<32x96xf32> -> vector<32x96xf32>
    %47 = arith.addf %37, %46 : vector<32x96xf32>
    %c1_56 = arith.constant 1 : index
    %c4_57 = arith.constant 4 : index
    %c0_58 = arith.constant 0 : index
    %c0_59 = arith.constant 0 : index
    %48 = vector.load %arg2[%c1_56, %c4_57, %c0_58, %c0_59] : memref<2x5x36x96xf32, #tpu.memory_space<vmem>>, vector<1x1x36x96xf32>
    %49 = vector.shape_cast %48 : vector<1x1x36x96xf32> to vector<36x96xf32>
    %cst_60 = arith.constant dense<0.000000e+00> : vector<32x96xf32>
    %50 = tpu.matmul %43, %49, %cst_60 {dimension_numbers = #tpu.dot_dimension_numbers<[1], [0], [0], [1], [0, 0, 1, 1], [], []>} : vector<32x36xf32>, vector<36x96xf32>, vector<32x96xf32> -> vector<32x96xf32>
    %51 = arith.addf %41, %50 : vector<32x96xf32>
    %52 = arith.maximumf %47, %51 : vector<32x96xf32>
    %c0_61 = arith.constant 0 : index
    %c0_62 = arith.constant 0 : index
    %53 = vector.load %arg3[%c0_61, %c0_62] : memref<1x96xf32, #tpu.memory_space<vmem>>, vector<1x96xf32>
    %54 = vector.broadcast %53 : vector<1x96xf32> to vector<32x96xf32>
    %55 = arith.addf %52, %54 : vector<32x96xf32>
    %cst_63 = arith.constant 0.000000e+00 : f32
    %56 = vector.broadcast %cst_63 : f32 to vector<32x96xf32>
    %57 = arith.maximumf %55, %56 : vector<32x96xf32>
    %c0_64 = arith.constant 0 : index
    %c0_65 = arith.constant 0 : index
    %c0_66 = arith.constant 0 : index
    %58 = vector.load %arg4[%c0_64, %c0_65, %c0_66] : memref<2x16x32xf32, #tpu.memory_space<vmem>>, vector<1x16x32xf32>
    %59 = vector.shape_cast %58 : vector<1x16x32xf32> to vector<16x32xf32>
    %cst_67 = arith.constant dense<0.000000e+00> : vector<16x96xf32>
    %60 = tpu.matmul %59, %57, %cst_67 {dimension_numbers = #tpu.dot_dimension_numbers<[1], [0], [0], [1], [0, 0, 1, 1], [], []>} : vector<16x32xf32>, vector<32x96xf32>, vector<16x96xf32> -> vector<16x96xf32>
    %c1_68 = arith.constant 1 : index
    %c0_69 = arith.constant 0 : index
    %c0_70 = arith.constant 0 : index
    %61 = vector.load %arg4[%c1_68, %c0_69, %c0_70] : memref<2x16x32xf32, #tpu.memory_space<vmem>>, vector<1x16x32xf32>
    %62 = vector.shape_cast %61 : vector<1x16x32xf32> to vector<16x32xf32>
    %cst_71 = arith.constant dense<0.000000e+00> : vector<16x96xf32>
    %63 = tpu.matmul %62, %57, %cst_71 {dimension_numbers = #tpu.dot_dimension_numbers<[1], [0], [0], [1], [0, 0, 1, 1], [], []>} : vector<16x32xf32>, vector<32x96xf32>, vector<16x96xf32> -> vector<16x96xf32>
    %64 = arith.maximumf %60, %63 : vector<16x96xf32>
    %cst_72 = arith.constant 0.000000e+00 : f32
    %65 = vector.broadcast %cst_72 : f32 to vector<12x96xf32>
    %cst_73 = arith.constant 0.000000e+00 : f32
    %66 = vector.broadcast %cst_73 : f32 to vector<12x96xf32>
    %67 = vector.extract_strided_slice %64 {offsets = [0, 0], sizes = [12, 96], strides = [1, 1]} : vector<16x96xf32> to vector<12x96xf32>
    %c0_74 = arith.constant 0 : index
    %c0_75 = arith.constant 0 : index
    %c0_76 = arith.constant 0 : index
    %c0_77 = arith.constant 0 : index
    %68 = vector.load %arg5[%c0_74, %c0_75, %c0_76, %c0_77] : memref<2x5x96x96xf32, #tpu.memory_space<vmem>>, vector<1x1x96x96xf32>
    %69 = vector.shape_cast %68 : vector<1x1x96x96xf32> to vector<96x96xf32>
    %cst_78 = arith.constant dense<0.000000e+00> : vector<12x96xf32>
    %70 = tpu.matmul %67, %69, %cst_78 {dimension_numbers = #tpu.dot_dimension_numbers<[1], [0], [0], [1], [0, 0, 1, 1], [], []>} : vector<12x96xf32>, vector<96x96xf32>, vector<12x96xf32> -> vector<12x96xf32>
    %71 = arith.addf %65, %70 : vector<12x96xf32>
    %c1_79 = arith.constant 1 : index
    %c0_80 = arith.constant 0 : index
    %c0_81 = arith.constant 0 : index
    %c0_82 = arith.constant 0 : index
    %72 = vector.load %arg5[%c1_79, %c0_80, %c0_81, %c0_82] : memref<2x5x96x96xf32, #tpu.memory_space<vmem>>, vector<1x1x96x96xf32>
    %73 = vector.shape_cast %72 : vector<1x1x96x96xf32> to vector<96x96xf32>
    %cst_83 = arith.constant dense<0.000000e+00> : vector<12x96xf32>
    %74 = tpu.matmul %67, %73, %cst_83 {dimension_numbers = #tpu.dot_dimension_numbers<[1], [0], [0], [1], [0, 0, 1, 1], [], []>} : vector<12x96xf32>, vector<96x96xf32>, vector<12x96xf32> -> vector<12x96xf32>
    %75 = arith.addf %66, %74 : vector<12x96xf32>
    %76 = vector.extract_strided_slice %64 {offsets = [1, 0], sizes = [12, 96], strides = [1, 1]} : vector<16x96xf32> to vector<12x96xf32>
    %c0_84 = arith.constant 0 : index
    %c1_85 = arith.constant 1 : index
    %c0_86 = arith.constant 0 : index
    %c0_87 = arith.constant 0 : index
    %77 = vector.load %arg5[%c0_84, %c1_85, %c0_86, %c0_87] : memref<2x5x96x96xf32, #tpu.memory_space<vmem>>, vector<1x1x96x96xf32>
    %78 = vector.shape_cast %77 : vector<1x1x96x96xf32> to vector<96x96xf32>
    %cst_88 = arith.constant dense<0.000000e+00> : vector<12x96xf32>
    %79 = tpu.matmul %76, %78, %cst_88 {dimension_numbers = #tpu.dot_dimension_numbers<[1], [0], [0], [1], [0, 0, 1, 1], [], []>} : vector<12x96xf32>, vector<96x96xf32>, vector<12x96xf32> -> vector<12x96xf32>
    %80 = arith.addf %71, %79 : vector<12x96xf32>
    %c1_89 = arith.constant 1 : index
    %c1_90 = arith.constant 1 : index
    %c0_91 = arith.constant 0 : index
    %c0_92 = arith.constant 0 : index
    %81 = vector.load %arg5[%c1_89, %c1_90, %c0_91, %c0_92] : memref<2x5x96x96xf32, #tpu.memory_space<vmem>>, vector<1x1x96x96xf32>
    %82 = vector.shape_cast %81 : vector<1x1x96x96xf32> to vector<96x96xf32>
    %cst_93 = arith.constant dense<0.000000e+00> : vector<12x96xf32>
    %83 = tpu.matmul %76, %82, %cst_93 {dimension_numbers = #tpu.dot_dimension_numbers<[1], [0], [0], [1], [0, 0, 1, 1], [], []>} : vector<12x96xf32>, vector<96x96xf32>, vector<12x96xf32> -> vector<12x96xf32>
    %84 = arith.addf %75, %83 : vector<12x96xf32>
    %85 = vector.extract_strided_slice %64 {offsets = [2, 0], sizes = [12, 96], strides = [1, 1]} : vector<16x96xf32> to vector<12x96xf32>
    %c0_94 = arith.constant 0 : index
    %c2_95 = arith.constant 2 : index
    %c0_96 = arith.constant 0 : index
    %c0_97 = arith.constant 0 : index
    %86 = vector.load %arg5[%c0_94, %c2_95, %c0_96, %c0_97] : memref<2x5x96x96xf32, #tpu.memory_space<vmem>>, vector<1x1x96x96xf32>
    %87 = vector.shape_cast %86 : vector<1x1x96x96xf32> to vector<96x96xf32>
    %cst_98 = arith.constant dense<0.000000e+00> : vector<12x96xf32>
    %88 = tpu.matmul %85, %87, %cst_98 {dimension_numbers = #tpu.dot_dimension_numbers<[1], [0], [0], [1], [0, 0, 1, 1], [], []>} : vector<12x96xf32>, vector<96x96xf32>, vector<12x96xf32> -> vector<12x96xf32>
    %89 = arith.addf %80, %88 : vector<12x96xf32>
    %c1_99 = arith.constant 1 : index
    %c2_100 = arith.constant 2 : index
    %c0_101 = arith.constant 0 : index
    %c0_102 = arith.constant 0 : index
    %90 = vector.load %arg5[%c1_99, %c2_100, %c0_101, %c0_102] : memref<2x5x96x96xf32, #tpu.memory_space<vmem>>, vector<1x1x96x96xf32>
    %91 = vector.shape_cast %90 : vector<1x1x96x96xf32> to vector<96x96xf32>
    %cst_103 = arith.constant dense<0.000000e+00> : vector<12x96xf32>
    %92 = tpu.matmul %85, %91, %cst_103 {dimension_numbers = #tpu.dot_dimension_numbers<[1], [0], [0], [1], [0, 0, 1, 1], [], []>} : vector<12x96xf32>, vector<96x96xf32>, vector<12x96xf32> -> vector<12x96xf32>
    %93 = arith.addf %84, %92 : vector<12x96xf32>
    %94 = vector.extract_strided_slice %64 {offsets = [3, 0], sizes = [12, 96], strides = [1, 1]} : vector<16x96xf32> to vector<12x96xf32>
    %c0_104 = arith.constant 0 : index
    %c3_105 = arith.constant 3 : index
    %c0_106 = arith.constant 0 : index
    %c0_107 = arith.constant 0 : index
    %95 = vector.load %arg5[%c0_104, %c3_105, %c0_106, %c0_107] : memref<2x5x96x96xf32, #tpu.memory_space<vmem>>, vector<1x1x96x96xf32>
    %96 = vector.shape_cast %95 : vector<1x1x96x96xf32> to vector<96x96xf32>
    %cst_108 = arith.constant dense<0.000000e+00> : vector<12x96xf32>
    %97 = tpu.matmul %94, %96, %cst_108 {dimension_numbers = #tpu.dot_dimension_numbers<[1], [0], [0], [1], [0, 0, 1, 1], [], []>} : vector<12x96xf32>, vector<96x96xf32>, vector<12x96xf32> -> vector<12x96xf32>
    %98 = arith.addf %89, %97 : vector<12x96xf32>
    %c1_109 = arith.constant 1 : index
    %c3_110 = arith.constant 3 : index
    %c0_111 = arith.constant 0 : index
    %c0_112 = arith.constant 0 : index
    %99 = vector.load %arg5[%c1_109, %c3_110, %c0_111, %c0_112] : memref<2x5x96x96xf32, #tpu.memory_space<vmem>>, vector<1x1x96x96xf32>
    %100 = vector.shape_cast %99 : vector<1x1x96x96xf32> to vector<96x96xf32>
    %cst_113 = arith.constant dense<0.000000e+00> : vector<12x96xf32>
    %101 = tpu.matmul %94, %100, %cst_113 {dimension_numbers = #tpu.dot_dimension_numbers<[1], [0], [0], [1], [0, 0, 1, 1], [], []>} : vector<12x96xf32>, vector<96x96xf32>, vector<12x96xf32> -> vector<12x96xf32>
    %102 = arith.addf %93, %101 : vector<12x96xf32>
    %103 = vector.extract_strided_slice %64 {offsets = [4, 0], sizes = [12, 96], strides = [1, 1]} : vector<16x96xf32> to vector<12x96xf32>
    %c0_114 = arith.constant 0 : index
    %c4_115 = arith.constant 4 : index
    %c0_116 = arith.constant 0 : index
    %c0_117 = arith.constant 0 : index
    %104 = vector.load %arg5[%c0_114, %c4_115, %c0_116, %c0_117] : memref<2x5x96x96xf32, #tpu.memory_space<vmem>>, vector<1x1x96x96xf32>
    %105 = vector.shape_cast %104 : vector<1x1x96x96xf32> to vector<96x96xf32>
    %cst_118 = arith.constant dense<0.000000e+00> : vector<12x96xf32>
    %106 = tpu.matmul %103, %105, %cst_118 {dimension_numbers = #tpu.dot_dimension_numbers<[1], [0], [0], [1], [0, 0, 1, 1], [], []>} : vector<12x96xf32>, vector<96x96xf32>, vector<12x96xf32> -> vector<12x96xf32>
    %107 = arith.addf %98, %106 : vector<12x96xf32>
    %c1_119 = arith.constant 1 : index
    %c4_120 = arith.constant 4 : index
    %c0_121 = arith.constant 0 : index
    %c0_122 = arith.constant 0 : index
    %108 = vector.load %arg5[%c1_119, %c4_120, %c0_121, %c0_122] : memref<2x5x96x96xf32, #tpu.memory_space<vmem>>, vector<1x1x96x96xf32>
    %109 = vector.shape_cast %108 : vector<1x1x96x96xf32> to vector<96x96xf32>
    %cst_123 = arith.constant dense<0.000000e+00> : vector<12x96xf32>
    %110 = tpu.matmul %103, %109, %cst_123 {dimension_numbers = #tpu.dot_dimension_numbers<[1], [0], [0], [1], [0, 0, 1, 1], [], []>} : vector<12x96xf32>, vector<96x96xf32>, vector<12x96xf32> -> vector<12x96xf32>
    %111 = arith.addf %102, %110 : vector<12x96xf32>
    %112 = arith.maximumf %107, %111 : vector<12x96xf32>
    %c0_124 = arith.constant 0 : index
    %c0_125 = arith.constant 0 : index
    %113 = vector.load %arg6[%c0_124, %c0_125] : memref<1x96xf32, #tpu.memory_space<vmem>>, vector<1x96xf32>
    %114 = vector.broadcast %113 : vector<1x96xf32> to vector<12x96xf32>
    %115 = arith.addf %112, %114 : vector<12x96xf32>
    %cst_126 = arith.constant 0.000000e+00 : f32
    %116 = vector.broadcast %cst_126 : f32 to vector<12x96xf32>
    %117 = arith.maximumf %115, %116 : vector<12x96xf32>
    %c0_127 = arith.constant 0 : index
    %c0_128 = arith.constant 0 : index
    %c0_129 = arith.constant 0 : index
    %118 = vector.load %arg7[%c0_127, %c0_128, %c0_129] : memref<2x6x12xf32, #tpu.memory_space<vmem>>, vector<1x6x12xf32>
    %119 = vector.shape_cast %118 : vector<1x6x12xf32> to vector<6x12xf32>
    %cst_130 = arith.constant dense<0.000000e+00> : vector<6x96xf32>
    %120 = tpu.matmul %119, %117, %cst_130 {dimension_numbers = #tpu.dot_dimension_numbers<[1], [0], [0], [1], [0, 0, 1, 1], [], []>} : vector<6x12xf32>, vector<12x96xf32>, vector<6x96xf32> -> vector<6x96xf32>
    %c1_131 = arith.constant 1 : index
    %c0_132 = arith.constant 0 : index
    %c0_133 = arith.constant 0 : index
    %121 = vector.load %arg7[%c1_131, %c0_132, %c0_133] : memref<2x6x12xf32, #tpu.memory_space<vmem>>, vector<1x6x12xf32>
    %122 = vector.shape_cast %121 : vector<1x6x12xf32> to vector<6x12xf32>
    %cst_134 = arith.constant dense<0.000000e+00> : vector<6x96xf32>
    %123 = tpu.matmul %122, %117, %cst_134 {dimension_numbers = #tpu.dot_dimension_numbers<[1], [0], [0], [1], [0, 0, 1, 1], [], []>} : vector<6x12xf32>, vector<12x96xf32>, vector<6x96xf32> -> vector<6x96xf32>
    %124 = arith.maximumf %120, %123 : vector<6x96xf32>
    %cst_135 = arith.constant 0.000000e+00 : f32
    %125 = vector.broadcast %cst_135 : f32 to vector<1x576xf32>
    %126 = vector.extract_strided_slice %124 {offsets = [0, 0], sizes = [1, 96], strides = [1, 1]} : vector<6x96xf32> to vector<1x96xf32>
    %c0_136 = arith.constant 0 : index
    %c0_137 = arith.constant 0 : index
    %c0_138 = arith.constant 0 : index
    %127 = vector.load %arg8[%c0_136, %c0_137, %c0_138] : memref<6x96x576xf32, #tpu.memory_space<vmem>>, vector<1x96x576xf32>
    %128 = vector.shape_cast %127 : vector<1x96x576xf32> to vector<96x576xf32>
    %cst_139 = arith.constant dense<0.000000e+00> : vector<1x576xf32>
    %129 = tpu.matmul %126, %128, %cst_139 {dimension_numbers = #tpu.dot_dimension_numbers<[1], [0], [0], [1], [0, 0, 1, 1], [], []>} : vector<1x96xf32>, vector<96x576xf32>, vector<1x576xf32> -> vector<1x576xf32>
    %130 = arith.addf %125, %129 : vector<1x576xf32>
    %131 = vector.extract_strided_slice %124 {offsets = [1, 0], sizes = [1, 96], strides = [1, 1]} : vector<6x96xf32> to vector<1x96xf32>
    %c1_140 = arith.constant 1 : index
    %c0_141 = arith.constant 0 : index
    %c0_142 = arith.constant 0 : index
    %132 = vector.load %arg8[%c1_140, %c0_141, %c0_142] : memref<6x96x576xf32, #tpu.memory_space<vmem>>, vector<1x96x576xf32>
    %133 = vector.shape_cast %132 : vector<1x96x576xf32> to vector<96x576xf32>
    %cst_143 = arith.constant dense<0.000000e+00> : vector<1x576xf32>
    %134 = tpu.matmul %131, %133, %cst_143 {dimension_numbers = #tpu.dot_dimension_numbers<[1], [0], [0], [1], [0, 0, 1, 1], [], []>} : vector<1x96xf32>, vector<96x576xf32>, vector<1x576xf32> -> vector<1x576xf32>
    %135 = arith.addf %130, %134 : vector<1x576xf32>
    %136 = vector.extract_strided_slice %124 {offsets = [2, 0], sizes = [1, 96], strides = [1, 1]} : vector<6x96xf32> to vector<1x96xf32>
    %c2_144 = arith.constant 2 : index
    %c0_145 = arith.constant 0 : index
    %c0_146 = arith.constant 0 : index
    %137 = vector.load %arg8[%c2_144, %c0_145, %c0_146] : memref<6x96x576xf32, #tpu.memory_space<vmem>>, vector<1x96x576xf32>
    %138 = vector.shape_cast %137 : vector<1x96x576xf32> to vector<96x576xf32>
    %cst_147 = arith.constant dense<0.000000e+00> : vector<1x576xf32>
    %139 = tpu.matmul %136, %138, %cst_147 {dimension_numbers = #tpu.dot_dimension_numbers<[1], [0], [0], [1], [0, 0, 1, 1], [], []>} : vector<1x96xf32>, vector<96x576xf32>, vector<1x576xf32> -> vector<1x576xf32>
    %140 = arith.addf %135, %139 : vector<1x576xf32>
    %141 = vector.extract_strided_slice %124 {offsets = [3, 0], sizes = [1, 96], strides = [1, 1]} : vector<6x96xf32> to vector<1x96xf32>
    %c3_148 = arith.constant 3 : index
    %c0_149 = arith.constant 0 : index
    %c0_150 = arith.constant 0 : index
    %142 = vector.load %arg8[%c3_148, %c0_149, %c0_150] : memref<6x96x576xf32, #tpu.memory_space<vmem>>, vector<1x96x576xf32>
    %143 = vector.shape_cast %142 : vector<1x96x576xf32> to vector<96x576xf32>
    %cst_151 = arith.constant dense<0.000000e+00> : vector<1x576xf32>
    %144 = tpu.matmul %141, %143, %cst_151 {dimension_numbers = #tpu.dot_dimension_numbers<[1], [0], [0], [1], [0, 0, 1, 1], [], []>} : vector<1x96xf32>, vector<96x576xf32>, vector<1x576xf32> -> vector<1x576xf32>
    %145 = arith.addf %140, %144 : vector<1x576xf32>
    %146 = vector.extract_strided_slice %124 {offsets = [4, 0], sizes = [1, 96], strides = [1, 1]} : vector<6x96xf32> to vector<1x96xf32>
    %c4_152 = arith.constant 4 : index
    %c0_153 = arith.constant 0 : index
    %c0_154 = arith.constant 0 : index
    %147 = vector.load %arg8[%c4_152, %c0_153, %c0_154] : memref<6x96x576xf32, #tpu.memory_space<vmem>>, vector<1x96x576xf32>
    %148 = vector.shape_cast %147 : vector<1x96x576xf32> to vector<96x576xf32>
    %cst_155 = arith.constant dense<0.000000e+00> : vector<1x576xf32>
    %149 = tpu.matmul %146, %148, %cst_155 {dimension_numbers = #tpu.dot_dimension_numbers<[1], [0], [0], [1], [0, 0, 1, 1], [], []>} : vector<1x96xf32>, vector<96x576xf32>, vector<1x576xf32> -> vector<1x576xf32>
    %150 = arith.addf %145, %149 : vector<1x576xf32>
    %151 = vector.extract_strided_slice %124 {offsets = [5, 0], sizes = [1, 96], strides = [1, 1]} : vector<6x96xf32> to vector<1x96xf32>
    %c5 = arith.constant 5 : index
    %c0_156 = arith.constant 0 : index
    %c0_157 = arith.constant 0 : index
    %152 = vector.load %arg8[%c5, %c0_156, %c0_157] : memref<6x96x576xf32, #tpu.memory_space<vmem>>, vector<1x96x576xf32>
    %153 = vector.shape_cast %152 : vector<1x96x576xf32> to vector<96x576xf32>
    %cst_158 = arith.constant dense<0.000000e+00> : vector<1x576xf32>
    %154 = tpu.matmul %151, %153, %cst_158 {dimension_numbers = #tpu.dot_dimension_numbers<[1], [0], [0], [1], [0, 0, 1, 1], [], []>} : vector<1x96xf32>, vector<96x576xf32>, vector<1x576xf32> -> vector<1x576xf32>
    %155 = arith.addf %150, %154 : vector<1x576xf32>
    %c0_159 = arith.constant 0 : index
    %c0_160 = arith.constant 0 : index
    %156 = vector.load %arg9[%c0_159, %c0_160] : memref<1x576xf32, #tpu.memory_space<vmem>>, vector<1x576xf32>
    %157 = arith.addf %155, %156 : vector<1x576xf32>
    %cst_161 = arith.constant 0.000000e+00 : f32
    %158 = vector.broadcast %cst_161 : f32 to vector<1x576xf32>
    %159 = arith.maximumf %157, %158 : vector<1x576xf32>
    %c0_162 = arith.constant 0 : index
    %c0_163 = arith.constant 0 : index
    %160 = vector.load %arg10[%c0_162, %c0_163] : memref<576x84xf32, #tpu.memory_space<vmem>>, vector<576x84xf32>
    %cst_164 = arith.constant dense<0.000000e+00> : vector<1x84xf32>
    %161 = tpu.matmul %159, %160, %cst_164 {dimension_numbers = #tpu.dot_dimension_numbers<[1], [0], [0], [1], [0, 0, 1, 1], [], []>} : vector<1x576xf32>, vector<576x84xf32>, vector<1x84xf32> -> vector<1x84xf32>
    %c0_165 = arith.constant 0 : index
    %c0_166 = arith.constant 0 : index
    %162 = vector.load %arg11[%c0_165, %c0_166] : memref<1x84xf32, #tpu.memory_space<vmem>>, vector<1x84xf32>
    %163 = arith.addf %161, %162 : vector<1x84xf32>
    %cst_167 = arith.constant 0.000000e+00 : f32
    %164 = vector.broadcast %cst_167 : f32 to vector<1x84xf32>
    %165 = arith.maximumf %163, %164 : vector<1x84xf32>
    %c0_168 = arith.constant 0 : index
    %c0_169 = arith.constant 0 : index
    %166 = vector.load %arg12[%c0_168, %c0_169] : memref<1x84xf32, #tpu.memory_space<vmem>>, vector<1x84xf32>
    %167 = arith.mulf %165, %166 : vector<1x84xf32>
    %cst_170 = arith.constant dense<0.000000e+00> : vector<1xf32>
    %168 = vector.multi_reduction <add>, %167, %cst_170 [1] : vector<1x84xf32> to vector<1xf32>
    %169 = vector.shape_cast %168 : vector<1xf32> to vector<1x1xf32>
    %c0_171 = arith.constant 0 : index
    %c0_172 = arith.constant 0 : index
    %170 = vector.load %arg13[%c0_171, %c0_172] : memref<1x1xf32, #tpu.memory_space<vmem>>, vector<1x1xf32>
    %171 = arith.addf %169, %170 : vector<1x1xf32>
    %c0_173 = arith.constant 0 : index
    %c0_174 = arith.constant 0 : index
    %c0_175 = arith.constant 0 : index
    %172 = vector.load %arg14[%c0_173, %c0_174, %c0_175] : memref<1x1x1xf32, #tpu.memory_space<vmem>>, vector<1x1x1xf32>
    %173 = vector.shape_cast %172 : vector<1x1x1xf32> to vector<1x1xf32>
    %174 = vector.shape_cast %171 : vector<1x1xf32> to vector<1x1x1xf32>
    tpu.vector_store %arg14[%c0_173, %c0_174, %c0_175], %174 {strides = array<i32>} : memref<1x1x1xf32, #tpu.memory_space<vmem>>, vector<1x1x1xf32>,
    return
  }
  func.func @transform_0(%arg0: i32) -> (i32, i32, i32) {
    %c0_i32 = arith.constant 0 : i32
    %c0_i32_0 = arith.constant 0 : i32
    %c0_i32_1 = arith.constant 0 : i32
    return %arg0, %c0_i32, %c0_i32_0 : i32, i32, i32
  }
  func.func @transform_1(%arg0: i32) -> (i32, i32, i32, i32) {
    %c0_i32 = arith.constant 0 : i32
    %c0_i32_0 = arith.constant 0 : i32
    %c0_i32_1 = arith.constant 0 : i32
    %c0_i32_2 = arith.constant 0 : i32
    %c0_i32_3 = arith.constant 0 : i32
    return %c0_i32, %c0_i32_0, %c0_i32_1, %c0_i32_2 : i32, i32, i32, i32
  }
  func.func @transform_2(%arg0: i32) -> (i32, i32) {
    %c0_i32 = arith.constant 0 : i32
    %c0_i32_0 = arith.constant 0 : i32
    %c0_i32_1 = arith.constant 0 : i32
    return %c0_i32, %c0_i32_0 : i32, i32
  }
  func.func @transform_3(%arg0: i32) -> (i32, i32, i32) {
    %c0_i32 = arith.constant 0 : i32
    %c0_i32_0 = arith.constant 0 : i32
    %c0_i32_1 = arith.constant 0 : i32
    %c0_i32_2 = arith.constant 0 : i32
    return %c0_i32, %c0_i32_0, %c0_i32_1 : i32, i32, i32
  }
  func.func @transform_4(%arg0: i32) -> (i32, i32, i32, i32) {
    %c0_i32 = arith.constant 0 : i32
    %c0_i32_0 = arith.constant 0 : i32
    %c0_i32_1 = arith.constant 0 : i32
    %c0_i32_2 = arith.constant 0 : i32
    %c0_i32_3 = arith.constant 0 : i32
    return %c0_i32, %c0_i32_0, %c0_i32_1, %c0_i32_2 : i32, i32, i32, i32
  }
  func.func @transform_5(%arg0: i32) -> (i32, i32) {
    %c0_i32 = arith.constant 0 : i32
    %c0_i32_0 = arith.constant 0 : i32
    %c0_i32_1 = arith.constant 0 : i32
    return %c0_i32, %c0_i32_0 : i32, i32
  }
  func.func @transform_6(%arg0: i32) -> (i32, i32, i32) {
    %c0_i32 = arith.constant 0 : i32
    %c0_i32_0 = arith.constant 0 : i32
    %c0_i32_1 = arith.constant 0 : i32
    %c0_i32_2 = arith.constant 0 : i32
    return %c0_i32, %c0_i32_0, %c0_i32_1 : i32, i32, i32
  }
  func.func @transform_7(%arg0: i32) -> (i32, i32, i32) {
    %c0_i32 = arith.constant 0 : i32
    %c0_i32_0 = arith.constant 0 : i32
    %c0_i32_1 = arith.constant 0 : i32
    %c0_i32_2 = arith.constant 0 : i32
    return %c0_i32, %c0_i32_0, %c0_i32_1 : i32, i32, i32
  }
  func.func @transform_8(%arg0: i32) -> (i32, i32) {
    %c0_i32 = arith.constant 0 : i32
    %c0_i32_0 = arith.constant 0 : i32
    %c0_i32_1 = arith.constant 0 : i32
    return %c0_i32, %c0_i32_0 : i32, i32
  }
  func.func @transform_9(%arg0: i32) -> (i32, i32) {
    %c0_i32 = arith.constant 0 : i32
    %c0_i32_0 = arith.constant 0 : i32
    %c0_i32_1 = arith.constant 0 : i32
    return %c0_i32, %c0_i32_0 : i32, i32
  }
  func.func @transform_10(%arg0: i32) -> (i32, i32) {
    %c0_i32 = arith.constant 0 : i32
    %c0_i32_0 = arith.constant 0 : i32
    %c0_i32_1 = arith.constant 0 : i32
    return %c0_i32, %c0_i32_0 : i32, i32
  }
  func.func @transform_11(%arg0: i32) -> (i32, i32) {
    %c0_i32 = arith.constant 0 : i32
    %c0_i32_0 = arith.constant 0 : i32
    %c0_i32_1 = arith.constant 0 : i32
    return %c0_i32, %c0_i32_0 : i32, i32
  }
  func.func @transform_12(%arg0: i32) -> (i32, i32) {
    %c0_i32 = arith.constant 0 : i32
    %c0_i32_0 = arith.constant 0 : i32
    %c0_i32_1 = arith.constant 0 : i32
    return %c0_i32, %c0_i32_0 : i32, i32
  }
  func.func @transform_13(%arg0: i32) -> (i32, i32, i32) {
    %c0_i32 = arith.constant 0 : i32
    %c0_i32_0 = arith.constant 0 : i32
    %c0_i32_1 = arith.constant 0 : i32
    return %arg0, %c0_i32, %c0_i32_0 : i32, i32, i32
  }
}

</mosaic_0001>

<bundles_post_ra>
// kernel: tile.13
= control target key start
LH: loop header
LB: loop body
LE: loop exit
PB: predicated region body
PF: predicated region fallthrough
CT: control target
= control target key end

     0   :  { %s28_s0 = inlined_call_operand.vmem [shape: f32[6], index: 0, kind: input, shape index: {}]   ;;  %s29_s1 = inlined_call_operand.vmem [shape: f32[16,6], index: 1, kind: output, shape index: {}]  }
   0x1   :  { %v4_v0 = vld [vmem:[%s28_s0] ss:$0 sm:$0xff] }
   0x2   :  { %5 = vst [vmem:[%s29_s1] sm:$0xff] %v4_v0 }
   0x3   :  { %8 = vst [vmem:[%s29_s1 + $0x8] sm:$0xff] %v4_v0 }

// kernel: tile.14
= control target key start
LH: loop header
LB: loop body
LE: loop exit
PB: predicated region body
PF: predicated region fallthrough
CT: control target
= control target key end

     0   :  { %s131_s10 = smov 90   ;;  %s132_s11 = smov 78   ;;  %vm3_vm0 = vcmask 48128   ;;  %vm9_vm1 = vcmask 786128   ;;  %vm15_vm2 = vcmask 736928   ;;  %vm21_vm3 = vcmask 687728   ;;  %s207_s0 = inlined_call_operand.vmem [shape: f32[16,6], index: 0, kind: input, shape index: {}]   ;;  %s208_s1 = inlined_call_operand.vmem [shape: f32[1,96], index: 1, kind: output, shape index: {}]  }
   0x1   :  { %v101_v0 = vld [vmem:[%s207_s0 + $0xf] sm:$0x1]   ;;  %v103_v1 = vld [vmem:[%s207_s0 + $0xd] sm:$0x1]   ;;  %v105_v2 = vld [vmem:[%s207_s0 + $0xb] sm:$0x1]  }
   0x2   :  { %7 = vrot.lane.b32.xlu0 %v101_v0, %s131_s10  ;;  %19 = vrot.lane.b32.xlu1 %v103_v1, %s132_s11  ;;  %s133_s14 = smov 66   ;;  %v102_v3 = vld [vmem:[%s207_s0 + $0xe] sm:$0x1]   ;;  %v104_v4 = vld [vmem:[%s207_s0 + $0xc] sm:$0x1]   ;;  %s134_s19 = smov 84  }
   0x3   :  { %31 = vrot.lane.b32.xlu2 %v105_v2, %s133_s14  ;;  %s135_s20 = smov 72   ;;  %v106_v5 = vld [vmem:[%s207_s0 + $0xa] sm:$0x1]   ;;  %s136_s23 = smov 60   ;;  %v107_v6 = vld [vmem:[%s207_s0 + $0x9] sm:$0x1]  }
   0x4   :  { %v108_v7 = vld [vmem:[%s207_s0 + $0x8] sm:$0x1]   ;;  %s137_s28 = smov 54   ;;  %s138_s29 = smov 48   ;;  %v109_v8 = vld [vmem:[%s207_s0 + $0x7] sm:$0x1]  }
   0x5   :  { %s139_s3 = smov 42   ;;  %v110_v9 = vld [vmem:[%s207_s0 + $0x6] sm:$0x1]   ;;  %v111_v10 = vld [vmem:[%s207_s0 + $0x5] sm:$0x1]   ;;  %s140_s8 = smov 36  }
   0x6   :  { %s141_s9 = smov 30   ;;  %v112_v11 = vld [vmem:[%s207_s0 + $0x4] sm:$0x1]   ;;  %s142_s12 = smov 24   ;;  %v113_v12 = vld [vmem:[%s207_s0 + $0x3] sm:$0x1]  }
   0x7   :  { %v114_v13 = vld [vmem:[%s207_s0 + $0x2] sm:$0x1]   ;;  %s143_s17 = smov 18   ;;  %s144_s18 = smov 12   ;;  %v115_v14 = vld [vmem:[%s207_s0 + $0x1] sm:$0x1]  }
   0x8   :  { %s145_s21 = smov 6   ;;  %v2_v15 = vld [vmem:[%s207_s0] sm:$0x1]   ;;  %vm27_vm4 = vcmask 638528   ;;  %vm33_vm5 = vcmask 589328   ;;  %vm39_vm6 = vcmask 540128  }
   0x9   :  { %4 = vst.msk [vmem:[#allocation0] sm:$0x1] %vm3_vm0, %v2_v15   ;;  %vm45_vm7 = vcmask 490928   ;;  %vm51_vm8 = vcmask 441728   ;;  %vm57_vm9 = vcmask 392528   ;;  %vm63_vm10 = vcmask 343328  }
   0xa   :  { %13 = vrot.lane.b32.xlu0 %v102_v3, %s134_s19  ;;  %25 = vrot.lane.b32.xlu1 %v104_v4, %s135_s20  ;;  %vm69_vm11 = vcmask 294128   ;;  %vm75_vm12 = vcmask 244928   ;;  %vm81_vm13 = vcmask 195728   ;;  %vm87_vm14 = vcmask 146528  }
   0xb   :  { %37 = vrot.lane.b32.xlu2 %v106_v5, %s136_s23  ;;  %vm93_vm15 = vcmask 97328  }
  0x12   :  { %43 = vrot.lane.b32.xlu0 %v107_v6, %s137_s28  ;;  %49 = vrot.lane.b32.xlu1 %v108_v7, %s138_s29 }
  0x13   :  { %55 = vrot.lane.b32.xlu2 %v109_v8, %s139_s3 }
  0x1a   :  { %61 = vrot.lane.b32.xlu0 %v110_v9, %s140_s8  ;;  %67 = vrot.lane.b32.xlu1 %v111_v10, %s141_s9 }
  0x1b   :  { %73 = vrot.lane.b32.xlu2 %v112_v11, %s142_s12 }
  0x22   :  { %79 = vrot.lane.b32.xlu0 %v113_v12, %s143_s17  ;;  %85 = vrot.lane.b32.xlu1 %v114_v13, %s144_s18 }
  0x23   :  { %91 = vrot.lane.b32.xlu2 %v115_v14, %s145_s21 }
  0x5d   :  { %v32_v16 = vpop.permute.xlu2 %31  }
  0x65   :  { %v38_v17 = vpop.permute.xlu2 %37  }
  0x6d   :  { %v56_v18 = vpop.permute.xlu2 %55  }
  0x74   :  { %v8_v19 = vpop.permute.xlu0 %7   ;;  %v20_v20 = vpop.permute.xlu1 %19  }
  0x75   :  { %10 = vst.msk [vmem:[#allocation0] sm:$0x1] %vm9_vm1, %v8_v19   ;;  %v74_v21 = vpop.permute.xlu2 %73  }
  0x7c   :  { %v14_v22 = vpop.permute.xlu0 %13   ;;  %v26_v23 = vpop.permute.xlu1 %25  }
  0x7d   :  { %16 = vst.msk [vmem:[#allocation0] sm:$0x1] %vm15_vm2, %v14_v22   ;;  %v92_v24 = vpop.permute.xlu2 %91  }
  0x7e   :  { %22 = vst.msk [vmem:[#allocation0] sm:$0x1] %vm21_vm3, %v20_v20  }
  0x7f   :  { %28 = vst.msk [vmem:[#allocation0] sm:$0x1] %vm27_vm4, %v26_v23  }
  0x80   :  { %34 = vst.msk [vmem:[#allocation0] sm:$0x1] %vm33_vm5, %v32_v16  }
  0x81   :  { %40 = vst.msk [vmem:[#allocation0] sm:$0x1] %vm39_vm6, %v38_v17  }
  0x84   :  { %v44_v25 = vpop.permute.xlu0 %43   ;;  %v50_v26 = vpop.permute.xlu1 %49  }
  0x85   :  { %46 = vst.msk [vmem:[#allocation0] sm:$0x1] %vm45_vm7, %v44_v25  }
  0x86   :  { %52 = vst.msk [vmem:[#allocation0] sm:$0x1] %vm51_vm8, %v50_v26  }
  0x87   :  { %58 = vst.msk [vmem:[#allocation0] sm:$0x1] %vm57_vm9, %v56_v18  }
  0x8c   :  { %v62_v27 = vpop.permute.xlu0 %61   ;;  %v68_v28 = vpop.permute.xlu1 %67  }
  0x8d   :  { %64 = vst.msk [vmem:[#allocation0] sm:$0x1] %vm63_vm10, %v62_v27  }
  0x8e   :  { %70 = vst.msk [vmem:[#allocation0] sm:$0x1] %vm69_vm11, %v68_v28  }
  0x8f   :  { %76 = vst.msk [vmem:[#allocation0] sm:$0x1] %vm75_vm12, %v74_v21  }
  0x94   :  { %v80_v29 = vpop.permute.xlu0 %79   ;;  %v86_v30 = vpop.permute.xlu1 %85  }
  0x95   :  { %82 = vst.msk [vmem:[#allocation0] sm:$0x1] %vm81_vm13, %v80_v29  }
  0x96   :  { %88 = vst.msk [vmem:[#allocation0] sm:$0x1] %vm87_vm14, %v86_v30  }
  0x97   :  { %94 = vst.msk [vmem:[#allocation0] sm:$0x1] %vm93_vm15, %v92_v24  }
  0x9e   :  { %v97_v31 = vld [vmem:[#allocation0] sm:$0x1] }
  0x9f   :  { %100 = vst [vmem:[%s208_s1] sm:$0x1] %v97_v31 }

// kernel: tile.18
= control target key start
LH: loop header
LB: loop body
LE: loop exit
PB: predicated region body
PF: predicated region fallthrough
CT: control target
= control target key end

     0   :  { %s22_s0 = inlined_call_operand.vmem [shape: f32[16], index: 0, kind: input, shape index: {}]   ;;  %s23_s1 = inlined_call_operand.vmem [shape: f32[6,16], index: 1, kind: output, shape index: {}]  }
   0x1   :  { %v4_v0 = vld [vmem:[%s22_s0] ss:$0 sm:$0xff] }
   0x2   :  { %5 = vst [vmem:[%s23_s1] sm:$0xff] %v4_v0 }

// kernel: tile.19
= control target key start
LH: loop header
LB: loop body
LE: loop exit
PB: predicated region body
PF: predicated region fallthrough
CT: control target
= control target key end

     0   :  { %s51_s10 = smov 80   ;;  %s52_s11 = smov 48   ;;  %vm3_vm0 = vcmask 130048   ;;  %vm9_vm1 = vcmask 786048   ;;  %vm15_vm2 = vcmask 654848   ;;  %vm21_vm3 = vcmask 523648   ;;  %s87_s0 = inlined_call_operand.vmem [shape: f32[6,16], index: 0, kind: input, shape index: {}]   ;;  %s88_s1 = inlined_call_operand.vmem [shape: f32[1,96], index: 1, kind: output, shape index: {}]  }
   0x1   :  { %v41_v0 = vld [vmem:[%s87_s0 + $0x5] sm:$0x1]   ;;  %v43_v1 = vld [vmem:[%s87_s0 + $0x3] sm:$0x1]   ;;  %v45_v2 = vld [vmem:[%s87_s0 + $0x1] sm:$0x1]  }
   0x2   :  { %7 = vrot.lane.b32.xlu0 %v41_v0, %s51_s10  ;;  %19 = vrot.lane.b32.xlu1 %v43_v1, %s52_s11  ;;  %s53_s14 = smov 16   ;;  %v42_v3 = vld [vmem:[%s87_s0 + $0x4] sm:$0x1]   ;;  %v44_v4 = vld [vmem:[%s87_s0 + $0x2] sm:$0x1]   ;;  %s54_s19 = smov 64  }
   0x3   :  { %31 = vrot.lane.b32.xlu2 %v45_v2, %s53_s14  ;;  %s55_s20 = smov 32   ;;  %v2_v5 = vld [vmem:[%s87_s0] sm:$0x1]   ;;  %vm27_vm4 = vcmask 392448   ;;  %vm33_vm5 = vcmask 261248  }
   0x4   :  { %4 = vst.msk [vmem:[#allocation0] sm:$0x1] %vm3_vm0, %v2_v5  }
   0xa   :  { %13 = vrot.lane.b32.xlu0 %v42_v3, %s54_s19  ;;  %25 = vrot.lane.b32.xlu1 %v44_v4, %s55_s20 }
  0x5d   :  { %v32_v6 = vpop.permute.xlu2 %31  }
  0x74   :  { %v8_v7 = vpop.permute.xlu0 %7   ;;  %v20_v8 = vpop.permute.xlu1 %19  }
  0x75   :  { %10 = vst.msk [vmem:[#allocation0] sm:$0x1] %vm9_vm1, %v8_v7  }
  0x7c   :  { %v14_v9 = vpop.permute.xlu0 %13   ;;  %v26_v10 = vpop.permute.xlu1 %25  }
  0x7d   :  { %16 = vst.msk [vmem:[#allocation0] sm:$0x1] %vm15_vm2, %v14_v9  }
  0x7e   :  { %22 = vst.msk [vmem:[#allocation0] sm:$0x1] %vm21_vm3, %v20_v8  }
  0x7f   :  { %28 = vst.msk [vmem:[#allocation0] sm:$0x1] %vm27_vm4, %v26_v10  }
  0x80   :  { %34 = vst.msk [vmem:[#allocation0] sm:$0x1] %vm33_vm5, %v32_v6  }
  0x87   :  { %v37_v11 = vld [vmem:[#allocation0] sm:$0x1] }
  0x88   :  { %40 = vst [vmem:[%s88_s1] sm:$0x1] %v37_v11 }

// kernel: lenet5_forward.1
= control target key start
LH: loop header
LB: loop body
LE: loop exit
PB: predicated region body
PF: predicated region fallthrough
CT: control target
= control target key end

     0   :  { %s3409_s27 = smov 0   ;;  %s5488_s0 = inlined_call_operand.vmem [shape: f32[2,36,36], index: 0, kind: input, shape index: {}]   ;;  %s5489_s1 = inlined_call_operand.vmem [shape: f32[2,5,36,96], index: 1, kind: input, shape index: {}]   ;;  %s5490_s2 = inlined_call_operand.vmem [shape: f32[1,96], index: 2, kind: input, shape index: {}]   ;;  %s5491_s3 = inlined_call_operand.vmem [shape: f32[2,16,32], index: 3, kind: input, shape index: {}]   ;;  %s5492_s4 = inlined_call_operand.vmem [shape: f32[2,5,96,96], index: 4, kind: input, shape index: {}]   ;;  %s5493_s5 = inlined_call_operand.vmem [shape: f32[1,96], index: 5, kind: input, shape index: {}]   ;;  %s5494_s6 = inlined_call_operand.vmem [shape: f32[2,6,12], index: 6, kind: input, shape index: {}]   ;;  %s5495_s7 = inlined_call_operand.vmem [shape: f32[6,96,576], index: 7, kind: input, shape index: {}]   ;;  %s5496_s8 = inlined_call_operand.vmem [shape: f32[1,576], index: 8, kind: input, shape index: {}]   ;;  %s5497_s9 = inlined_call_operand.vmem [shape: f32[576,84], index: 9, kind: input, shape index: {}]   ;;  %s5498_s10 = inlined_call_operand.vmem [shape: f32[1,84], index: 10, kind: input, shape index: {}]   ;;  %s5499_s11 = inlined_call_operand.vmem [shape: f32[1,84], index: 11, kind: input, shape index: {}]   ;;  %s5500_s12 = inlined_call_operand.<no memory space> [shape: f32[1,1], index: 12, kind: input, shape index: {}]   ;;  %s5501_s13 = inlined_call_operand.vmem [shape: f32[2,1,1], index: 13, kind: output, shape index: {}]  }
   0x1   :  { %v18_v0 = vstv %s5500_s12 }
   0x2   :  { %19 = vst [vmem:[#allocation2] sm:$0x1] %v18_v0 }
   0x3 LB: > { %s2739_s28 = sadd.s32 4294967295, %s3334_s27   ;;  %p2743_p0 = scmp.ge.s32.totalorder %s3334_s27, 1  ;;  %s3334_s27 = sphi %s3409_s27, %s25_s27  }
   0x4   : > { %p389_p1 = scmp.lt.s32.totalorder %s3334_s27, 3 }
   0x6   : > { %p390_p2 = pnand %p2743_p0, %p389_p1 }
   0x7   : > { %p431_p3 = scmp.lt.s32.totalorder (!%p390_p2), %s2739_s28, 1 }
   0x8   : > { %393 = sbr.rel (%p390_p2) target bundleno = 1267 (0x4f3), region = 72 }
   0xd   : > { %v2754_v1 = vld [vmem:[%s5489_s1 + $0x48] sm:$0xf]  ;;  %vm477_vm0 = vcmask 1043456   ;;  %v447_v2 = vld [vmem:[%s5489_s1 + $0x20] sm:$0xf]  ;;  %v446_v5 = vld [vmem:[%s5489_s1 + $0x18] sm:$0xff] }
   0xe   : > { %v2753_v3 = vld [vmem:[%s5489_s1 + $0x40] sm:$0xff]  ;;  %2755 = vmatpush.msk.msra.mxu0 %vm477_vm0, %v2754_v1  ;;  %3312 = vmatpush.msk.msra.mxu3 %vm477_vm0, %v2754_v1  ;;  %v2769_v4 = vld [vmem:[%s5489_s1 + $0x110] sm:$0xf]  ;;  %v2768_v6 = vld [vmem:[%s5489_s1 + $0x108] sm:$0xff]  ;;  %s5503_s28 = smov (!%p431_p3, %s2739_s28), 1  ;;  %vm464_vm1 = vcmask 293888  }
   0xf   : > { %2760 = vmatpush.msk.msra.mxu1 %vm477_vm0, %v447_v2  ;;  %2770 = vmatpush.msk.msra.mxu2 %vm477_vm0, %v2769_v4  ;;  %v2752_v7 = vld [vmem:[%s5489_s1 + $0x38] sm:$0xff]  ;;  %v445_v8 = vld [vmem:[%s5489_s1 + $0x10] sm:$0xff]  ;;  %v2767_v9 = vld [vmem:[%s5489_s1 + $0x100] sm:$0xff]  ;;  %s3317_s19 = smul.u32 40, %s5503_s28  ;;  %vm942_vm2 = vcmask 261120   ;;  %vm1050_vm3 = vcmask 785408   ;;  %s438_s15 = scalar_lea.vmem %s5501_s13, %s5503_s28 }
  0x10   : > { %493 = vmatpush.msra.mxu0 %v2753_v3  ;;  %3313 = vmatpush.msra.mxu3 %v2753_v3  ;;  %v2751_v10 = vld [vmem:[%s5489_s1 + $0x30] sm:$0xff]  ;;  %v444_v11 = vld [vmem:[%s5489_s1 + $0x8] sm:$0xff]  ;;  %v2766_v12 = vld [vmem:[%s5489_s1 + $0xf8] sm:$0xff]  ;;  %vm1046_vm4 = vcmask 1046528   ;;  %vm1177_vm5 = vcmask 1045504   ;;  %vm1261_vm6 = vcmask 1044480  }
  0x11   : > { %537 = vmatpush.msra.mxu1 %v446_v5  ;;  %575 = vmatpush.msra.mxu2 %v2768_v6  ;;  %v2750_v13 = vld [vmem:[%s5489_s1 + $0x28] sm:$0xff]  ;;  %v443_v14 = vld [vmem:[%s5489_s1] sm:$0xff]  ;;  %v2765_v15 = vld [vmem:[%s5489_s1 + $0xf0] sm:$0xff]  ;;  %s3472_s30 = scalar_lea.vmem %s5488_s0, %s3317_s19  ;;  %vm1426_vm7 = vcmask 97280   ;;  %vm2577_vm8 = vcmask 523264   ;;  %vm2684_vm9 = vcmask 679936  }
  0x12   : > { %494 = vmatpush.msra.mxu0 %v2752_v7  ;;  %3314 = vmatpush.msra.mxu3 %v2752_v7  ;;  %v454_v16 = vld [vmem:[%s3472_s30 + $0x1] sm:$0xff]  ;;  %v3476_v17 = vld [vmem:[%s3472_s30 + $0x11] sm:$0xff]  ;;  %v455_v29 = vld [vmem:[%s3472_s30 + $0x9] sm:$0xff]  ;;  %vm2690_vm10 = vcmask 0  }
  0x13   : > { %538 = vmatpush.msra.mxu1 %v445_v8  ;;  %576 = vmatpush.msra.mxu2 %v2767_v9  ;;  %v439_v18 = vld [vmem:[%s3472_s30] sm:$0xff]  ;;  %v2749_v19 = vld [vmem:[%s5489_s1 + $0xe8] sm:$0xf]  ;;  %v2784_v20 = vld [vmem:[%s5489_s1 + $0x70] sm:$0xf] }
  0x14   : > { %495 = vmatpush.msra.mxu0 %v2751_v10  ;;  %3315 = vmatpush.msra.mxu3 %v2751_v10  ;;  %v2794_v21 = vld [vmem:[%s5489_s1 + $0x138] sm:$0xf]  ;;  %v2748_v23 = vld [vmem:[%s5489_s1 + $0xe0] sm:$0xff]  ;;  %v2783_v24 = vld [vmem:[%s5489_s1 + $0x68] sm:$0xff] }
  0x15   : > { %539 = vmatpush.msra.mxu1 %v444_v11  ;;  %577 = vmatpush.msra.mxu2 %v2766_v12  ;;  %v2804_v22 = vld [vmem:[%s5489_s1 + $0x98] sm:$0xf]  ;;  %v2793_v25 = vld [vmem:[%s5489_s1 + $0x130] sm:$0xff]  ;;  %v2782_v28 = vld [vmem:[%s5489_s1 + $0x60] sm:$0xff] }
  0x16   : > { %496 = vmatpush.msra.mxu0 %v2750_v13  ;;  %3316 = vmatpush.msra.mxu3 %v2750_v13  ;;  %v2803_v26 = vld [vmem:[%s5489_s1 + $0x90] sm:$0xff]  ;;  %v2747_v27 = vld [vmem:[%s5489_s1 + $0xd8] sm:$0xff]  ;;  %v2792_v30 = vld [vmem:[%s5489_s1 + $0x128] sm:$0xff] }
  0x17   : > { %540 = vmatpush.msra.mxu1 %v443_v14  ;;  %578 = vmatpush.msra.mxu2 %v2765_v15  ;;  %v2802_v31 = vld [vmem:[%s5489_s1 + $0x88] sm:$0xff]  ;;  %v457_v32 = vld [vmem:[%s3472_s30 + $0x19] sm:$0xff]  ;;  %v2746_v34 = vld [vmem:[%s5489_s1 + $0xd0] sm:$0xff] }
  0x18   : > { %2756 = vmatmul.msk.f32.vlgmr.msra.gmra.mxu0 %vm464_vm1, %v454_v16  ;;  %2758 = vmatmul.msk.f32.vlgmr.msra.gmra.mxu3 %vm464_vm1, %v3476_v17  ;;  %v440_v33 = vld [vmem:[%s3472_s30 + $0x8] sm:$0xff]  ;;  %v2781_v35 = vld [vmem:[%s5489_s1 + $0x58] sm:$0xff]  ;;  %v2791_v36 = vld [vmem:[%s5489_s1 + $0x120] sm:$0xff] }
  0x19   : > { %2761 = vmatmul.msk.f32.vlgmr.msra.gmra.mxu1 %vm464_vm1, %v439_v18  ;;  %2771 = vmatmul.msk.f32.vlgmr.msra.gmra.mxu2 %vm464_vm1, %v454_v16  ;;  %v2801_v37 = vld [vmem:[%s5489_s1 + $0x80] sm:$0xff]  ;;  %v2745_v38 = vld [vmem:[%s5489_s1 + $0xc8] sm:$0xff]  ;;  %v2780_v39 = vld [vmem:[%s5489_s1 + $0x50] sm:$0xff] }
  0x1a   : > { %2775 = vmatpush.msk.msrb.mxu3 %vm477_vm0, %v2749_v19  ;;  %2785 = vmatpush.msk.msrb.mxu0 %vm477_vm0, %v2784_v20  ;;  %v2790_v40 = vld [vmem:[%s5489_s1 + $0x118] sm:$0xff]  ;;  %v2814_v42 = vld [vmem:[%s5489_s1 + $0x160] sm:$0xf]  ;;  %v441_v45 = vld [vmem:[%s3472_s30 + $0x10] sm:$0xff] }
  0x1b   : > { %2795 = vmatpush.msk.msrb.mxu1 %vm477_vm0, %v2794_v21  ;;  %2805 = vmatpush.msk.msrb.mxu2 %vm477_vm0, %v2804_v22  ;;  %v2800_v41 = vld [vmem:[%s5489_s1 + $0x78] sm:$0xff]  ;;  %v2824_v43 = vld [vmem:[%s5489_s1 + $0xc0] sm:$0xf]  ;;  %v2812_v48 = vld [vmem:[%s5489_s1 + $0x150] sm:$0xff] }
  0x1c   : > { %607 = vmatpush.msrb.mxu3 %v2748_v23  ;;  %661 = vmatpush.msrb.mxu0 %v2783_v24  ;;  %v624_v44 = vld [vmem:[%s3472_s30 + $0x2] sm:$0xff]  ;;  %v2813_v46 = vld [vmem:[%s5489_s1 + $0x158] sm:$0xff]  ;;  %v2822_v49 = vld [vmem:[%s5489_s1 + $0xb0] sm:$0xff] }
  0x1d   : > { %703 = vmatpush.msrb.mxu1 %v2793_v25  ;;  %761 = vmatpush.msrb.mxu2 %v2803_v26  ;;  %v2823_v47 = vld [vmem:[%s5489_s1 + $0xb8] sm:$0xff]  ;;  %v2834_v50 = vld [vmem:[%s5489_s1 + $0x188] sm:$0xf]  ;;  %v2810_v55 = vld [vmem:[%s5489_s1 + $0x140] sm:$0xff] }
  0x1e   : > { %608 = vmatpush.msrb.mxu3 %v2747_v27  ;;  %662 = vmatpush.msrb.mxu0 %v2782_v28  ;;  %v2811_v51 = vld [vmem:[%s5489_s1 + $0x148] sm:$0xff]  ;;  %v442_v54 = vld [vmem:[%s3472_s30 + $0x18] sm:$0xff]  ;;  %v2820_v56 = vld [vmem:[%s5489_s1 + $0xa0] sm:$0xff] }
  0x1f   : > { %704 = vmatpush.msrb.mxu1 %v2792_v30  ;;  %762 = vmatpush.msrb.mxu2 %v2802_v31  ;;  %v2821_v52 = vld [vmem:[%s5489_s1 + $0xa8] sm:$0xff]  ;;  %v2833_v57 = vld [vmem:[%s5489_s1 + $0x180] sm:$0xff]  ;;  %v2832_v58 = vld [vmem:[%s5489_s1 + $0x178] sm:$0xff] }
  0x20   : > { %2757 = vmatmul.msk.f32.gmra.mxu0 %vm464_vm1, %v455_v29  ;;  %2759 = vmatmul.msk.f32.gmra.mxu3 %vm464_vm1, %v457_v32  ;;  %v625_v53 = vld [vmem:[%s3472_s30 + $0xa] sm:$0xff]  ;;  %v626_v60 = vld [vmem:[%s3472_s30 + $0x12] sm:$0xff]  ;;  %v627_v63 = vld [vmem:[%s3472_s30 + $0x1a] sm:$0xff] }
  0x21   : > { %2762 = vmatmul.msk.f32.gmra.mxu1 %vm464_vm1, %v440_v33  ;;  %2772 = vmatmul.msk.f32.gmra.mxu2 %vm464_vm1, %v455_v29  ;;  %v2831_v59 = vld [vmem:[%s5489_s1 + $0x170] sm:$0xff]  ;;  %v724_v61 = vld [vmem:[%s3472_s30 + $0x3] sm:$0xff]  ;;  %v727_v4 = vld [vmem:[%s3472_s30 + $0x1b] sm:$0xff] }
  0x22   : > { %609 = vmatpush.msrb.mxu3 %v2746_v34  ;;  %663 = vmatpush.msrb.mxu0 %v2781_v35  ;;  %v2830_v62 = vld [vmem:[%s5489_s1 + $0x168] sm:$0xff]  ;;  %v726_v2 = vld [vmem:[%s3472_s30 + $0x13] sm:$0xff]  ;;  %v827_v6 = vld [vmem:[%s3472_s30 + $0x1c] sm:$0xff] }
  0x23   : > { %705 = vmatpush.msrb.mxu1 %v2791_v36  ;;  %763 = vmatpush.msrb.mxu2 %v2801_v37  ;;  %v725_v0 = vld [vmem:[%s3472_s30 + $0xb] sm:$0xff]  ;;  %v826_v5 = vld [vmem:[%s3472_s30 + $0x14] sm:$0xff] }
  0x24   : > { %610 = vmatpush.msrb.mxu3 %v2745_v38  ;;  %664 = vmatpush.msrb.mxu0 %v2780_v39  ;;  %v824_v1 = vld [vmem:[%s3472_s30 + $0x4] sm:$0xff]  ;;  %v825_v3 = vld [vmem:[%s3472_s30 + $0xc] sm:$0xff] }
  0x25   : > { %706 = vmatpush.msrb.mxu1 %v2790_v40  ;;  %764 = vmatpush.msrb.mxu2 %v2800_v41 }
  0x26   : > { %2815 = vmatpush.msk.msra.mxu3 %vm477_vm0, %v2814_v42  ;;  %2825 = vmatpush.msk.msra.mxu0 %vm477_vm0, %v2824_v43 }
  0x27   : > { %2835 = vmatpush.msk.msra.mxu1 %vm477_vm0, %v2834_v50 }
  0x28   : > { %2776 = vmatmul.msk.f32.vlgmr.msrb.gmra.mxu3 %vm464_vm1, %v439_v18  ;;  %2786 = vmatmul.msk.f32.vlgmr.msrb.gmra.mxu0 %vm464_vm1, %v624_v44 }
  0x29   : > { %2763 = vmatmul.msk.f32.gmra.mxu1 %vm464_vm1, %v441_v45  ;;  %2773 = vmatmul.msk.f32.gmra.mxu2 %vm464_vm1, %v3476_v17 }
  0x2a   : > { %803 = vmatpush.msra.mxu3 %v2813_v46  ;;  %861 = vmatpush.msra.mxu0 %v2823_v47 }
  0x2b   : > { %903 = vmatpush.msra.mxu1 %v2833_v57 }
  0x2c   : > { %804 = vmatpush.msra.mxu3 %v2812_v48  ;;  %862 = vmatpush.msra.mxu0 %v2822_v49  ;;  %v2857_v49 = vld [vmem:[%s5492_s4 + $0x238] sm:$0xff] }
  0x2d   : > { %904 = vmatpush.msra.mxu1 %v2832_v58 }
  0x2e   : > { %805 = vmatpush.msra.mxu3 %v2811_v51  ;;  %863 = vmatpush.msra.mxu0 %v2821_v52  ;;  %v2856_v52 = vld [vmem:[%s5492_s4 + $0x230] sm:$0xff] }
  0x2f   : > { %905 = vmatpush.msra.mxu1 %v2831_v59 }
  0x30   : > { %2777 = vmatmul.msk.f32.gmra.mxu3 %vm464_vm1, %v440_v33  ;;  %2787 = vmatmul.msk.f32.gmra.mxu0 %vm464_vm1, %v625_v53 }
  0x31   : > { %2764 = vmatmul.msk.f32.gmra.mxu1 %vm464_vm1, %v442_v54  ;;  %2774 = vmatmul.msk.f32.gmra.mxu2 %vm464_vm1, %v457_v32 }
  0x32   : > { %806 = vmatpush.msra.mxu3 %v2810_v55  ;;  %864 = vmatpush.msra.mxu0 %v2820_v56  ;;  %v2855_v56 = vld [vmem:[%s5492_s4 + $0x228] sm:$0xff] }
  0x33   : > { %906 = vmatpush.msra.mxu1 %v2830_v62 }
  0x38   : > { %2778 = vmatmul.msk.f32.gmra.mxu3 %vm464_vm1, %v441_v45  ;;  %2788 = vmatmul.msk.f32.gmra.mxu0 %vm464_vm1, %v626_v60 }
  0x39   : > { %2796 = vmatmul.msk.f32.vlgmr.msrb.gmra.mxu1 %vm464_vm1, %v624_v44  ;;  %2806 = vmatmul.msk.f32.vlgmr.msrb.gmra.mxu2 %vm464_vm1, %v724_v61 }
  0x3a   : > { %1145 = vmatpush.msrb.mxu1 %v2857_v49  ;;  %v2846_v49 = vld [vmem:[%s5492_s4 + $0x1e0] sm:$0xff] }
  0x3c   : > { %1146 = vmatpush.msrb.mxu1 %v2856_v52  ;;  %v2868_v52 = vld [vmem:[%s5492_s4 + $0xb0] sm:$0xff] }
  0x3e   : > { %1147 = vmatpush.msrb.mxu1 %v2855_v56  ;;  %v2867_v56 = vld [vmem:[%s5492_s4 + $0xa8] sm:$0xff] }
  0x40   : > { %2779 = vmatmul.msk.f32.gmra.mxu3 %vm464_vm1, %v442_v54  ;;  %2789 = vmatmul.msk.f32.gmra.mxu0 %vm464_vm1, %v627_v63 }
  0x41   : > { %2797 = vmatmul.msk.f32.gmra.mxu1 %vm464_vm1, %v625_v53  ;;  %2807 = vmatmul.msk.f32.gmra.mxu2 %vm464_vm1, %v725_v0 }
  0x48   : > { %2816 = vmatmul.msk.f32.vlgmr.msra.gmra.mxu3 %vm464_vm1, %v724_v61  ;;  %2826 = vmatmul.msk.f32.vlgmr.msra.gmra.mxu0 %vm464_vm1, %v824_v1 }
  0x49   : > { %2798 = vmatmul.msk.f32.gmra.mxu1 %vm464_vm1, %v626_v60  ;;  %2808 = vmatmul.msk.f32.gmra.mxu2 %vm464_vm1, %v726_v2 }
  0x50   : > { %2817 = vmatmul.msk.f32.gmra.mxu3 %vm464_vm1, %v725_v0  ;;  %2827 = vmatmul.msk.f32.gmra.mxu0 %vm464_vm1, %v825_v3 }
  0x51   : > { %2799 = vmatmul.msk.f32.gmra.mxu1 %vm464_vm1, %v627_v63  ;;  %2809 = vmatmul.msk.f32.gmra.mxu2 %vm464_vm1, %v727_v4 }
  0x58   : > { %2818 = vmatmul.msk.f32.gmra.mxu3 %vm464_vm1, %v726_v2  ;;  %2828 = vmatmul.msk.f32.gmra.mxu0 %vm464_vm1, %v826_v5 }
  0x59   : > { %2836 = vmatmul.msk.f32.vlgmr.msra.gmra.mxu1 %vm464_vm1, %v824_v1 }
  0x60   : > { %2819 = vmatmul.msk.f32.gmra.mxu3 %vm464_vm1, %v727_v4  ;;  %2829 = vmatmul.msk.f32.gmra.mxu0 %vm464_vm1, %v827_v6 }
  0x61   : > { %2837 = vmatmul.msk.f32.gmra.mxu1 %vm464_vm1, %v825_v3  ;;  %v2854_v3 = vld [vmem:[%s5492_s4 + $0x220] sm:$0xff] }
  0x62   : > { %1148 = vmatpush.msrb.mxu1 %v2854_v3  ;;  %v2863_v3 = vld [vmem:[%s5492_s4 + $0x88] sm:$0xff] }
  0x69   : > { %2838 = vmatmul.msk.f32.gmra.mxu1 %vm464_vm1, %v826_v5 }
  0x71   : > { %2839 = vmatmul.msk.f32.gmra.mxu1 %vm464_vm1, %v827_v6 }
  0x95   : > { %v498_v7 = vpop.f32.mrf.mxu0 }
  0x96   : > { %v542_v8 = vpop.f32.mrf.mxu1 }
  0x97   : > { %v543_v57 = vadd.f32 %v542_v8, %v498_v7 }
  0x9b   : > { %v504_v9 = vpop.f32.mrf.mxu3 }
  0x9c   : > { %v580_v12 = vpop.f32.mrf.mxu2 }
  0x9d   : > { %v501_v10 = vpop.f32.mrf.mxu0 }
  0x9e   : > { %v545_v11 = vpop.f32.mrf.mxu1 }
  0x9f   : > { %v546_v50 = vadd.f32 %v545_v11, %v501_v10 }
  0xa3   : > { %v507_v13 = vpop.f32.mrf.mxu3 }
  0xa4   : > { %v583_v17 = vpop.f32.mrf.mxu2 }
  0xa5   : > { %v666_v15 = vpop.f32.mrf.mxu0 }
  0xa6   : > { %v548_v14 = vpop.f32.mrf.mxu1  ;;  %v678_v4 = vadd.f32 %v666_v15, %v543_v57  ;;  %v2942_v57 = vld [vmem:[%s5492_s4 + $0x350] sm:$0xff] }
  0xa7   : > { %v549_v46 = vadd.f32 %v548_v14, %v504_v9 }
  0xab   : > { %v612_v16 = vpop.f32.mrf.mxu3 }
  0xac   : > { %v586_v22 = vpop.f32.mrf.mxu2  ;;  %v613_v44 = vadd.f32 %v612_v16, %v580_v12  ;;  %v2853_v12 = vld [vmem:[%s5492_s4 + $0x218] sm:$0xff] }
  0xad   : > { %v669_v19 = vpop.f32.mrf.mxu0  ;;  %1149 = vmatpush.msrb.mxu1 %v2853_v12  ;;  %v1006_v12 = vld [vmem:[%s5492_s4] sm:$0xff] }
  0xae   : > { %v551_v18 = vpop.f32.mrf.mxu1  ;;  %v679_v58 = vadd.f32 %v669_v19, %v546_v50  ;;  %v2879_v50 = vld [vmem:[%s5492_s4 + $0x268] sm:$0xff] }
  0xaf   : > { %v552_v51 = vadd.f32 %v551_v18, %v507_v13 }
  0xb3   : > { %v615_v20 = vpop.f32.mrf.mxu3 }
  0xb4   : > { %v589_v26 = vpop.f32.mrf.mxu2  ;;  %v616_v43 = vadd.f32 %v615_v20, %v583_v17  ;;  %v2852_v20 = vld [vmem:[%s5492_s4 + $0x210] sm:$0xff] }
  0xb5   : > { %v672_v23 = vpop.f32.mrf.mxu0  ;;  %1150 = vmatpush.msrb.mxu1 %v2852_v20  ;;  %v2877_v20 = vld [vmem:[%s5492_s4 + $0x258] sm:$0xff] }
  0xb6   : > { %v708_v21 = vpop.f32.mrf.mxu1  ;;  %v680_v53 = vadd.f32 %v672_v23, %v549_v46  ;;  %v2842_v46 = vld [vmem:[%s5491_s3 + $0x10] sm:$0xff] }
  0xb7   : > { %v720_v59 = vadd.f32 %v708_v21, %v613_v44 }
  0xbb   : > { %v618_v24 = vpop.f32.mrf.mxu3 }
  0xbc   : > { %v766_v30 = vpop.f32.mrf.mxu2  ;;  %v619_v42 = vadd.f32 %v618_v24, %v586_v22  ;;  %v3326_v24 = vld [vmem:[%s5490_s2] ss:$0 sm:$0xff] }
  0xbd   : > { %v675_v28 = vpop.f32.mrf.mxu0  ;;  %v778_v13 = vadd.f32 %v766_v30, %v678_v4  ;;  %v2884_v30 = vld [vmem:[%s5492_s4 + $0x290] sm:$0xff]  ;;  %v1010_v4 = vld [vmem:[%s5492_s4 + $0x20] sm:$0xff] }
  0xbe   : > { %v711_v25 = vpop.f32.mrf.mxu1  ;;  %v681_v60 = vadd.f32 %v675_v28, %v552_v51  ;;  %v1016_v51 = vld [vmem:[%s5492_s4 + $0x50] sm:$0xff] }
  0xbf   : > { %v721_v54 = vadd.f32 %v711_v25, %v616_v43  ;;  %v2885_v25 = vld [vmem:[%s5492_s4 + $0x298] sm:$0xff]  ;;  %v2880_v43 = vld [vmem:[%s5492_s4 + $0x270] sm:$0xff] }
  0xc0   : > { %1122 = vmatpush.msrb.mxu0 %v2885_v25  ;;  %v2900_v25 = vld [vmem:[%s5492_s4 + $0x110] sm:$0xff] }
  0xc2   : > { %1123 = vmatpush.msrb.mxu0 %v2884_v30  ;;  %v2939_v30 = vld [vmem:[%s5492_s4 + $0x338] sm:$0xff] }
  0xc3   : > { %v621_v27 = vpop.f32.mrf.mxu3 }
  0xc4   : > { %v769_v34 = vpop.f32.mrf.mxu2  ;;  %v622_v47 = vadd.f32 %v621_v27, %v589_v26  ;;  %v2851_v26 = vld [vmem:[%s5492_s4 + $0x208] sm:$0xff] }
  0xc5   : > { %v866_v32 = vpop.f32.mrf.mxu0  ;;  %v779_v5 = vadd.f32 %v769_v34, %v679_v58  ;;  %1151 = vmatpush.msrb.mxu1 %v2851_v26  ;;  %v2883_v34 = vld [vmem:[%s5492_s4 + $0x288] sm:$0xff]  ;;  %v1014_v58 = vld [vmem:[%s5492_s4 + $0x40] sm:$0xff] }
  0xc6   : > { %v714_v29 = vpop.f32.mrf.mxu1  ;;  %v878_v21 = vadd.f32 %v866_v32, %v778_v13  ;;  %1124 = vmatpush.msrb.mxu0 %v2883_v34  ;;  %v2858_v13 = vld [vmem:[%s5492_s4 + $0x60] sm:$0xff]  ;;  %v2938_v34 = vld [vmem:[%s5492_s4 + $0x330] sm:$0xff] }
  0xc7   : > { %v722_v48 = vadd.f32 %v714_v29, %v619_v42  ;;  %v2847_v42 = vld [vmem:[%s5492_s4 + $0x1e8] sm:$0xff]  ;;  %v2940_v26 = vld [vmem:[%s5492_s4 + $0x340] sm:$0xff] }
  0xcb   : > { %v808_v31 = vpop.f32.mrf.mxu3 }
  0xcc   : > { %v772_v39 = vpop.f32.mrf.mxu2  ;;  %v820_v6 = vadd.f32 %v808_v31, %v720_v59  ;;  %v2850_v31 = vld [vmem:[%s5492_s4 + $0x200] sm:$0xff] }
  0xcd   : > { %v869_v37 = vpop.f32.mrf.mxu0  ;;  %v780_v63 = vadd.f32 %v772_v39, %v680_v53  ;;  %1152 = vmatpush.msrb.mxu1 %v2850_v31  ;;  %v2848_v39 = vld [vmem:[%s5492_s4 + $0x1f0] sm:$0xff]  ;;  %v2943_v53 = vld [vmem:[%s5492_s4 + $0x358] sm:$0xff]  ;;  %v2866_v59 = vld [vmem:[%s5492_s4 + $0xa0] sm:$0xff] }
  0xce   : > { %v717_v33 = vpop.f32.mrf.mxu1  ;;  %v879_v14 = vadd.f32 %v869_v37, %v779_v5  ;;  %v2862_v5 = vld [vmem:[%s5492_s4 + $0x80] sm:$0xff]  ;;  %v2907_v31 = vld [vmem:[%s5492_s4 + $0x2b8] sm:$0xff] }
  0xcf   : > { %v723_v0 = vadd.f32 %v717_v33, %v622_v47  ;;  %v1017_v47 = vld [vmem:[%s5492_s4 + $0x58] sm:$0xff] }
  0xd3   : > { %v811_v35 = vpop.f32.mrf.mxu3 }
  0xd4   : > { %v775_v61 = vpop.f32.mrf.mxu2  ;;  %v821_v1 = vadd.f32 %v811_v35, %v721_v54  ;;  %v2849_v35 = vld [vmem:[%s5492_s4 + $0x1f8] sm:$0xff]  ;;  %v2878_v54 = vld [vmem:[%s5492_s4 + $0x260] sm:$0xff] }
  0xd5   : > { %v872_v41 = vpop.f32.mrf.mxu0  ;;  %v781_v7 = vadd.f32 %v775_v61, %v681_v60  ;;  %1153 = vmatpush.msrb.mxu1 %v2849_v35  ;;  %v941_v60 = vld [vmem:[%s5491_s3 + $0x8] sm:$0xff]  ;;  %v2843_v61 = vld [vmem:[%s5491_s3 + $0x18] sm:$0xff]  ;;  %v2906_v35 = vld [vmem:[%s5492_s4 + $0x2b0] sm:$0xff] }
  0xd6   : > { %v908_v36 = vpop.f32.mrf.mxu1  ;;  %v880_v8 = vadd.f32 %v872_v41, %v780_v63  ;;  %v2865_v63 = vld [vmem:[%s5492_s4 + $0x98] sm:$0xff] }
  0xd7   : > { %v920_v17 = vadd.f32 %v908_v36, %v820_v6  ;;  %v2882_v36 = vld [vmem:[%s5492_s4 + $0x280] sm:$0xff]  ;;  %1154 = vmatpush.msrb.mxu1 %v2848_v39  ;;  %v1009_v6 = vld [vmem:[%s5492_s4 + $0x18] sm:$0xff]  ;;  %v2905_v39 = vld [vmem:[%s5492_s4 + $0x2a8] sm:$0xff] }
  0xd8   : > { %1125 = vmatpush.msrb.mxu0 %v2882_v36  ;;  %v2929_v36 = vld [vmem:[%s5492_s4 + $0x178] sm:$0xff] }
  0xd9   : > { %v924_v27 = vmax.f32 %v878_v21, %v920_v17  ;;  %1155 = vmatpush.msrb.mxu1 %v2847_v42  ;;  %v2913_v17 = vld [vmem:[%s5492_s4 + $0x2e8] sm:$0xff]  ;;  %v2901_v21 = vld [vmem:[%s5492_s4 + $0x118] sm:$0xff]  ;;  %v2936_v42 = vld [vmem:[%s5492_s4 + $0x320] sm:$0xff] }
  0xdb   : > { %v814_v40 = vpop.f32.mrf.mxu3  ;;  %1156 = vmatpush.msrb.mxu1 %v2846_v49  ;;  %v2934_v49 = vld [vmem:[%s5492_s4 + $0x310] sm:$0xff] }
  0xdc   : > { %v822_v55 = vadd.f32 %v814_v40, %v722_v48  ;;  %v2881_v40 = vld [vmem:[%s5492_s4 + $0x278] sm:$0xff] }
  0xdd   : > { %v875_v9 = vpop.f32.mrf.mxu0  ;;  %1126 = vmatpush.msrb.mxu0 %v2881_v40  ;;  %v2869_v48 = vld [vmem:[%s5492_s4 + $0xb8] sm:$0xff]  ;;  %1311 = vmatpush.msra.mxu1 %v2943_v53  ;;  %v2928_v40 = vld [vmem:[%s5492_s4 + $0x170] sm:$0xff] }
  0xde   : > { %v911_v38 = vpop.f32.mrf.mxu1  ;;  %v881_v18 = vadd.f32 %v875_v9, %v781_v7  ;;  %v2861_v9 = vld [vmem:[%s5492_s4 + $0x78] sm:$0xff]  ;;  %v1008_v7 = vld [vmem:[%s5492_s4 + $0x10] sm:$0xff] }
  0xdf   : > { %v921_v10 = vadd.f32 %v911_v38, %v821_v1  ;;  %v932_v38 = vadd.f32 %v3326_v24, %v924_v27  ;;  %1127 = vmatpush.msrb.mxu0 %v2880_v43  ;;  %1312 = vmatpush.msra.mxu1 %v2942_v57  ;;  %v2864_v1 = vld [vmem:[%s5492_s4 + $0x90] sm:$0xff]  ;;  %v2908_v27 = vld [vmem:[%s5492_s4 + $0x2c0] sm:$0xff]  ;;  %v2891_v57 = vld [vmem:[%s5492_s4 + $0xc8] sm:$0xff] }
  0xe0   : > { %v2904_v43 = vld [vmem:[%s5492_s4 + $0x2a0] sm:$0xff]  ;;  %v2924_v53 = vld [vmem:[%s5492_s4 + $0x150] sm:$0xff] }
  0xe1   : > { %v925_v22 = vmax.f32 %v879_v14, %v921_v10  ;;  %v936_v44 = vmax.f32 %v932_v38, 0.0  ;;  %1128 = vmatpush.msrb.mxu0 %v2879_v50  ;;  %v1007_v10 = vld [vmem:[%s5492_s4 + $0x8] sm:$0xff]  ;;  %v2915_v14 = vld [vmem:[%s5492_s4 + $0x2f8] sm:$0xff] }
  0xe2   : > { %v2937_v38 = vld [vmem:[%s5492_s4 + $0x328] sm:$0xff]  ;;  %v2925_v50 = vld [vmem:[%s5492_s4 + $0x158] sm:$0xff] }
  0xe3   : > { %v817_v62 = vpop.f32.mrf.mxu3  ;;  %v933_v33 = vadd.f32 %v3326_v24, %v925_v22  ;;  %1129 = vmatpush.msrb.mxu0 %v2878_v54  ;;  %v2941_v22 = vld [vmem:[%s5492_s4 + $0x348] sm:$0xff]  ;;  %v2892_v54 = vld [vmem:[%s5492_s4 + $0xd0] sm:$0xff] }
  0xe4   : > { %v823_v11 = vadd.f32 %v817_v62, %v723_v0  ;;  %v1013_v62 = vld [vmem:[%s5492_s4 + $0x38] sm:$0xff]  ;;  %v1012_v0 = vld [vmem:[%s5492_s4 + $0x30] sm:$0xff]  ;;  %1313 = vmatpush.msra.mxu1 %v2941_v22  ;;  %v2964_v22 = vld [vmem:[%s5492_s4 + $0x380] sm:$0xff] }
  0xe5   : > { %v937_v41 = vmax.f32 %v933_v33, 0.0  ;;  %1130 = vmatpush.msrb.mxu0 %v2877_v20  ;;  %v2898_v33 = vld [vmem:[%s5492_s4 + $0x100] sm:$0xff] }
  0xe6   : > { %v914_v45 = vpop.f32.mrf.mxu1  ;;  %1314 = vmatpush.msra.mxu1 %v2940_v26  ;;  %v2963_v26 = vld [vmem:[%s5492_s4 + $0x378] sm:$0xff] }
  0xe7   : > { %v922_v2 = vadd.f32 %v914_v45, %v822_v55  ;;  %v940_v45 = vld [vmem:[%s5491_s3] sm:$0xff]  ;;  %v1015_v55 = vld [vmem:[%s5492_s4 + $0x48] sm:$0xff] }
  0xe8   : > { %1315 = vmatpush.msra.mxu1 %v2939_v30  ;;  %v2961_v30 = vld [vmem:[%s5492_s4 + $0x368] sm:$0xff] }
  0xe9   : > { %v926_v19 = vmax.f32 %v880_v8, %v922_v2  ;;  %v1011_v2 = vld [vmem:[%s5492_s4 + $0x28] sm:$0xff]  ;;  %v2860_v8 = vld [vmem:[%s5492_s4 + $0x70] sm:$0xff] }
  0xea   : > { %1316 = vmatpush.msra.mxu1 %v2938_v34 }
  0xeb   : > { %v934_v29 = vadd.f32 %v3326_v24, %v926_v19  ;;  %v2911_v19 = vld [vmem:[%s5492_s4 + $0x2d8] sm:$0xff] }
  0xec   : > { %1317 = vmatpush.msra.mxu1 %v2937_v38 }
  0xed   : > { %v938_v37 = vmax.f32 %v934_v29, 0.0  ;;  %v2899_v29 = vld [vmem:[%s5492_s4 + $0x108] sm:$0xff] }
  0xee   : > { %v917_v16 = vpop.f32.mrf.mxu1  ;;  %1318 = vmatpush.msra.mxu1 %v2936_v42 }
  0xef   : > { %v923_v15 = vadd.f32 %v917_v16, %v823_v11  ;;  %v2859_v11 = vld [vmem:[%s5492_s4 + $0x68] sm:$0xff]  ;;  %v2914_v16 = vld [vmem:[%s5492_s4 + $0x2f0] sm:$0xff] }
  0xf1   : > { %v927_v23 = vmax.f32 %v881_v18, %v923_v15  ;;  %v2912_v18 = vld [vmem:[%s5492_s4 + $0x2e0] sm:$0xff]  ;;  %v2910_v15 = vld [vmem:[%s5492_s4 + $0x2d0] sm:$0xff] }
  0xf3   : > { %v935_v28 = vadd.f32 %v3326_v24, %v927_v23  ;;  %v2909_v23 = vld [vmem:[%s5492_s4 + $0x2c8] sm:$0xff]  ;;  %v2876_v24 = vld [vmem:[%s5492_s4 + $0x250] sm:$0xff] }
  0xf4   : > { %1131 = vmatpush.msrb.mxu0 %v2876_v24 }
  0xf5   : > { %v939_v32 = vmax.f32 %v935_v28, 0.0  ;;  %v2875_v28 = vld [vmem:[%s5492_s4 + $0x248] sm:$0xff] }
  0xf6   : > { %1132 = vmatpush.msrb.mxu0 %v2875_v28  ;;  %v2962_v28 = vld [vmem:[%s5492_s4 + $0x370] sm:$0xff] }
  0xf7   : > { %961 = vmatpush.msra.mxu2 %v939_v32  ;;  %993 = vmatpush.msrb.mxu3 %v939_v32  ;;  %v2874_v32 = vld [vmem:[%s5492_s4 + $0x240] sm:$0xff] }
  0xf8   : > { %1133 = vmatpush.msrb.mxu0 %v2874_v32  ;;  %v2960_v32 = vld [vmem:[%s5492_s4 + $0x360] sm:$0xff] }
  0xf9   : > { %962 = vmatpush.msra.mxu2 %v938_v37  ;;  %994 = vmatpush.msrb.mxu3 %v938_v37  ;;  %v2897_v37 = vld [vmem:[%s5492_s4 + $0xf8] sm:$0xff] }
  0xfa   : > { %1273 = vmatpush.msra.mxu0 %v2929_v36 }
  0xfb   : > { %963 = vmatpush.msra.mxu2 %v937_v41  ;;  %995 = vmatpush.msrb.mxu3 %v937_v41  ;;  %v2896_v41 = vld [vmem:[%s5492_s4 + $0xf0] sm:$0xff] }
  0xfc   : > { %1274 = vmatpush.msra.mxu0 %v2928_v40  ;;  %v2947_v40 = vld [vmem:[%s5492_s4 + $0x188] sm:$0xff] }
  0xfd   : > { %964 = vmatpush.msra.mxu2 %v936_v44  ;;  %996 = vmatpush.msrb.mxu3 %v936_v44  ;;  %v2927_v44 = vld [vmem:[%s5492_s4 + $0x168] sm:$0xff] }
  0xfe   : > { %2840 = vmatmul.msk.f32.vlgmr.msra.gmra.mxu2 %vm942_vm2, %v940_v45  ;;  %2844 = vmatmul.msk.f32.vlgmr.msrb.gmra.mxu3 %vm942_vm2, %v2842_v46  ;;  %v2895_v45 = vld [vmem:[%s5492_s4 + $0xe8] sm:$0xff]  ;;  %v2935_v46 = vld [vmem:[%s5492_s4 + $0x318] sm:$0xff] }
  0xff   : > { %1086 = vmatpush.msra.mxu3 %v1017_v47  ;;  %1059 = vmatpush.msrb.mxu2 %v2869_v48  ;;  %v2926_v47 = vld [vmem:[%s5492_s4 + $0x160] sm:$0xff] }
 0x100   : > { %1275 = vmatpush.msra.mxu0 %v2927_v44  ;;  %1319 = vmatpush.msra.mxu1 %v2935_v46  ;;  %v2894_v48 = vld [vmem:[%s5492_s4 + $0xe0] sm:$0xff] }
 0x101   : > { %1087 = vmatpush.msra.mxu3 %v1016_v51  ;;  %1060 = vmatpush.msrb.mxu2 %v2868_v52  ;;  %v2893_v51 = vld [vmem:[%s5492_s4 + $0xd8] sm:$0xff]  ;;  %v2933_v52 = vld [vmem:[%s5492_s4 + $0x308] sm:$0xff] }
 0x102   : > { %1276 = vmatpush.msra.mxu0 %v2926_v47  ;;  %1320 = vmatpush.msra.mxu1 %v2934_v49 }
 0x103   : > { %1088 = vmatpush.msra.mxu3 %v1015_v55  ;;  %1061 = vmatpush.msrb.mxu2 %v2867_v56  ;;  %v2932_v55 = vld [vmem:[%s5492_s4 + $0x300] sm:$0xff]  ;;  %v2923_v56 = vld [vmem:[%s5492_s4 + $0x148] sm:$0xff] }
 0x104   : > { %1277 = vmatpush.msra.mxu0 %v2925_v50  ;;  %1321 = vmatpush.msra.mxu1 %v2933_v52 }
 0x105   : > { %1089 = vmatpush.msra.mxu3 %v1014_v58  ;;  %1062 = vmatpush.msrb.mxu2 %v2866_v59  ;;  %v2922_v58 = vld [vmem:[%s5492_s4 + $0x140] sm:$0xff] }
 0x106   : > { %2841 = vmatmul.msk.f32.gmra.mxu2 %vm942_vm2, %v941_v60  ;;  %2845 = vmatmul.msk.f32.gmra.mxu3 %vm942_vm2, %v2843_v61  ;;  %v2890_v59 = vld [vmem:[%s5492_s4 + $0xc0] sm:$0xff]  ;;  %v2921_v60 = vld [vmem:[%s5492_s4 + $0x138] sm:$0xff]  ;;  %v2920_v61 = vld [vmem:[%s5492_s4 + $0x130] sm:$0xff] }
 0x107   : > { %1090 = vmatpush.msra.mxu3 %v1013_v62  ;;  %1063 = vmatpush.msrb.mxu2 %v2865_v63  ;;  %v2919_v62 = vld [vmem:[%s5492_s4 + $0x128] sm:$0xff]  ;;  %v2918_v63 = vld [vmem:[%s5492_s4 + $0x120] sm:$0xff] }
 0x108   : > { %1278 = vmatpush.msra.mxu0 %v2924_v53  ;;  %1322 = vmatpush.msra.mxu1 %v2932_v55 }
 0x109   : > { %1091 = vmatpush.msra.mxu3 %v1012_v0  ;;  %1064 = vmatpush.msrb.mxu2 %v2864_v1 }
 0x10a   : > { %1279 = vmatpush.msra.mxu0 %v2923_v56 }
 0x10b   : > { %1092 = vmatpush.msra.mxu3 %v1011_v2  ;;  %1065 = vmatpush.msrb.mxu2 %v2863_v3  ;;  %v2971_v3 = vld [vmem:[%s5492_s4 + $0x3b8] sm:$0xff] }
 0x10c   : > { %1280 = vmatpush.msra.mxu0 %v2922_v58  ;;  %v3036_v58 = vld [vmem:[%s5495_s7 + $0x3a8] sm:$0xff] }
 0x10d   : > { %1093 = vmatpush.msra.mxu3 %v1010_v4  ;;  %1066 = vmatpush.msrb.mxu2 %v2862_v5  ;;  %v2970_v4 = vld [vmem:[%s5492_s4 + $0x3b0] sm:$0xff]  ;;  %v2969_v5 = vld [vmem:[%s5492_s4 + $0x3a8] sm:$0xff] }
 0x10e   : > { %1281 = vmatpush.msra.mxu0 %v2921_v60  ;;  %v3037_v60 = vld [vmem:[%s5495_s7 + $0x3b0] sm:$0xff] }
 0x10f   : > { %1094 = vmatpush.msra.mxu3 %v1009_v6  ;;  %1067 = vmatpush.msrb.mxu2 %v2861_v9  ;;  %v2968_v6 = vld [vmem:[%s5492_s4 + $0x3a0] sm:$0xff] }
 0x110   : > { %1282 = vmatpush.msra.mxu0 %v2920_v61  ;;  %v3030_v61 = vld [vmem:[%s5495_s7 + $0x378] sm:$0xff] }
 0x111   : > { %1095 = vmatpush.msra.mxu3 %v1008_v7  ;;  %1068 = vmatpush.msrb.mxu2 %v2860_v8 }
 0x112   : > { %1283 = vmatpush.msra.mxu0 %v2919_v62  ;;  %v3031_v62 = vld [vmem:[%s5495_s7 + $0x380] sm:$0xff] }
 0x113   : > { %1096 = vmatpush.msra.mxu3 %v1007_v10  ;;  %1069 = vmatpush.msrb.mxu2 %v2859_v11  ;;  %v2967_v10 = vld [vmem:[%s5492_s4 + $0x398] sm:$0xff] }
 0x114   : > { %1284 = vmatpush.msra.mxu0 %v2918_v63  ;;  %v3032_v63 = vld [vmem:[%s5495_s7 + $0x388] sm:$0xff] }
 0x115   : > { %1097 = vmatpush.msra.mxu3 %v1006_v12  ;;  %1070 = vmatpush.msrb.mxu2 %v2858_v13  ;;  %v2966_v13 = vld [vmem:[%s5492_s4 + $0x390] sm:$0xff] }
 0x117   : > { %1227 = vmatpush.msrb.mxu3 %v2915_v14  ;;  %1189 = vmatpush.msra.mxu2 %v2901_v21  ;;  %v2957_v14 = vld [vmem:[%s5492_s4 + $0x1d8] sm:$0xff] }
 0x119   : > { %1228 = vmatpush.msrb.mxu3 %v2914_v16  ;;  %1190 = vmatpush.msra.mxu2 %v2900_v25 }
 0x11b   : > { %1229 = vmatpush.msrb.mxu3 %v2913_v17  ;;  %1191 = vmatpush.msra.mxu2 %v2899_v29  ;;  %v2953_v29 = vld [vmem:[%s5492_s4 + $0x1b8] sm:$0xff] }
 0x11d   : > { %1230 = vmatpush.msrb.mxu3 %v2912_v18  ;;  %1192 = vmatpush.msra.mxu2 %v2898_v33  ;;  %v2951_v33 = vld [vmem:[%s5492_s4 + $0x1a8] sm:$0xff] }
 0x11f   : > { %1231 = vmatpush.msrb.mxu3 %v2911_v19  ;;  %1193 = vmatpush.msra.mxu2 %v2897_v37  ;;  %v2965_v19 = vld [vmem:[%s5492_s4 + $0x388] sm:$0xff]  ;;  %v2949_v37 = vld [vmem:[%s5492_s4 + $0x198] sm:$0xff] }
 0x121   : > { %1232 = vmatpush.msrb.mxu3 %v2910_v15  ;;  %1194 = vmatpush.msra.mxu2 %v2896_v41  ;;  %v2956_v15 = vld [vmem:[%s5492_s4 + $0x1d0] sm:$0xff]  ;;  %v2946_v41 = vld [vmem:[%s5492_s4 + $0x180] sm:$0xff] }
 0x123   : > { %1233 = vmatpush.msrb.mxu3 %v2909_v23  ;;  %1195 = vmatpush.msra.mxu2 %v2895_v45  ;;  %v2955_v23 = vld [vmem:[%s5492_s4 + $0x1c8] sm:$0xff] }
 0x125   : > { %1234 = vmatpush.msrb.mxu3 %v2908_v27  ;;  %1196 = vmatpush.msra.mxu2 %v2894_v48  ;;  %v2954_v27 = vld [vmem:[%s5492_s4 + $0x1c0] sm:$0xff] }
 0x127   : > { %1235 = vmatpush.msrb.mxu3 %v2907_v31  ;;  %1197 = vmatpush.msra.mxu2 %v2893_v51  ;;  %v2952_v31 = vld [vmem:[%s5492_s4 + $0x1b0] sm:$0xff] }
 0x129   : > { %1236 = vmatpush.msrb.mxu3 %v2906_v35  ;;  %1198 = vmatpush.msra.mxu2 %v2892_v54  ;;  %v2950_v35 = vld [vmem:[%s5492_s4 + $0x1a0] sm:$0xff] }
 0x12b   : > { %1237 = vmatpush.msrb.mxu3 %v2905_v39  ;;  %1199 = vmatpush.msra.mxu2 %v2891_v57  ;;  %v2948_v39 = vld [vmem:[%s5492_s4 + $0x190] sm:$0xff]  ;;  %v3035_v57 = vld [vmem:[%s5495_s7 + $0x3a0] sm:$0xff] }
 0x12d   : > { %1238 = vmatpush.msrb.mxu3 %v2904_v43  ;;  %1200 = vmatpush.msra.mxu2 %v2890_v59 }
 0x181   : > { %v966_v0 = vpop.f32.mrf.mxu2  ;;  %v998_v1 = vpop.f32.mrf.mxu3 }
 0x182   : > { %v3957_v2 = vmax.f32 %v966_v0, %v998_v1 }
 0x184   : > { %2872 = vmatmul.msk.f32.vlgmr.msra.gmra.mxu3 %vm1050_vm3, %v3957_v2  ;;  %2888 = vmatmul.msk.f32.vlgmr.msrb.gmra.mxu1 %vm1050_vm3, %v3957_v2  ;;  %v1047_v11 = vrot.slane %v3957_v2, 1  ;;  %v1178_v20 = vrot.slane %v3957_v2, 2  ;;  %v1262_v21 = vrot.slane %v3957_v2, 3  ;;  %v1345_v36 = vrot.slane %v3957_v2, 4  ;;  %v3025_v2 = vld [vmem:[%s5495_s7 + $0x350] sm:$0xff] }
 0x185   : > { %1394 = vmatpush.msra.mxu3 %v2971_v3  ;;  %1628 = vmatpush.msrb.mxu1 %v3035_v57  ;;  %v3026_v3 = vld [vmem:[%s5495_s7 + $0x358] sm:$0xff] }
 0x186   : > { %v2982_v57 = vld [vmem:[%s5495_s7 + $0x1f8] sm:$0xff] }
 0x187   : > { %1395 = vmatpush.msra.mxu3 %v2970_v4  ;;  %1629 = vmatpush.msrb.mxu1 %v3030_v61  ;;  %v3027_v4 = vld [vmem:[%s5495_s7 + $0x360] sm:$0xff]  ;;  %v3034_v61 = vld [vmem:[%s5495_s7 + $0x398] sm:$0xff] }
 0x189   : > { %v969_v9 = vpop.f32.mrf.mxu2  ;;  %v1001_v7 = vpop.f32.mrf.mxu3  ;;  %1396 = vmatpush.msra.mxu3 %v2969_v5  ;;  %1630 = vmatpush.msrb.mxu1 %v3025_v2  ;;  %v1524_v2 = vld [vmem:[%s5495_s7 + $0x168] sm:$0xff] }
 0x18a   : > { %v1005_v8 = vmax.f32 %v969_v9, %v1001_v7  ;;  %v3021_v9 = vld [vmem:[%s5495_s7 + $0x330] sm:$0xff] }
 0x18b   : > { %1397 = vmatpush.msra.mxu3 %v2968_v6  ;;  %v3020_v6 = vld [vmem:[%s5495_s7 + $0x328] sm:$0xff] }
 0x18c   : > { %2873 = vmatmul.msk.f32.gmra.mxu3 %vm1050_vm3, %v1005_v8  ;;  %2889 = vmatmul.msk.f32.gmra.mxu1 %vm1050_vm3, %v1005_v8  ;;  %v1048_v12 = vrot.slane %v1005_v8, 1  ;;  %v1179_v17 = vrot.slane %v1005_v8, 2  ;;  %v1263_v18 = vrot.slane %v1005_v8, 3  ;;  %v1346_v34 = vrot.slane %v1005_v8, 4 }
 0x18d   : > { %1398 = vmatpush.msra.mxu3 %v2967_v10  ;;  %1631 = vmatpush.msrb.mxu1 %v3020_v6  ;;  %v1519_v6 = vld [vmem:[%s5495_s7 + $0x140] sm:$0xff] }
 0x18e   : > { %v1049_v16 = vsel %vm1046_vm4, %v1047_v11, %v1048_v12  ;;  %v1180_v24 = vsel %vm1177_vm5, %v1178_v20, %v1179_v17  ;;  %v1264_v25 = vsel %vm1261_vm6, %v1262_v21, %v1263_v18  ;;  %v1347_v38 = vsel %vm477_vm0, %v1345_v36, %v1346_v34  ;;  %v3022_v11 = vld [vmem:[%s5495_s7 + $0x338] sm:$0xff] }
 0x18f   : > { %2870 = vmatmul.msk.f32.vlgmr.msrb.gmra.mxu2 %vm1050_vm3, %v1049_v16  ;;  %2886 = vmatmul.msk.f32.vlgmr.msrb.gmra.mxu0 %vm1050_vm3, %v1049_v16 }
 0x190   : > { %1399 = vmatpush.msra.mxu3 %v2966_v13  ;;  %1356 = vmatpush.msrb.mxu2 %v2957_v14  ;;  %v3016_v13 = vld [vmem:[%s5495_s7 + $0x308] sm:$0xff] }
 0x192   : > { %1400 = vmatpush.msra.mxu3 %v2965_v19  ;;  %1357 = vmatpush.msrb.mxu2 %v2956_v15  ;;  %v3010_v19 = vld [vmem:[%s5495_s7 + $0x2d8] sm:$0xff]  ;;  %v3011_v15 = vld [vmem:[%s5495_s7 + $0x2e0] sm:$0xff] }
 0x194   : > { %2916 = vmatmul.msk.f32.vlgmr.msrb.gmra.mxu3 %vm1050_vm3, %v1180_v24  ;;  %2944 = vmatmul.msk.f32.vlgmr.msra.gmra.mxu1 %vm1050_vm3, %v1264_v25 }
 0x195   : > { %1401 = vmatpush.msra.mxu3 %v2964_v22  ;;  %1358 = vmatpush.msrb.mxu2 %v2955_v23  ;;  %v3012_v23 = vld [vmem:[%s5495_s7 + $0x2e8] sm:$0xff] }
 0x197   : > { %2871 = vmatmul.msk.f32.gmra.mxu2 %vm1050_vm3, %v1048_v12  ;;  %2887 = vmatmul.msk.f32.gmra.mxu0 %vm1050_vm3, %v1048_v12  ;;  %v3015_v12 = vld [vmem:[%s5495_s7 + $0x300] sm:$0xff] }
 0x198   : > { %1402 = vmatpush.msra.mxu3 %v2963_v26  ;;  %1359 = vmatpush.msrb.mxu2 %v2954_v27  ;;  %v3005_v26 = vld [vmem:[%s5495_s7 + $0x2b0] sm:$0xff]  ;;  %v3006_v27 = vld [vmem:[%s5495_s7 + $0x2b8] sm:$0xff] }
 0x199   : > { %1632 = vmatpush.msrb.mxu1 %v3015_v12  ;;  %v1515_v12 = vld [vmem:[%s5495_s7 + $0x120] sm:$0xff] }
 0x19a   : > { %1403 = vmatpush.msra.mxu3 %v2962_v28  ;;  %1360 = vmatpush.msrb.mxu2 %v2953_v29 }
 0x19b   : > { %1633 = vmatpush.msrb.mxu1 %v3010_v19  ;;  %v2994_v19 = vld [vmem:[%s5495_s7 + $0x258] sm:$0xff] }
 0x19c   : > { %2917 = vmatmul.msk.f32.gmra.mxu3 %vm1050_vm3, %v1179_v17  ;;  %2945 = vmatmul.msk.f32.gmra.mxu1 %vm1050_vm3, %v1263_v18 }
 0x19d   : > { %1404 = vmatpush.msra.mxu3 %v2961_v30  ;;  %1361 = vmatpush.msrb.mxu2 %v2952_v31  ;;  %v3007_v31 = vld [vmem:[%s5495_s7 + $0x2c0] sm:$0xff] }
 0x19e   : > { %1634 = vmatpush.msrb.mxu1 %v3005_v26  ;;  %v3018_v26 = vld [vmem:[%s5495_s7 + $0x318] sm:$0xff] }
 0x19f   : > { %2902 = vmatmul.msk.f32.vlgmr.msra.gmra.mxu2 %vm1050_vm3, %v1180_v24  ;;  %2930 = vmatmul.msk.f32.vlgmr.msra.gmra.mxu0 %vm1050_vm3, %v1264_v25 }
 0x1a0   : > { %1405 = vmatpush.msra.mxu3 %v2960_v32  ;;  %1362 = vmatpush.msrb.mxu2 %v2951_v33  ;;  %v3000_v33 = vld [vmem:[%s5495_s7 + $0x288] sm:$0xff] }
 0x1a1   : > { %1635 = vmatpush.msrb.mxu1 %v3000_v33  ;;  %v1505_v33 = vld [vmem:[%s5495_s7 + $0xd0] sm:$0xff] }
 0x1a2   : > { %1363 = vmatpush.msrb.mxu2 %v2950_v35  ;;  %1668 = vmatpush.msrb.mxu3 %v3037_v60  ;;  %v1536_v60 = vld [vmem:[%s5495_s7 + $0x1c8] sm:$0xff] }
 0x1a4   : > { %2972 = vmatmul.msk.f32.vlgmr.msra.gmra.mxu3 %vm1050_vm3, %v1347_v38  ;;  %1364 = vmatpush.msrb.mxu2 %v2949_v37 }
 0x1a5   : > { %1669 = vmatpush.msrb.mxu3 %v3032_v63  ;;  %v1530_v63 = vld [vmem:[%s5495_s7 + $0x198] sm:$0xff] }
 0x1a6   : > { %1365 = vmatpush.msrb.mxu2 %v2948_v39  ;;  %v3002_v39 = vld [vmem:[%s5495_s7 + $0x298] sm:$0xff] }
 0x1a7   : > { %2903 = vmatmul.msk.f32.gmra.mxu2 %vm1050_vm3, %v1179_v17  ;;  %2931 = vmatmul.msk.f32.gmra.mxu0 %vm1050_vm3, %v1263_v18  ;;  %v3017_v18 = vld [vmem:[%s5495_s7 + $0x310] sm:$0xff] }
 0x1a8   : > { %1366 = vmatpush.msrb.mxu2 %v2947_v40  ;;  %1670 = vmatpush.msrb.mxu3 %v3027_v4  ;;  %v2995_v40 = vld [vmem:[%s5495_s7 + $0x260] sm:$0xff]  ;;  %v1526_v4 = vld [vmem:[%s5495_s7 + $0x178] sm:$0xff] }
 0x1a9   : > { %1636 = vmatpush.msrb.mxu1 %v2995_v40  ;;  %v1494_v40 = vld [vmem:[%s5495_s7 + $0x78] sm:$0xff] }
 0x1aa   : > { %1367 = vmatpush.msrb.mxu2 %v2946_v41  ;;  %1671 = vmatpush.msrb.mxu3 %v3022_v11  ;;  %v2996_v41 = vld [vmem:[%s5495_s7 + $0x268] sm:$0xff]  ;;  %v3019_v11 = vld [vmem:[%s5495_s7 + $0x320] sm:$0xff] }
 0x1ac   : > { %2973 = vmatmul.msk.f32.gmra.mxu3 %vm1050_vm3, %v1346_v34  ;;  %1648 = vmatpush.msra.mxu2 %v3036_v58  ;;  %v1534_v58 = vld [vmem:[%s5495_s7 + $0x1b8] sm:$0xff] }
 0x1ad   : > { %1672 = vmatpush.msrb.mxu3 %v3017_v18  ;;  %v2999_v18 = vld [vmem:[%s5495_s7 + $0x280] sm:$0xff] }
 0x1ae   : > { %1649 = vmatpush.msra.mxu2 %v3031_v62  ;;  %v1529_v62 = vld [vmem:[%s5495_s7 + $0x190] sm:$0xff] }
 0x1af   : > { %2958 = vmatmul.msk.f32.vlgmr.msrb.gmra.mxu2 %vm1050_vm3, %v1347_v38  ;;  %1673 = vmatpush.msrb.mxu3 %v3012_v23  ;;  %v3327_v38 = vld [vmem:[%s5493_s5] ss:$0 sm:$0xff]  ;;  %v3033_v23 = vld [vmem:[%s5495_s7 + $0x390] sm:$0xff] }
 0x1b0   : > { %1650 = vmatpush.msra.mxu2 %v3026_v3  ;;  %v1525_v3 = vld [vmem:[%s5495_s7 + $0x170] sm:$0xff] }
 0x1b1   : > { %1674 = vmatpush.msrb.mxu3 %v3007_v31  ;;  %v3008_v31 = vld [vmem:[%s5495_s7 + $0x2c8] sm:$0xff] }
 0x1b2   : > { %1651 = vmatpush.msra.mxu2 %v3021_v9  ;;  %v3024_v9 = vld [vmem:[%s5495_s7 + $0x348] sm:$0xff] }
 0x1b3   : > { %1675 = vmatpush.msrb.mxu3 %v3002_v39  ;;  %v2998_v39 = vld [vmem:[%s5495_s7 + $0x278] sm:$0xff] }
 0x1b4   : > { %1652 = vmatpush.msra.mxu2 %v3016_v13  ;;  %v1516_v13 = vld [vmem:[%s5495_s7 + $0x128] sm:$0xff] }
 0x1b6   : > { %1653 = vmatpush.msra.mxu2 %v3011_v15  ;;  %v2989_v15 = vld [vmem:[%s5495_s7 + $0x230] sm:$0xff] }
 0x1b7   : > { %2959 = vmatmul.msk.f32.gmra.mxu2 %vm1050_vm3, %v1346_v34  ;;  %v3001_v34 = vld [vmem:[%s5495_s7 + $0x290] sm:$0xff] }
 0x1b8   : > { %1654 = vmatpush.msra.mxu2 %v3006_v27  ;;  %v3013_v27 = vld [vmem:[%s5495_s7 + $0x2f0] sm:$0xff] }
 0x1ba   : > { %1655 = vmatpush.msra.mxu2 %v3001_v34  ;;  %v1506_v34 = vld [vmem:[%s5495_s7 + $0xd8] sm:$0xff] }
 0x1bc   : > { %1656 = vmatpush.msra.mxu2 %v2996_v41  ;;  %v1495_v41 = vld [vmem:[%s5495_s7 + $0x80] sm:$0xff] }
 0x201   : > { %v1158_v45 = vpop.f32.mrf.mxu1 }
 0x207   : > { %v1099_v42 = vpop.f32.mrf.mxu3 }
 0x209   : > { %v1161_v50 = vpop.f32.mrf.mxu1 }
 0x20c   : > { %v1135_v46 = vpop.f32.mrf.mxu0 }
 0x20d   : > { %v1159_v0 = vadd.f32 %v1158_v45, %v1135_v46  ;;  %v2991_v45 = vld [vmem:[%s5495_s7 + $0x240] sm:$0xff] }
 0x20e   : > { %1657 = vmatpush.msra.mxu2 %v2991_v45  ;;  %v1490_v45 = vld [vmem:[%s5495_s7 + $0x58] sm:$0xff] }
 0x20f   : > { %v1102_v43 = vpop.f32.mrf.mxu3 }
 0x211   : > { %v1324_v54 = vpop.f32.mrf.mxu1 }
 0x212   : > { %v1072_v44 = vpop.f32.mrf.mxu2 }
 0x213   : > { %v1100_v59 = vadd.f32 %v1099_v42, %v1072_v44  ;;  %v2990_v44 = vld [vmem:[%s5495_s7 + $0x238] sm:$0xff] }
 0x214   : > { %v1138_v51 = vpop.f32.mrf.mxu0  ;;  %1637 = vmatpush.msrb.mxu1 %v2990_v44  ;;  %v1489_v44 = vld [vmem:[%s5495_s7 + $0x50] sm:$0xff] }
 0x215   : > { %v1162_v7 = vadd.f32 %v1161_v50, %v1138_v51  ;;  %v2986_v51 = vld [vmem:[%s5495_s7 + $0x218] sm:$0xff] }
 0x216   : > { %1658 = vmatpush.msra.mxu2 %v2986_v51  ;;  %v2983_v51 = vld [vmem:[%s5495_s7 + $0x200] sm:$0xff] }
 0x217   : > { %v1240_v47 = vpop.f32.mrf.mxu3 }
 0x218   : > { %v1246_v8 = vadd.f32 %v1240_v47, %v1159_v0  ;;  %v1531_v0 = vld [vmem:[%s5495_s7 + $0x1a0] sm:$0xff] }
 0x219   : > { %v1327_v20 = vpop.f32.mrf.mxu1 }
 0x21a   : > { %v1075_v48 = vpop.f32.mrf.mxu2  ;;  %v1330_v21 = vadd.f32 %v1324_v54, %v1246_v8  ;;  %v1521_v8 = vld [vmem:[%s5495_s7 + $0x150] sm:$0xff] }
 0x21b   : > { %v1103_v10 = vadd.f32 %v1102_v43, %v1075_v48  ;;  %v2997_v43 = vld [vmem:[%s5495_s7 + $0x270] sm:$0xff]  ;;  %v2992_v48 = vld [vmem:[%s5495_s7 + $0x248] sm:$0xff] }
 0x21c   : > { %v1286_v55 = vpop.f32.mrf.mxu0  ;;  %1676 = vmatpush.msrb.mxu3 %v2997_v43  ;;  %v2993_v43 = vld [vmem:[%s5495_s7 + $0x250] sm:$0xff] }
 0x21e   : > { %1677 = vmatpush.msrb.mxu3 %v2992_v48  ;;  %v1484_v48 = vld [vmem:[%s5495_s7 + $0x28] sm:$0xff] }
 0x21f   : > { %v1243_v52 = vpop.f32.mrf.mxu3 }
 0x220   : > { %v1247_v14 = vadd.f32 %v1243_v52, %v1162_v7  ;;  %v2987_v52 = vld [vmem:[%s5495_s7 + $0x220] sm:$0xff]  ;;  %v1520_v7 = vld [vmem:[%s5495_s7 + $0x148] sm:$0xff] }
 0x221   : > { %1678 = vmatpush.msrb.mxu3 %v2987_v52  ;;  %v1479_v52 = vld [vmem:[%s5495_s7] sm:$0xff] }
 0x222   : > { %v1202_v49 = vpop.f32.mrf.mxu2  ;;  %v1331_v29 = vadd.f32 %v1327_v20, %v1247_v14  ;;  %v3014_v14 = vld [vmem:[%s5495_s7 + $0x2f8] sm:$0xff]  ;;  %v2984_v20 = vld [vmem:[%s5495_s7 + $0x208] sm:$0xff] }
 0x223   : > { %v1208_v1 = vadd.f32 %v1202_v49, %v1100_v59  ;;  %v2985_v49 = vld [vmem:[%s5495_s7 + $0x210] sm:$0xff]  ;;  %v1535_v59 = vld [vmem:[%s5495_s7 + $0x1c0] sm:$0xff]  ;;  %1679 = vmatpush.msrb.mxu3 %v2982_v57 }
 0x224   : > { %v1289_v24 = vpop.f32.mrf.mxu0  ;;  %1638 = vmatpush.msrb.mxu1 %v2985_v49  ;;  %v1485_v49 = vld [vmem:[%s5495_s7 + $0x30] sm:$0xff] }
 0x225   : > { %v1292_v17 = vadd.f32 %v1286_v55, %v1208_v1  ;;  %v1425_v55 = vld [vmem:[%s5494_s6] sm:$0x3f]  ;;  %v3029_v1 = vld [vmem:[%s5495_s7 + $0x370] sm:$0xff]  ;;  %1750 = vmatpush.msra.mxu3 %v1536_v60  ;;  %v1538_v60 = vld [vmem:[%s5495_s7 + $0x1d8] sm:$0xff] }
 0x227   : > { %v1407_v56 = vpop.f32.mrf.mxu3  ;;  %1751 = vmatpush.msra.mxu3 %v1531_v0  ;;  %v1533_v0 = vld [vmem:[%s5495_s7 + $0x1b0] sm:$0xff] }
 0x228   : > { %v1413_v28 = vadd.f32 %v1407_v56, %v1330_v21  ;;  %v2981_v56 = vld [vmem:[%s5495_s7 + $0x1f0] sm:$0xff]  ;;  %v2979_v21 = vld [vmem:[%s5495_s7 + $0x1e0] sm:$0xff] }
 0x229   : > { %1659 = vmatpush.msra.mxu2 %v2981_v56  ;;  %1752 = vmatpush.msra.mxu3 %v1526_v4  ;;  %v1528_v4 = vld [vmem:[%s5495_s7 + $0x188] sm:$0xff] }
 0x22a   : > { %v1205_v53 = vpop.f32.mrf.mxu2 }
 0x22b   : > { %v1209_v16 = vadd.f32 %v1205_v53, %v1103_v10  ;;  %v2980_v53 = vld [vmem:[%s5495_s7 + $0x1e8] sm:$0xff]  ;;  %1730 = vmatpush.msrb.mxu2 %v1535_v59  ;;  %v1514_v10 = vld [vmem:[%s5495_s7 + $0x118] sm:$0xff]  ;;  %1753 = vmatpush.msra.mxu3 %v1521_v8  ;;  %v1537_v59 = vld [vmem:[%s5495_s7 + $0x1d0] sm:$0xff] }
 0x22c   : > { %1639 = vmatpush.msrb.mxu1 %v2980_v53  ;;  %v1480_v53 = vld [vmem:[%s5495_s7 + $0x8] sm:$0xff]  ;;  %v3089_v8 = vld [vmem:[%s5495_s7 + $0x500] sm:$0xff] }
 0x22d   : > { %v1293_v30 = vadd.f32 %v1289_v24, %v1209_v16  ;;  %1731 = vmatpush.msrb.mxu2 %v1530_v63  ;;  %v3009_v16 = vld [vmem:[%s5495_s7 + $0x2d0] sm:$0xff]  ;;  %1754 = vmatpush.msra.mxu3 %v1516_v13  ;;  %v3028_v24 = vld [vmem:[%s5495_s7 + $0x368] sm:$0xff]  ;;  %v3084_v13 = vld [vmem:[%s5495_s7 + $0x4d8] sm:$0xff] }
 0x22e   : > { %1710 = vmatpush.msra.mxu1 %v1534_v58  ;;  %v1532_v63 = vld [vmem:[%s5495_s7 + $0x1a8] sm:$0xff] }
 0x22f   : > { %v1410_v25 = vpop.f32.mrf.mxu3  ;;  %1732 = vmatpush.msrb.mxu2 %v1525_v3  ;;  %v1527_v3 = vld [vmem:[%s5495_s7 + $0x180] sm:$0xff] }
 0x230   : > { %v1414_v35 = vadd.f32 %v1410_v25, %v1331_v29  ;;  %1711 = vmatpush.msra.mxu1 %v1529_v62  ;;  %v3023_v25 = vld [vmem:[%s5495_s7 + $0x340] sm:$0xff]  ;;  %v1510_v29 = vld [vmem:[%s5495_s7 + $0xf8] sm:$0xff] }
 0x231   : > { %1733 = vmatpush.msrb.mxu2 %v1520_v7  ;;  %v3105_v62 = vld [vmem:[%s5495_s7 + $0x580] sm:$0xff] }
 0x232   : > { %v1369_v5 = vpop.f32.mrf.mxu2  ;;  %1712 = vmatpush.msra.mxu1 %v1524_v2  ;;  %v3100_v2 = vld [vmem:[%s5495_s7 + $0x558] sm:$0xff]  ;;  %v1523_v7 = vld [vmem:[%s5495_s7 + $0x160] sm:$0xff] }
 0x233   : > { %v1375_v22 = vadd.f32 %v1369_v5, %v1292_v17  ;;  %v2976_v5 = vld [vmem:[%s5494_s6 + $0x8] sm:$0x3f]  ;;  %1734 = vmatpush.msrb.mxu2 %v1515_v12  ;;  %v1518_v12 = vld [vmem:[%s5495_s7 + $0x138] sm:$0xff] }
 0x234   : > { %1713 = vmatpush.msra.mxu1 %v1519_v6  ;;  %v3004_v17 = vld [vmem:[%s5495_s7 + $0x2a8] sm:$0xff]  ;;  %v3095_v6 = vld [vmem:[%s5495_s7 + $0x530] sm:$0xff] }
 0x235   : > { %v1415_v36 = vmax.f32 %v1375_v22, %v1413_v28  ;;  %v3038_v22 = vld [vmem:[%s5495_s7 + $0x3b8] sm:$0xff]  ;;  %v1509_v28 = vld [vmem:[%s5495_s7 + $0xf0] sm:$0xff]  ;;  %1735 = vmatpush.msrb.mxu2 %v1510_v29 }
 0x236   : > { %1714 = vmatpush.msra.mxu1 %v1514_v10  ;;  %v3090_v10 = vld [vmem:[%s5495_s7 + $0x508] sm:$0xff]  ;;  %v3064_v29 = vld [vmem:[%s5495_s7 + $0x438] sm:$0xff] }
 0x237   : > { %v1421_v47 = vadd.f32 %v3327_v38, %v1415_v36  ;;  %v1499_v36 = vld [vmem:[%s5495_s7 + $0xa0] sm:$0xff]  ;;  %1736 = vmatpush.msrb.mxu2 %v1505_v33  ;;  %v3059_v33 = vld [vmem:[%s5495_s7 + $0x410] sm:$0xff] }
 0x238   : > { %1715 = vmatpush.msra.mxu1 %v1509_v28  ;;  %v1498_v28 = vld [vmem:[%s5495_s7 + $0x98] sm:$0xff] }
 0x239   : > { %v1423_v54 = vmax.f32 %v1421_v47, 0.0  ;;  %v2988_v47 = vld [vmem:[%s5495_s7 + $0x228] sm:$0xff] }
 0x23a   : > { %v1372_v32 = vpop.f32.mrf.mxu2 }
 0x23b   : > { %v1376_v37 = vadd.f32 %v1372_v32, %v1293_v30  ;;  %v1511_v30 = vld [vmem:[%s5495_s7 + $0x100] sm:$0xff]  ;;  %v1504_v32 = vld [vmem:[%s5495_s7 + $0xc8] sm:$0xff] }
 0x23c   : > { %1755 = vmatpush.msra.mxu3 %v1511_v30  ;;  %1716 = vmatpush.msra.mxu1 %v1504_v32  ;;  %v3065_v30 = vld [vmem:[%s5495_s7 + $0x440] sm:$0xff]  ;;  %v1493_v32 = vld [vmem:[%s5495_s7 + $0x70] sm:$0xff] }
 0x23d   : > { %v1416_v42 = vmax.f32 %v1376_v37, %v1414_v35  ;;  %v3003_v35 = vld [vmem:[%s5495_s7 + $0x2a0] sm:$0xff]  ;;  %v1500_v37 = vld [vmem:[%s5495_s7 + $0xa8] sm:$0xff] }
 0x23e   : > { %1756 = vmatpush.msra.mxu3 %v1506_v34  ;;  %1717 = vmatpush.msra.mxu1 %v1499_v36  ;;  %v3060_v34 = vld [vmem:[%s5495_s7 + $0x418] sm:$0xff]  ;;  %v1488_v36 = vld [vmem:[%s5495_s7 + $0x48] sm:$0xff] }
 0x23f   : > { %v1422_v46 = vadd.f32 %v3327_v38, %v1416_v42  ;;  %v1501_v38 = vld [vmem:[%s5495_s7 + $0xb0] sm:$0xff]  ;;  %v1496_v42 = vld [vmem:[%s5495_s7 + $0x88] sm:$0xff]  ;;  %1737 = vmatpush.msrb.mxu2 %v1500_v37 }
 0x240   : > { %1757 = vmatpush.msra.mxu3 %v1501_v38  ;;  %1718 = vmatpush.msra.mxu1 %v1494_v40  ;;  %v3054_v37 = vld [vmem:[%s5495_s7 + $0x3e8] sm:$0xff]  ;;  %v3055_v38 = vld [vmem:[%s5495_s7 + $0x3f0] sm:$0xff]  ;;  %v1483_v40 = vld [vmem:[%s5495_s7 + $0x20] sm:$0xff] }
 0x241   : > { %v1424_v50 = vmax.f32 %v1422_v46, 0.0  ;;  %1738 = vmatpush.msrb.mxu2 %v1495_v41  ;;  %v1491_v46 = vld [vmem:[%s5495_s7 + $0x60] sm:$0xff] }
 0x242   : > { %1758 = vmatpush.msra.mxu3 %v1496_v42  ;;  %1719 = vmatpush.msra.mxu1 %v1489_v44  ;;  %v3049_v41 = vld [vmem:[%s5495_s7 + $0x3c0] sm:$0xff]  ;;  %v3050_v42 = vld [vmem:[%s5495_s7 + $0x3c8] sm:$0xff] }
 0x243   : > { %2974 = vmatpush.msk.msrb.mxu0 %vm477_vm0, %v1424_v50  ;;  %1739 = vmatpush.msrb.mxu2 %v1490_v45  ;;  %v3106_v44 = vld [vmem:[%s5495_s7 + $0x588] sm:$0xff]  ;;  %v3107_v45 = vld [vmem:[%s5495_s7 + $0x590] sm:$0xff] }
 0x244   : > { %1759 = vmatpush.msra.mxu3 %v1491_v46  ;;  %1720 = vmatpush.msra.mxu1 %v1484_v48  ;;  %v3108_v46 = vld [vmem:[%s5495_s7 + $0x598] sm:$0xff]  ;;  %v3101_v48 = vld [vmem:[%s5495_s7 + $0x560] sm:$0xff] }
 0x245   : > { %1448 = vmatpush.msrb.mxu0 %v1423_v54  ;;  %1740 = vmatpush.msrb.mxu2 %v1485_v49  ;;  %v3102_v49 = vld [vmem:[%s5495_s7 + $0x568] sm:$0xff] }
 0x246   : > { %2975 = vmatmul.msk.f32.vlgmr.msrb.gmra.mxu0 %vm1426_vm7, %v1425_v55  ;;  %1721 = vmatpush.msra.mxu1 %v1479_v52  ;;  %v3096_v52 = vld [vmem:[%s5495_s7 + $0x538] sm:$0xff] }
 0x247   : > { %2977 = vmatpush.msk.msra.mxu0 %vm477_vm0, %v1424_v50  ;;  %v1486_v50 = vld [vmem:[%s5495_s7 + $0x38] sm:$0xff]  ;;  %1741 = vmatpush.msrb.mxu2 %v1480_v53  ;;  %v3097_v53 = vld [vmem:[%s5495_s7 + $0x540] sm:$0xff] }
 0x248   : > { %1760 = vmatpush.msra.mxu3 %v1486_v50  ;;  %v3103_v50 = vld [vmem:[%s5495_s7 + $0x570] sm:$0xff] }
 0x249   : > { %1473 = vmatpush.msra.mxu0 %v1423_v54  ;;  %v1481_v54 = vld [vmem:[%s5495_s7 + $0x10] sm:$0xff] }
 0x24a   : > { %1761 = vmatpush.msra.mxu3 %v1481_v54  ;;  %v3098_v54 = vld [vmem:[%s5495_s7 + $0x548] sm:$0xff] }
 0x24b   : > { %1608 = vmatpush.msrb.mxu0 %v3034_v61  ;;  %v3104_v61 = vld [vmem:[%s5495_s7 + $0x578] sm:$0xff] }
 0x24d   : > { %1609 = vmatpush.msrb.mxu0 %v3029_v1  ;;  %v3099_v1 = vld [vmem:[%s5495_s7 + $0x550] sm:$0xff] }
 0x24e   : > { %2978 = vmatmul.msk.f32.vlgmr.msra.gmra.mxu0 %vm1426_vm7, %v2976_v5  ;;  %v3094_v5 = vld [vmem:[%s5495_s7 + $0x528] sm:$0xff] }
 0x24f   : > { %1610 = vmatpush.msrb.mxu0 %v3024_v9  ;;  %v1522_v9 = vld [vmem:[%s5495_s7 + $0x158] sm:$0xff] }
 0x251   : > { %1611 = vmatpush.msrb.mxu0 %v3019_v11  ;;  %v1517_v11 = vld [vmem:[%s5495_s7 + $0x130] sm:$0xff] }
 0x253   : > { %1612 = vmatpush.msrb.mxu0 %v3014_v14  ;;  %v3085_v14 = vld [vmem:[%s5495_s7 + $0x4e0] sm:$0xff] }
 0x255   : > { %1613 = vmatpush.msrb.mxu0 %v3009_v16  ;;  %v1512_v16 = vld [vmem:[%s5495_s7 + $0x108] sm:$0xff] }
 0x257   : > { %1614 = vmatpush.msrb.mxu0 %v3004_v17  ;;  %v1513_v17 = vld [vmem:[%s5495_s7 + $0x110] sm:$0xff] }
 0x259   : > { %1615 = vmatpush.msrb.mxu0 %v2999_v18  ;;  %v3079_v18 = vld [vmem:[%s5495_s7 + $0x4b0] sm:$0xff] }
 0x25b   : > { %1616 = vmatpush.msrb.mxu0 %v2994_v19  ;;  %v3080_v19 = vld [vmem:[%s5495_s7 + $0x4b8] sm:$0xff] }
 0x25d   : > { %1617 = vmatpush.msrb.mxu0 %v2989_v15  ;;  %v1507_v15 = vld [vmem:[%s5495_s7 + $0xe0] sm:$0xff] }
 0x25f   : > { %1618 = vmatpush.msrb.mxu0 %v2984_v20  ;;  %v1508_v20 = vld [vmem:[%s5495_s7 + $0xe8] sm:$0xff] }
 0x261   : > { %1619 = vmatpush.msrb.mxu0 %v2979_v21  ;;  %v3074_v21 = vld [vmem:[%s5495_s7 + $0x488] sm:$0xff] }
 0x263   : > { %1688 = vmatpush.msra.mxu0 %v3038_v22  ;;  %v3075_v22 = vld [vmem:[%s5495_s7 + $0x490] sm:$0xff] }
 0x265   : > { %1689 = vmatpush.msra.mxu0 %v3033_v23  ;;  %v1502_v23 = vld [vmem:[%s5495_s7 + $0xb8] sm:$0xff] }
 0x267   : > { %1690 = vmatpush.msra.mxu0 %v3028_v24  ;;  %v1503_v24 = vld [vmem:[%s5495_s7 + $0xc0] sm:$0xff] }
 0x269   : > { %1691 = vmatpush.msra.mxu0 %v3023_v25  ;;  %v3069_v25 = vld [vmem:[%s5495_s7 + $0x460] sm:$0xff] }
 0x26b   : > { %1692 = vmatpush.msra.mxu0 %v3018_v26  ;;  %v3070_v26 = vld [vmem:[%s5495_s7 + $0x468] sm:$0xff] }
 0x26d   : > { %1693 = vmatpush.msra.mxu0 %v3013_v27  ;;  %v1497_v27 = vld [vmem:[%s5495_s7 + $0x90] sm:$0xff] }
 0x26f   : > { %1694 = vmatpush.msra.mxu0 %v3008_v31  ;;  %v1492_v31 = vld [vmem:[%s5495_s7 + $0x68] sm:$0xff] }
 0x271   : > { %1695 = vmatpush.msra.mxu0 %v3003_v35  ;;  %v1487_v35 = vld [vmem:[%s5495_s7 + $0x40] sm:$0xff] }
 0x273   : > { %1696 = vmatpush.msra.mxu0 %v2998_v39  ;;  %v1482_v39 = vld [vmem:[%s5495_s7 + $0x18] sm:$0xff] }
 0x275   : > { %1697 = vmatpush.msra.mxu0 %v2993_v43 }
 0x277   : > { %1698 = vmatpush.msra.mxu0 %v2988_v47  ;;  %v3169_v47 = vld [vmem:[%s5495_s7 + $0x758] sm:$0xff] }
 0x279   : > { %1699 = vmatpush.msra.mxu0 %v2983_v51  ;;  %v3164_v51 = vld [vmem:[%s5495_s7 + $0x730] sm:$0xff] }
 0x2c3   : > { %v1450_v55 = vpop.f32.mrf.mxu0 }
 0x2cb   : > { %v1475_v56 = vpop.f32.mrf.mxu0 }
 0x2cc   : > { %v4359_v57 = vmax.f32 %v1450_v55, %v1475_v56  ;;  %v3159_v55 = vld [vmem:[%s5495_s7 + $0x708] sm:$0xff]  ;;  %v3091_v56 = vld [vmem:[%s5495_s7 + $0x510] sm:$0xff] }
 0x2ce   : > { %v1601_v58 = vrot.slane %v4359_v57, 1  ;;  %v4518_v43 = vrot.slane %v4359_v57, 2 }
 0x2d0   : > { %3039 = vmatmul.msk.f32.vlgmr.msrb.gmra.mxu0 %vm1050_vm3, %v1601_v58  ;;  %3040 = vmatmul.msk.f32.vlgmr.msrb.gmra.mxu1 %vm1050_vm3, %v1601_v58 }
 0x2d1   : > { %3041 = vmatmul.msk.f32.vlgmr.msra.gmra.mxu2 %vm1050_vm3, %v1601_v58  ;;  %3042 = vmatmul.msk.f32.vlgmr.msrb.gmra.mxu3 %vm1050_vm3, %v1601_v58 }
 0x2d2   : > { %1770 = vmatpush.msrb.mxu0 %v1537_v59  ;;  %1790 = vmatpush.msrb.mxu1 %v1538_v60  ;;  %v3093_v59 = vld [vmem:[%s5495_s7 + $0x520] sm:$0xff] }
 0x2d3   : > { %1874 = vmatpush.msra.mxu2 %v3104_v61  ;;  %1894 = vmatpush.msrb.mxu3 %v3105_v62  ;;  %v3154_v60 = vld [vmem:[%s5495_s7 + $0x6e0] sm:$0xff]  ;;  %v3086_v61 = vld [vmem:[%s5495_s7 + $0x4e8] sm:$0xff]  ;;  %v3087_v62 = vld [vmem:[%s5495_s7 + $0x4f0] sm:$0xff] }
 0x2d4   : > { %1771 = vmatpush.msrb.mxu0 %v1532_v63  ;;  %1791 = vmatpush.msrb.mxu1 %v1533_v0  ;;  %v3088_v63 = vld [vmem:[%s5495_s7 + $0x4f8] sm:$0xff] }
 0x2d5   : > { %1875 = vmatpush.msra.mxu2 %v3099_v1  ;;  %1895 = vmatpush.msrb.mxu3 %v3100_v2  ;;  %v3149_v0 = vld [vmem:[%s5495_s7 + $0x6b8] sm:$0xff]  ;;  %v3081_v1 = vld [vmem:[%s5495_s7 + $0x4c0] sm:$0xff]  ;;  %v3082_v2 = vld [vmem:[%s5495_s7 + $0x4c8] sm:$0xff] }
 0x2d6   : > { %1772 = vmatpush.msrb.mxu0 %v1527_v3  ;;  %1792 = vmatpush.msrb.mxu1 %v1528_v4  ;;  %v3083_v3 = vld [vmem:[%s5495_s7 + $0x4d0] sm:$0xff] }
 0x2d7   : > { %1876 = vmatpush.msra.mxu2 %v3094_v5  ;;  %1896 = vmatpush.msrb.mxu3 %v3095_v6  ;;  %v3144_v4 = vld [vmem:[%s5495_s7 + $0x690] sm:$0xff]  ;;  %v3076_v5 = vld [vmem:[%s5495_s7 + $0x498] sm:$0xff]  ;;  %v3077_v6 = vld [vmem:[%s5495_s7 + $0x4a0] sm:$0xff] }
 0x2d8   : > { %1773 = vmatpush.msrb.mxu0 %v1522_v9  ;;  %1793 = vmatpush.msrb.mxu1 %v1523_v7  ;;  %v3078_v9 = vld [vmem:[%s5495_s7 + $0x4a8] sm:$0xff] }
 0x2d9   : > { %1877 = vmatpush.msra.mxu2 %v3089_v8  ;;  %1897 = vmatpush.msrb.mxu3 %v3090_v10  ;;  %v3139_v7 = vld [vmem:[%s5495_s7 + $0x668] sm:$0xff]  ;;  %v3071_v8 = vld [vmem:[%s5495_s7 + $0x470] sm:$0xff]  ;;  %v3072_v10 = vld [vmem:[%s5495_s7 + $0x478] sm:$0xff] }
 0x2da   : > { %3043 = vmatmul.msk.f32.vlgmr.msra.gmra.mxu0 %vm1050_vm3, %v1601_v58  ;;  %3044 = vmatmul.msk.f32.vlgmr.msra.gmra.mxu1 %vm1050_vm3, %v4359_v57  ;;  %v3092_v58 = vld [vmem:[%s5495_s7 + $0x518] sm:$0xff] }
 0x2db   : > { %3045 = vmatmul.msk.f32.vlgmr.msrb.gmra.mxu2 %vm1050_vm3, %v4359_v57  ;;  %3046 = vmatmul.msk.f32.vlgmr.msra.gmra.mxu3 %vm1050_vm3, %v4359_v57 }
 0x2dc   : > { %1774 = vmatpush.msrb.mxu0 %v1517_v11  ;;  %1794 = vmatpush.msrb.mxu1 %v1518_v12  ;;  %v3073_v11 = vld [vmem:[%s5495_s7 + $0x480] sm:$0xff] }
 0x2dd   : > { %1878 = vmatpush.msra.mxu2 %v3084_v13  ;;  %1898 = vmatpush.msrb.mxu3 %v3085_v14  ;;  %v3134_v12 = vld [vmem:[%s5495_s7 + $0x640] sm:$0xff]  ;;  %v3066_v13 = vld [vmem:[%s5495_s7 + $0x448] sm:$0xff]  ;;  %v3067_v14 = vld [vmem:[%s5495_s7 + $0x450] sm:$0xff] }
 0x2de   : > { %1775 = vmatpush.msrb.mxu0 %v1512_v16  ;;  %1795 = vmatpush.msrb.mxu1 %v1513_v17  ;;  %v3068_v16 = vld [vmem:[%s5495_s7 + $0x458] sm:$0xff] }
 0x2df   : > { %1879 = vmatpush.msra.mxu2 %v3079_v18  ;;  %1899 = vmatpush.msrb.mxu3 %v3080_v19  ;;  %v3129_v17 = vld [vmem:[%s5495_s7 + $0x618] sm:$0xff]  ;;  %v3061_v18 = vld [vmem:[%s5495_s7 + $0x420] sm:$0xff]  ;;  %v3062_v19 = vld [vmem:[%s5495_s7 + $0x428] sm:$0xff] }
 0x2e0   : > { %1776 = vmatpush.msrb.mxu0 %v1507_v15  ;;  %1796 = vmatpush.msrb.mxu1 %v1508_v20  ;;  %v3063_v15 = vld [vmem:[%s5495_s7 + $0x430] sm:$0xff] }
 0x2e1   : > { %1880 = vmatpush.msra.mxu2 %v3074_v21  ;;  %1900 = vmatpush.msrb.mxu3 %v3075_v22  ;;  %v3124_v20 = vld [vmem:[%s5495_s7 + $0x5f0] sm:$0xff]  ;;  %v3056_v21 = vld [vmem:[%s5495_s7 + $0x3f8] sm:$0xff]  ;;  %v3057_v22 = vld [vmem:[%s5495_s7 + $0x400] sm:$0xff] }
 0x2e2   : > { %1777 = vmatpush.msrb.mxu0 %v1502_v23  ;;  %1797 = vmatpush.msrb.mxu1 %v1503_v24  ;;  %v3058_v23 = vld [vmem:[%s5495_s7 + $0x408] sm:$0xff] }
 0x2e3   : > { %1881 = vmatpush.msra.mxu2 %v3069_v25  ;;  %1901 = vmatpush.msrb.mxu3 %v3070_v26  ;;  %v3119_v24 = vld [vmem:[%s5495_s7 + $0x5c8] sm:$0xff]  ;;  %v3051_v25 = vld [vmem:[%s5495_s7 + $0x3d0] sm:$0xff]  ;;  %v3052_v26 = vld [vmem:[%s5495_s7 + $0x3d8] sm:$0xff] }
 0x2e4   : > { %1778 = vmatpush.msrb.mxu0 %v1497_v27  ;;  %1798 = vmatpush.msrb.mxu1 %v1498_v28  ;;  %v3053_v27 = vld [vmem:[%s5495_s7 + $0x3e0] sm:$0xff] }
 0x2e5   : > { %1882 = vmatpush.msra.mxu2 %v3064_v29  ;;  %1902 = vmatpush.msrb.mxu3 %v3065_v30  ;;  %v3114_v28 = vld [vmem:[%s5495_s7 + $0x5a0] sm:$0xff]  ;;  %v4673_v29 = vrot.slane %v4359_v57, 3 }
 0x2e6   : > { %1779 = vmatpush.msrb.mxu0 %v1492_v31  ;;  %1799 = vmatpush.msrb.mxu1 %v1493_v32  ;;  %v3170_v30 = vld [vmem:[%s5495_s7 + $0x760] sm:$0xff]  ;;  %v3171_v31 = vld [vmem:[%s5495_s7 + $0x768] sm:$0xff]  ;;  %v3172_v32 = vld [vmem:[%s5495_s7 + $0x770] sm:$0xff] }
 0x2e7   : > { %1883 = vmatpush.msra.mxu2 %v3059_v33  ;;  %1903 = vmatpush.msrb.mxu3 %v3060_v34  ;;  %v3173_v33 = vld [vmem:[%s5495_s7 + $0x778] sm:$0xff] }
 0x2e8   : > { %1780 = vmatpush.msrb.mxu0 %v1487_v35  ;;  %1800 = vmatpush.msrb.mxu1 %v1488_v36  ;;  %v3165_v34 = vld [vmem:[%s5495_s7 + $0x738] sm:$0xff]  ;;  %v3166_v35 = vld [vmem:[%s5495_s7 + $0x740] sm:$0xff]  ;;  %v3167_v36 = vld [vmem:[%s5495_s7 + $0x748] sm:$0xff] }
 0x2e9   : > { %1884 = vmatpush.msra.mxu2 %v3054_v37  ;;  %1904 = vmatpush.msrb.mxu3 %v3055_v38  ;;  %v3168_v37 = vld [vmem:[%s5495_s7 + $0x750] sm:$0xff] }
 0x2ea   : > { %1781 = vmatpush.msrb.mxu0 %v1482_v39  ;;  %1801 = vmatpush.msrb.mxu1 %v1483_v40  ;;  %v3160_v38 = vld [vmem:[%s5495_s7 + $0x710] sm:$0xff]  ;;  %v3161_v39 = vld [vmem:[%s5495_s7 + $0x718] sm:$0xff]  ;;  %v3162_v40 = vld [vmem:[%s5495_s7 + $0x720] sm:$0xff] }
 0x2eb   : > { %1885 = vmatpush.msra.mxu2 %v3049_v41  ;;  %1905 = vmatpush.msrb.mxu3 %v3050_v42  ;;  %v3163_v41 = vld [vmem:[%s5495_s7 + $0x728] sm:$0xff] }
 0x2ec   : > { %3047 = vmatmul.msk.f32.vlgmr.msrb.gmra.mxu0 %vm1050_vm3, %v4359_v57  ;;  %3048 = vmatmul.msk.f32.vlgmr.msrb.gmra.mxu1 %vm1050_vm3, %v4359_v57  ;;  %v3155_v42 = vld [vmem:[%s5495_s7 + $0x6e8] sm:$0xff] }
 0x2ed   : > { %3109 = vmatmul.msk.f32.vlgmr.msra.gmra.mxu2 %vm1050_vm3, %v4518_v43  ;;  %3110 = vmatmul.msk.f32.vlgmr.msrb.gmra.mxu3 %vm1050_vm3, %v4518_v43 }
 0x2ee   : > { %1914 = vmatpush.msra.mxu0 %v3106_v44  ;;  %1934 = vmatpush.msra.mxu1 %v3107_v45  ;;  %v3157_v44 = vld [vmem:[%s5495_s7 + $0x6f8] sm:$0xff]  ;;  %v3158_v45 = vld [vmem:[%s5495_s7 + $0x700] sm:$0xff] }
 0x2ef   : > { %1954 = vmatpush.msrb.mxu2 %v3108_v46  ;;  %2043 = vmatpush.msra.mxu3 %v3169_v47  ;;  %v3150_v46 = vld [vmem:[%s5495_s7 + $0x6c0] sm:$0xff]  ;;  %v3151_v47 = vld [vmem:[%s5495_s7 + $0x6c8] sm:$0xff] }
 0x2f0   : > { %1915 = vmatpush.msra.mxu0 %v3101_v48  ;;  %1935 = vmatpush.msra.mxu1 %v3102_v49  ;;  %v3152_v48 = vld [vmem:[%s5495_s7 + $0x6d0] sm:$0xff]  ;;  %v3153_v49 = vld [vmem:[%s5495_s7 + $0x6d8] sm:$0xff] }
 0x2f1   : > { %1955 = vmatpush.msrb.mxu2 %v3103_v50  ;;  %2044 = vmatpush.msra.mxu3 %v3164_v51  ;;  %v3145_v50 = vld [vmem:[%s5495_s7 + $0x698] sm:$0xff]  ;;  %v3146_v51 = vld [vmem:[%s5495_s7 + $0x6a0] sm:$0xff] }
 0x2f2   : > { %1916 = vmatpush.msra.mxu0 %v3096_v52  ;;  %1936 = vmatpush.msra.mxu1 %v3097_v53  ;;  %v3147_v52 = vld [vmem:[%s5495_s7 + $0x6a8] sm:$0xff]  ;;  %v3148_v53 = vld [vmem:[%s5495_s7 + $0x6b0] sm:$0xff] }
 0x2f3   : > { %1956 = vmatpush.msrb.mxu2 %v3098_v54  ;;  %2045 = vmatpush.msra.mxu3 %v3159_v55  ;;  %v3140_v54 = vld [vmem:[%s5495_s7 + $0x670] sm:$0xff]  ;;  %v3141_v55 = vld [vmem:[%s5495_s7 + $0x678] sm:$0xff] }
 0x2f4   : > { %1917 = vmatpush.msra.mxu0 %v3091_v56  ;;  %1937 = vmatpush.msra.mxu1 %v3092_v58  ;;  %v3142_v56 = vld [vmem:[%s5495_s7 + $0x680] sm:$0xff]  ;;  %v3143_v58 = vld [vmem:[%s5495_s7 + $0x688] sm:$0xff] }
 0x2f5   : > { %1957 = vmatpush.msrb.mxu2 %v3093_v59  ;;  %2046 = vmatpush.msra.mxu3 %v3154_v60  ;;  %v3135_v59 = vld [vmem:[%s5495_s7 + $0x648] sm:$0xff]  ;;  %v3136_v60 = vld [vmem:[%s5495_s7 + $0x650] sm:$0xff] }
 0x2f6   : > { %1918 = vmatpush.msra.mxu0 %v3086_v61  ;;  %1938 = vmatpush.msra.mxu1 %v3087_v62  ;;  %v3137_v61 = vld [vmem:[%s5495_s7 + $0x658] sm:$0xff]  ;;  %v3138_v62 = vld [vmem:[%s5495_s7 + $0x660] sm:$0xff] }
 0x2f7   : > { %1958 = vmatpush.msrb.mxu2 %v3088_v63  ;;  %2047 = vmatpush.msra.mxu3 %v3149_v0  ;;  %v3130_v63 = vld [vmem:[%s5495_s7 + $0x620] sm:$0xff]  ;;  %v3131_v0 = vld [vmem:[%s5495_s7 + $0x628] sm:$0xff] }
 0x2f8   : > { %1919 = vmatpush.msra.mxu0 %v3081_v1  ;;  %1939 = vmatpush.msra.mxu1 %v3082_v2  ;;  %v3132_v1 = vld [vmem:[%s5495_s7 + $0x630] sm:$0xff]  ;;  %v3133_v2 = vld [vmem:[%s5495_s7 + $0x638] sm:$0xff] }
 0x2f9   : > { %1959 = vmatpush.msrb.mxu2 %v3083_v3  ;;  %2048 = vmatpush.msra.mxu3 %v3144_v4  ;;  %v3125_v3 = vld [vmem:[%s5495_s7 + $0x5f8] sm:$0xff]  ;;  %v3126_v4 = vld [vmem:[%s5495_s7 + $0x600] sm:$0xff] }
 0x2fa   : > { %1920 = vmatpush.msra.mxu0 %v3076_v5  ;;  %1940 = vmatpush.msra.mxu1 %v3077_v6  ;;  %v3127_v5 = vld [vmem:[%s5495_s7 + $0x608] sm:$0xff]  ;;  %v3128_v6 = vld [vmem:[%s5495_s7 + $0x610] sm:$0xff] }
 0x2fb   : > { %1960 = vmatpush.msrb.mxu2 %v3078_v9  ;;  %2049 = vmatpush.msra.mxu3 %v3139_v7  ;;  %v3120_v9 = vld [vmem:[%s5495_s7 + $0x5d0] sm:$0xff]  ;;  %v3121_v7 = vld [vmem:[%s5495_s7 + $0x5d8] sm:$0xff] }
 0x2fc   : > { %1921 = vmatpush.msra.mxu0 %v3071_v8  ;;  %1941 = vmatpush.msra.mxu1 %v3072_v10  ;;  %v3122_v8 = vld [vmem:[%s5495_s7 + $0x5e0] sm:$0xff]  ;;  %v3123_v10 = vld [vmem:[%s5495_s7 + $0x5e8] sm:$0xff] }
 0x2fd   : > { %1961 = vmatpush.msrb.mxu2 %v3073_v11  ;;  %2050 = vmatpush.msra.mxu3 %v3134_v12  ;;  %v3115_v11 = vld [vmem:[%s5495_s7 + $0x5a8] sm:$0xff]  ;;  %v3116_v12 = vld [vmem:[%s5495_s7 + $0x5b0] sm:$0xff] }
 0x2fe   : > { %1922 = vmatpush.msra.mxu0 %v3066_v13  ;;  %1942 = vmatpush.msra.mxu1 %v3067_v14  ;;  %v3117_v13 = vld [vmem:[%s5495_s7 + $0x5b8] sm:$0xff]  ;;  %v3118_v14 = vld [vmem:[%s5495_s7 + $0x5c0] sm:$0xff] }
 0x2ff   : > { %1962 = vmatpush.msrb.mxu2 %v3068_v16  ;;  %2051 = vmatpush.msra.mxu3 %v3129_v17  ;;  %v3234_v16 = vld [vmem:[%s5495_s7 + $0x938] sm:$0xff]  ;;  %v3235_v17 = vld [vmem:[%s5495_s7 + $0x940] sm:$0xff] }
 0x300   : > { %1923 = vmatpush.msra.mxu0 %v3061_v18  ;;  %1943 = vmatpush.msra.mxu1 %v3062_v19  ;;  %v3236_v18 = vld [vmem:[%s5495_s7 + $0x948] sm:$0xff]  ;;  %v3237_v19 = vld [vmem:[%s5495_s7 + $0x950] sm:$0xff] }
 0x301   : > { %1963 = vmatpush.msrb.mxu2 %v3063_v15  ;;  %2052 = vmatpush.msra.mxu3 %v3124_v20  ;;  %v3229_v15 = vld [vmem:[%s5495_s7 + $0x910] sm:$0xff]  ;;  %v3230_v20 = vld [vmem:[%s5495_s7 + $0x918] sm:$0xff] }
 0x302   : > { %1924 = vmatpush.msra.mxu0 %v3056_v21  ;;  %1944 = vmatpush.msra.mxu1 %v3057_v22  ;;  %v3231_v21 = vld [vmem:[%s5495_s7 + $0x920] sm:$0xff]  ;;  %v3232_v22 = vld [vmem:[%s5495_s7 + $0x928] sm:$0xff] }
 0x303   : > { %1964 = vmatpush.msrb.mxu2 %v3058_v23  ;;  %2053 = vmatpush.msra.mxu3 %v3119_v24  ;;  %v3224_v23 = vld [vmem:[%s5495_s7 + $0x8e8] sm:$0xff]  ;;  %v3225_v24 = vld [vmem:[%s5495_s7 + $0x8f0] sm:$0xff] }
 0x304   : > { %1925 = vmatpush.msra.mxu0 %v3051_v25  ;;  %1945 = vmatpush.msra.mxu1 %v3052_v26  ;;  %v3226_v25 = vld [vmem:[%s5495_s7 + $0x8f8] sm:$0xff]  ;;  %v3227_v26 = vld [vmem:[%s5495_s7 + $0x900] sm:$0xff] }
 0x305   : > { %1965 = vmatpush.msrb.mxu2 %v3053_v27  ;;  %2054 = vmatpush.msra.mxu3 %v3114_v28  ;;  %v3219_v27 = vld [vmem:[%s5495_s7 + $0x8c0] sm:$0xff]  ;;  %v3220_v28 = vld [vmem:[%s5495_s7 + $0x8c8] sm:$0xff] }
 0x306   : > { %3111 = vmatmul.msk.f32.vlgmr.msra.gmra.mxu0 %vm1050_vm3, %v4518_v43  ;;  %3112 = vmatmul.msk.f32.vlgmr.msra.gmra.mxu1 %vm1050_vm3, %v4518_v43 }
 0x307   : > { %3113 = vmatmul.msk.f32.vlgmr.msrb.gmra.mxu2 %vm1050_vm3, %v4518_v43  ;;  %3174 = vmatmul.msk.f32.vlgmr.msra.gmra.mxu3 %vm1050_vm3, %v4673_v29  ;;  %v3156_v43 = vld [vmem:[%s5495_s7 + $0x6f0] sm:$0xff] }
 0x308   : > { %2063 = vmatpush.msrb.mxu0 %v3170_v30  ;;  %2083 = vmatpush.msrb.mxu1 %v3171_v31  ;;  %v3222_v30 = vld [vmem:[%s5495_s7 + $0x8d8] sm:$0xff] }
 0x309   : > { %2103 = vmatpush.msra.mxu2 %v3172_v32  ;;  %2123 = vmatpush.msrb.mxu3 %v3173_v33  ;;  %v3214_v31 = vld [vmem:[%s5495_s7 + $0x898] sm:$0xff]  ;;  %v3215_v32 = vld [vmem:[%s5495_s7 + $0x8a0] sm:$0xff]  ;;  %v3216_v33 = vld [vmem:[%s5495_s7 + $0x8a8] sm:$0xff] }
 0x30a   : > { %2064 = vmatpush.msrb.mxu0 %v3165_v34  ;;  %2084 = vmatpush.msrb.mxu1 %v3166_v35  ;;  %v3217_v34 = vld [vmem:[%s5495_s7 + $0x8b0] sm:$0xff] }
 0x30b   : > { %2104 = vmatpush.msra.mxu2 %v3167_v36  ;;  %2124 = vmatpush.msrb.mxu3 %v3168_v37  ;;  %v3209_v35 = vld [vmem:[%s5495_s7 + $0x870] sm:$0xff]  ;;  %v3210_v36 = vld [vmem:[%s5495_s7 + $0x878] sm:$0xff]  ;;  %v3211_v37 = vld [vmem:[%s5495_s7 + $0x880] sm:$0xff] }
 0x30c   : > { %2065 = vmatpush.msrb.mxu0 %v3160_v38  ;;  %2085 = vmatpush.msrb.mxu1 %v3161_v39  ;;  %v3212_v38 = vld [vmem:[%s5495_s7 + $0x888] sm:$0xff] }
 0x30d   : > { %2105 = vmatpush.msra.mxu2 %v3162_v40  ;;  %2125 = vmatpush.msrb.mxu3 %v3163_v41  ;;  %v3204_v39 = vld [vmem:[%s5495_s7 + $0x848] sm:$0xff]  ;;  %v3205_v40 = vld [vmem:[%s5495_s7 + $0x850] sm:$0xff]  ;;  %v3206_v41 = vld [vmem:[%s5495_s7 + $0x858] sm:$0xff] }
 0x30e   : > { %2066 = vmatpush.msrb.mxu0 %v3155_v42  ;;  %2086 = vmatpush.msrb.mxu1 %v3156_v43  ;;  %v3207_v42 = vld [vmem:[%s5495_s7 + $0x860] sm:$0xff] }
 0x30f   : > { %2106 = vmatpush.msra.mxu2 %v3157_v44  ;;  %2126 = vmatpush.msrb.mxu3 %v3158_v45  ;;  %v3199_v43 = vld [vmem:[%s5495_s7 + $0x820] sm:$0xff]  ;;  %v3200_v44 = vld [vmem:[%s5495_s7 + $0x828] sm:$0xff]  ;;  %v3201_v45 = vld [vmem:[%s5495_s7 + $0x830] sm:$0xff] }
 0x310   : > { %2067 = vmatpush.msrb.mxu0 %v3150_v46  ;;  %2087 = vmatpush.msrb.mxu1 %v3151_v47  ;;  %v3202_v46 = vld [vmem:[%s5495_s7 + $0x838] sm:$0xff] }
 0x311   : > { %2107 = vmatpush.msra.mxu2 %v3152_v48  ;;  %2127 = vmatpush.msrb.mxu3 %v3153_v49  ;;  %v3194_v47 = vld [vmem:[%s5495_s7 + $0x7f8] sm:$0xff]  ;;  %v3195_v48 = vld [vmem:[%s5495_s7 + $0x800] sm:$0xff]  ;;  %v3196_v49 = vld [vmem:[%s5495_s7 + $0x808] sm:$0xff] }
 0x312   : > { %2068 = vmatpush.msrb.mxu0 %v3145_v50  ;;  %2088 = vmatpush.msrb.mxu1 %v3146_v51  ;;  %v3197_v50 = vld [vmem:[%s5495_s7 + $0x810] sm:$0xff] }
 0x313   : > { %2108 = vmatpush.msra.mxu2 %v3147_v52  ;;  %2128 = vmatpush.msrb.mxu3 %v3148_v53  ;;  %v3189_v51 = vld [vmem:[%s5495_s7 + $0x7d0] sm:$0xff]  ;;  %v3190_v52 = vld [vmem:[%s5495_s7 + $0x7d8] sm:$0xff]  ;;  %v3191_v53 = vld [vmem:[%s5495_s7 + $0x7e0] sm:$0xff] }
 0x314   : > { %2069 = vmatpush.msrb.mxu0 %v3140_v54  ;;  %2089 = vmatpush.msrb.mxu1 %v3141_v55  ;;  %v3192_v54 = vld [vmem:[%s5495_s7 + $0x7e8] sm:$0xff] }
 0x315   : > { %2109 = vmatpush.msra.mxu2 %v3142_v56  ;;  %2129 = vmatpush.msrb.mxu3 %v3143_v58  ;;  %v3184_v55 = vld [vmem:[%s5495_s7 + $0x7a8] sm:$0xff]  ;;  %v3185_v56 = vld [vmem:[%s5495_s7 + $0x7b0] sm:$0xff]  ;;  %v3186_v58 = vld [vmem:[%s5495_s7 + $0x7b8] sm:$0xff] }
 0x316   : > { %2070 = vmatpush.msrb.mxu0 %v3135_v59  ;;  %2090 = vmatpush.msrb.mxu1 %v3136_v60  ;;  %v3187_v59 = vld [vmem:[%s5495_s7 + $0x7c0] sm:$0xff] }
 0x317   : > { %2110 = vmatpush.msra.mxu2 %v3137_v61  ;;  %2130 = vmatpush.msrb.mxu3 %v3138_v62  ;;  %v3179_v60 = vld [vmem:[%s5495_s7 + $0x780] sm:$0xff]  ;;  %v3180_v61 = vld [vmem:[%s5495_s7 + $0x788] sm:$0xff]  ;;  %v3181_v62 = vld [vmem:[%s5495_s7 + $0x790] sm:$0xff] }
 0x318   : > { %2071 = vmatpush.msrb.mxu0 %v3130_v63  ;;  %2091 = vmatpush.msrb.mxu1 %v3131_v0  ;;  %v3182_v63 = vld [vmem:[%s5495_s7 + $0x798] sm:$0xff]  ;;  %v4980_v0 = vrot.slane %v4359_v57, 4 }
 0x319   : > { %2111 = vmatpush.msra.mxu2 %v3132_v1  ;;  %2131 = vmatpush.msrb.mxu3 %v3133_v2  ;;  %v3238_v1 = vld [vmem:[%s5495_s7 + $0x958] sm:$0xff] }
 0x31a   : > { %2072 = vmatpush.msrb.mxu0 %v3125_v3  ;;  %2092 = vmatpush.msrb.mxu1 %v3126_v4  ;;  %v3299_v2 = vld [vmem:[%s5495_s7 + $0xb18] sm:$0xff]  ;;  %v3300_v3 = vld [vmem:[%s5495_s7 + $0xb20] sm:$0xff]  ;;  %v3301_v4 = vld [vmem:[%s5495_s7 + $0xb28] sm:$0xff] }
 0x31b   : > { %2112 = vmatpush.msra.mxu2 %v3127_v5  ;;  %2132 = vmatpush.msrb.mxu3 %v3128_v6  ;;  %v3233_v5 = vld [vmem:[%s5495_s7 + $0x930] sm:$0xff] }
 0x31c   : > { %2073 = vmatpush.msrb.mxu0 %v3120_v9  ;;  %2093 = vmatpush.msrb.mxu1 %v3121_v7  ;;  %v3294_v6 = vld [vmem:[%s5495_s7 + $0xaf0] sm:$0xff]  ;;  %v3295_v9 = vld [vmem:[%s5495_s7 + $0xaf8] sm:$0xff]  ;;  %v3296_v7 = vld [vmem:[%s5495_s7 + $0xb00] sm:$0xff] }
 0x31d   : > { %2113 = vmatpush.msra.mxu2 %v3122_v8  ;;  %2133 = vmatpush.msrb.mxu3 %v3123_v10  ;;  %v3228_v8 = vld [vmem:[%s5495_s7 + $0x908] sm:$0xff] }
 0x31e   : > { %2074 = vmatpush.msrb.mxu0 %v3115_v11  ;;  %2094 = vmatpush.msrb.mxu1 %v3116_v12  ;;  %v3289_v10 = vld [vmem:[%s5495_s7 + $0xac8] sm:$0xff]  ;;  %v3290_v11 = vld [vmem:[%s5495_s7 + $0xad0] sm:$0xff]  ;;  %v3291_v12 = vld [vmem:[%s5495_s7 + $0xad8] sm:$0xff] }
 0x31f   : > { %2114 = vmatpush.msra.mxu2 %v3117_v13  ;;  %2134 = vmatpush.msrb.mxu3 %v3118_v14  ;;  %v3223_v13 = vld [vmem:[%s5495_s7 + $0x8e0] sm:$0xff] }
 0x320   : > { %3175 = vmatmul.msk.f32.vlgmr.msrb.gmra.mxu0 %vm1050_vm3, %v4673_v29  ;;  %3176 = vmatmul.msk.f32.vlgmr.msrb.gmra.mxu1 %vm1050_vm3, %v4673_v29  ;;  %v3284_v14 = vld [vmem:[%s5495_s7 + $0xaa0] sm:$0xff] }
 0x321   : > { %3177 = vmatmul.msk.f32.vlgmr.msra.gmra.mxu2 %vm1050_vm3, %v4673_v29  ;;  %3178 = vmatmul.msk.f32.vlgmr.msrb.gmra.mxu3 %vm1050_vm3, %v4673_v29  ;;  %v3221_v29 = vld [vmem:[%s5495_s7 + $0x8d0] sm:$0xff] }
 0x322   : > { %2212 = vmatpush.msra.mxu0 %v3234_v16  ;;  %2232 = vmatpush.msra.mxu1 %v3235_v17  ;;  %v3285_v16 = vld [vmem:[%s5495_s7 + $0xaa8] sm:$0xff]  ;;  %v3286_v17 = vld [vmem:[%s5495_s7 + $0xab0] sm:$0xff] }
 0x323   : > { %2252 = vmatpush.msrb.mxu2 %v3236_v18  ;;  %2272 = vmatpush.msra.mxu3 %v3237_v19  ;;  %v3218_v18 = vld [vmem:[%s5495_s7 + $0x8b8] sm:$0xff] }
 0x324   : > { %2213 = vmatpush.msra.mxu0 %v3229_v15  ;;  %2233 = vmatpush.msra.mxu1 %v3230_v20  ;;  %v3279_v19 = vld [vmem:[%s5495_s7 + $0xa78] sm:$0xff]  ;;  %v3280_v15 = vld [vmem:[%s5495_s7 + $0xa80] sm:$0xff]  ;;  %v3281_v20 = vld [vmem:[%s5495_s7 + $0xa88] sm:$0xff] }
 0x325   : > { %2253 = vmatpush.msrb.mxu2 %v3231_v21  ;;  %2273 = vmatpush.msra.mxu3 %v3232_v22  ;;  %v3213_v21 = vld [vmem:[%s5495_s7 + $0x890] sm:$0xff] }
 0x326   : > { %2214 = vmatpush.msra.mxu0 %v3224_v23  ;;  %2234 = vmatpush.msra.mxu1 %v3225_v24  ;;  %v3274_v22 = vld [vmem:[%s5495_s7 + $0xa50] sm:$0xff]  ;;  %v3275_v23 = vld [vmem:[%s5495_s7 + $0xa58] sm:$0xff]  ;;  %v3276_v24 = vld [vmem:[%s5495_s7 + $0xa60] sm:$0xff] }
 0x327   : > { %2254 = vmatpush.msrb.mxu2 %v3226_v25  ;;  %2274 = vmatpush.msra.mxu3 %v3227_v26  ;;  %v3208_v25 = vld [vmem:[%s5495_s7 + $0x868] sm:$0xff] }
 0x328   : > { %2215 = vmatpush.msra.mxu0 %v3219_v27  ;;  %2235 = vmatpush.msra.mxu1 %v3220_v28  ;;  %v3269_v26 = vld [vmem:[%s5495_s7 + $0xa28] sm:$0xff]  ;;  %v3270_v27 = vld [vmem:[%s5495_s7 + $0xa30] sm:$0xff]  ;;  %v3271_v28 = vld [vmem:[%s5495_s7 + $0xa38] sm:$0xff] }
 0x329   : > { %2255 = vmatpush.msrb.mxu2 %v3221_v29  ;;  %2275 = vmatpush.msra.mxu3 %v3222_v30  ;;  %v3203_v29 = vld [vmem:[%s5495_s7 + $0x840] sm:$0xff] }
 0x32a   : > { %2216 = vmatpush.msra.mxu0 %v3214_v31  ;;  %2236 = vmatpush.msra.mxu1 %v3215_v32  ;;  %v3264_v30 = vld [vmem:[%s5495_s7 + $0xa00] sm:$0xff]  ;;  %v3265_v31 = vld [vmem:[%s5495_s7 + $0xa08] sm:$0xff]  ;;  %v3266_v32 = vld [vmem:[%s5495_s7 + $0xa10] sm:$0xff] }
 0x32b   : > { %2256 = vmatpush.msrb.mxu2 %v3216_v33  ;;  %2276 = vmatpush.msra.mxu3 %v3217_v34  ;;  %v3198_v33 = vld [vmem:[%s5495_s7 + $0x818] sm:$0xff] }
 0x32c   : > { %2217 = vmatpush.msra.mxu0 %v3209_v35  ;;  %2237 = vmatpush.msra.mxu1 %v3210_v36  ;;  %v3259_v34 = vld [vmem:[%s5495_s7 + $0x9d8] sm:$0xff]  ;;  %v3260_v35 = vld [vmem:[%s5495_s7 + $0x9e0] sm:$0xff]  ;;  %v3261_v36 = vld [vmem:[%s5495_s7 + $0x9e8] sm:$0xff] }
 0x32d   : > { %2257 = vmatpush.msrb.mxu2 %v3211_v37  ;;  %2277 = vmatpush.msra.mxu3 %v3212_v38  ;;  %v3193_v37 = vld [vmem:[%s5495_s7 + $0x7f0] sm:$0xff] }
 0x32e   : > { %2218 = vmatpush.msra.mxu0 %v3204_v39  ;;  %2238 = vmatpush.msra.mxu1 %v3205_v40  ;;  %v3254_v38 = vld [vmem:[%s5495_s7 + $0x9b0] sm:$0xff]  ;;  %v3255_v39 = vld [vmem:[%s5495_s7 + $0x9b8] sm:$0xff]  ;;  %v3256_v40 = vld [vmem:[%s5495_s7 + $0x9c0] sm:$0xff] }
 0x32f   : > { %2258 = vmatpush.msrb.mxu2 %v3206_v41  ;;  %2278 = vmatpush.msra.mxu3 %v3207_v42  ;;  %v3188_v41 = vld [vmem:[%s5495_s7 + $0x7c8] sm:$0xff] }
 0x330   : > { %2219 = vmatpush.msra.mxu0 %v3199_v43  ;;  %2239 = vmatpush.msra.mxu1 %v3200_v44  ;;  %v3249_v42 = vld [vmem:[%s5495_s7 + $0x988] sm:$0xff]  ;;  %v3250_v43 = vld [vmem:[%s5495_s7 + $0x990] sm:$0xff]  ;;  %v3251_v44 = vld [vmem:[%s5495_s7 + $0x998] sm:$0xff] }
 0x331   : > { %2259 = vmatpush.msrb.mxu2 %v3201_v45  ;;  %2279 = vmatpush.msra.mxu3 %v3202_v46  ;;  %v3183_v45 = vld [vmem:[%s5495_s7 + $0x7a0] sm:$0xff] }
 0x332   : > { %2220 = vmatpush.msra.mxu0 %v3194_v47  ;;  %2240 = vmatpush.msra.mxu1 %v3195_v48  ;;  %v3244_v46 = vld [vmem:[%s5495_s7 + $0x960] sm:$0xff]  ;;  %v3245_v47 = vld [vmem:[%s5495_s7 + $0x968] sm:$0xff]  ;;  %v3246_v48 = vld [vmem:[%s5495_s7 + $0x970] sm:$0xff] }
 0x333   : > { %2260 = vmatpush.msrb.mxu2 %v3196_v49  ;;  %2280 = vmatpush.msra.mxu3 %v3197_v50  ;;  %v2374_v49 = vrot.slane %v4359_v57, 5  ;;  %v3302_v50 = vld [vmem:[%s5495_s7 + $0xb30] sm:$0xff]  ;;  %v3297_v57 = vld [vmem:[%s5495_s7 + $0xb08] sm:$0xff] }
 0x334   : > { %2221 = vmatpush.msra.mxu0 %v3189_v51  ;;  %2241 = vmatpush.msra.mxu1 %v3190_v52  ;;  %v3303_v51 = vld [vmem:[%s5495_s7 + $0xb38] sm:$0xff]  ;;  %v3298_v52 = vld [vmem:[%s5495_s7 + $0xb10] sm:$0xff] }
 0x335   : > { %2261 = vmatpush.msrb.mxu2 %v3191_v53  ;;  %2281 = vmatpush.msra.mxu3 %v3192_v54  ;;  %v3292_v53 = vld [vmem:[%s5495_s7 + $0xae0] sm:$0xff]  ;;  %v3293_v54 = vld [vmem:[%s5495_s7 + $0xae8] sm:$0xff] }
 0x336   : > { %2222 = vmatpush.msra.mxu0 %v3184_v55  ;;  %2242 = vmatpush.msra.mxu1 %v3185_v56  ;;  %v3287_v55 = vld [vmem:[%s5495_s7 + $0xab8] sm:$0xff]  ;;  %v3288_v56 = vld [vmem:[%s5495_s7 + $0xac0] sm:$0xff] }
 0x337   : > { %2262 = vmatpush.msrb.mxu2 %v3186_v58  ;;  %2282 = vmatpush.msra.mxu3 %v3187_v59  ;;  %v3282_v58 = vld [vmem:[%s5495_s7 + $0xa90] sm:$0xff]  ;;  %v3283_v59 = vld [vmem:[%s5495_s7 + $0xa98] sm:$0xff] }
 0x338   : > { %2223 = vmatpush.msra.mxu0 %v3179_v60  ;;  %2243 = vmatpush.msra.mxu1 %v3180_v61  ;;  %v3277_v60 = vld [vmem:[%s5495_s7 + $0xa68] sm:$0xff]  ;;  %v3278_v61 = vld [vmem:[%s5495_s7 + $0xa70] sm:$0xff] }
 0x339   : > { %2263 = vmatpush.msrb.mxu2 %v3181_v62  ;;  %2283 = vmatpush.msra.mxu3 %v3182_v63  ;;  %v3272_v62 = vld [vmem:[%s5495_s7 + $0xa40] sm:$0xff]  ;;  %v3273_v63 = vld [vmem:[%s5495_s7 + $0xa48] sm:$0xff] }
 0x33a   : > { %3239 = vmatmul.msk.f32.vlgmr.msra.gmra.mxu0 %vm1050_vm3, %v4980_v0  ;;  %3240 = vmatmul.msk.f32.vlgmr.msra.gmra.mxu1 %vm1050_vm3, %v4980_v0 }
 0x33b   : > { %3241 = vmatmul.msk.f32.vlgmr.msrb.gmra.mxu2 %vm1050_vm3, %v4980_v0  ;;  %3242 = vmatmul.msk.f32.vlgmr.msra.gmra.mxu3 %vm1050_vm3, %v4980_v0 }
 0x33c   : > { %2292 = vmatpush.msrb.mxu0 %v3238_v1  ;;  %2381 = vmatpush.msrb.mxu1 %v3299_v2  ;;  %v3268_v1 = vld [vmem:[%s5495_s7 + $0xa20] sm:$0xff]  ;;  %v3262_v2 = vld [vmem:[%s5495_s7 + $0x9f0] sm:$0xff] }
 0x33d   : > { %2401 = vmatpush.msra.mxu2 %v3300_v3  ;;  %2421 = vmatpush.msrb.mxu3 %v3301_v4  ;;  %v3263_v3 = vld [vmem:[%s5495_s7 + $0x9f8] sm:$0xff]  ;;  %v3257_v4 = vld [vmem:[%s5495_s7 + $0x9c8] sm:$0xff] }
 0x33e   : > { %2293 = vmatpush.msrb.mxu0 %v3233_v5  ;;  %2382 = vmatpush.msrb.mxu1 %v3294_v6  ;;  %v3258_v5 = vld [vmem:[%s5495_s7 + $0x9d0] sm:$0xff]  ;;  %v3252_v6 = vld [vmem:[%s5495_s7 + $0x9a0] sm:$0xff] }
 0x33f   : > { %2402 = vmatpush.msra.mxu2 %v3295_v9  ;;  %2422 = vmatpush.msrb.mxu3 %v3296_v7  ;;  %v3253_v9 = vld [vmem:[%s5495_s7 + $0x9a8] sm:$0xff]  ;;  %v3247_v7 = vld [vmem:[%s5495_s7 + $0x978] sm:$0xff] }
 0x340   : > { %2294 = vmatpush.msrb.mxu0 %v3228_v8  ;;  %2383 = vmatpush.msrb.mxu1 %v3289_v10  ;;  %v3248_v8 = vld [vmem:[%s5495_s7 + $0x980] sm:$0xff]  ;;  %v2519_v10 = vld [vmem:[%s5497_s9 + $0x78] sm:$0xff] }
 0x341   : > { %2403 = vmatpush.msra.mxu2 %v3290_v11  ;;  %2423 = vmatpush.msrb.mxu3 %v3291_v12  ;;  %v2518_v11 = vld [vmem:[%s5497_s9 + $0x70] sm:$0xff]  ;;  %v2517_v12 = vld [vmem:[%s5497_s9 + $0x68] sm:$0xff] }
 0x342   : > { %2295 = vmatpush.msrb.mxu0 %v3223_v13  ;;  %2384 = vmatpush.msrb.mxu1 %v3284_v14  ;;  %v2535_v13 = vld [vmem:[%s5497_s9 + $0xf8] sm:$0xff] }
 0x343   : > { %2404 = vmatpush.msra.mxu2 %v3285_v16  ;;  %2424 = vmatpush.msrb.mxu3 %v3286_v17  ;;  %v2551_v14 = vld [vmem:[%s5497_s9 + $0x178] sm:$0xff]  ;;  %v2516_v16 = vld [vmem:[%s5497_s9 + $0x60] sm:$0xff] }
 0x344   : > { %2296 = vmatpush.msrb.mxu0 %v3218_v18  ;;  %2385 = vmatpush.msrb.mxu1 %v3279_v19  ;;  %v2515_v18 = vld [vmem:[%s5497_s9 + $0x58] sm:$0xff]  ;;  %v2534_v19 = vld [vmem:[%s5497_s9 + $0xf0] sm:$0xff] }
 0x345   : > { %2405 = vmatpush.msra.mxu2 %v3280_v15  ;;  %2425 = vmatpush.msrb.mxu3 %v3281_v20  ;;  %v2550_v15 = vld [vmem:[%s5497_s9 + $0x170] sm:$0xff] }
 0x346   : > { %2297 = vmatpush.msrb.mxu0 %v3213_v21  ;;  %2386 = vmatpush.msrb.mxu1 %v3274_v22  ;;  %v2514_v20 = vld [vmem:[%s5497_s9 + $0x50] sm:$0xff]  ;;  %v2533_v21 = vld [vmem:[%s5497_s9 + $0xe8] sm:$0xff] }
 0x347   : > { %2406 = vmatpush.msra.mxu2 %v3275_v23  ;;  %2426 = vmatpush.msrb.mxu3 %v3276_v24  ;;  %v2549_v22 = vld [vmem:[%s5497_s9 + $0x168] sm:$0xff]  ;;  %v2532_v24 = vld [vmem:[%s5497_s9 + $0xe0] sm:$0xff] }
 0x348   : > { %2298 = vmatpush.msrb.mxu0 %v3208_v25  ;;  %2387 = vmatpush.msrb.mxu1 %v3269_v26  ;;  %v2513_v23 = vld [vmem:[%s5497_s9 + $0x48] sm:$0xff]  ;;  %v2548_v25 = vld [vmem:[%s5497_s9 + $0x160] sm:$0xff] }
 0x349   : > { %2407 = vmatpush.msra.mxu2 %v3270_v27  ;;  %2427 = vmatpush.msrb.mxu3 %v3271_v28  ;;  %v2512_v27 = vld [vmem:[%s5497_s9 + $0x40] sm:$0xff]  ;;  %v2531_v28 = vld [vmem:[%s5497_s9 + $0xd8] sm:$0xff] }
 0x34a   : > { %2299 = vmatpush.msrb.mxu0 %v3203_v29  ;;  %2388 = vmatpush.msrb.mxu1 %v3264_v30  ;;  %v2547_v29 = vld [vmem:[%s5497_s9 + $0x158] sm:$0xff] }
 0x34b   : > { %2408 = vmatpush.msra.mxu2 %v3265_v31  ;;  %2428 = vmatpush.msrb.mxu3 %v3266_v32  ;;  %v2511_v30 = vld [vmem:[%s5497_s9 + $0x38] sm:$0xff]  ;;  %v2530_v31 = vld [vmem:[%s5497_s9 + $0xd0] sm:$0xff] }
 0x34c   : > { %2300 = vmatpush.msrb.mxu0 %v3198_v33  ;;  %2389 = vmatpush.msrb.mxu1 %v3259_v34  ;;  %v2546_v34 = vld [vmem:[%s5497_s9 + $0x150] sm:$0xff] }
 0x34d   : > { %2409 = vmatpush.msra.mxu2 %v3260_v35  ;;  %2429 = vmatpush.msrb.mxu3 %v3261_v36  ;;  %v5232_v17 = vpop.f32.mrf.mxu1  ;;  %v5261_v26 = vpop.f32.mrf.mxu0  ;;  %v2510_v35 = vld [vmem:[%s5497_s9 + $0x30] sm:$0xff]  ;;  %v2529_v36 = vld [vmem:[%s5497_s9 + $0xc8] sm:$0xff] }
 0x34e   : > { %2301 = vmatpush.msrb.mxu0 %v3193_v37  ;;  %2390 = vmatpush.msrb.mxu1 %v3254_v38  ;;  %v2567_v37 = vld [vmem:[%s5497_s9 + $0x1f8] sm:$0xff]  ;;  %v2545_v38 = vld [vmem:[%s5497_s9 + $0x148] sm:$0xff] }
 0x34f   : > { %2410 = vmatpush.msra.mxu2 %v3255_v39  ;;  %2430 = vmatpush.msrb.mxu3 %v3256_v40  ;;  %v2509_v40 = vld [vmem:[%s5497_s9 + $0x28] sm:$0xff] }
 0x350   : > { %2302 = vmatpush.msrb.mxu0 %v3188_v41  ;;  %2391 = vmatpush.msrb.mxu1 %v3249_v42  ;;  %v2528_v41 = vld [vmem:[%s5497_s9 + $0xc0] sm:$0xff] }
 0x351   : > { %2411 = vmatpush.msra.mxu2 %v3250_v43  ;;  %2431 = vmatpush.msrb.mxu3 %v3251_v44  ;;  %v2544_v42 = vld [vmem:[%s5497_s9 + $0x140] sm:$0xff]  ;;  %v2527_v44 = vld [vmem:[%s5497_s9 + $0xb8] sm:$0xff] }
 0x352   : > { %2303 = vmatpush.msrb.mxu0 %v3183_v45  ;;  %2392 = vmatpush.msrb.mxu1 %v3244_v46  ;;  %v2508_v43 = vld [vmem:[%s5497_s9 + $0x20] sm:$0xff]  ;;  %v2543_v45 = vld [vmem:[%s5497_s9 + $0x138] sm:$0xff] }
 0x353   : > { %2412 = vmatpush.msra.mxu2 %v3245_v47  ;;  %2432 = vmatpush.msrb.mxu3 %v3246_v48 }
 0x354   : > { %3243 = vmatmul.msk.f32.vlgmr.msrb.gmra.mxu0 %vm1050_vm3, %v4980_v0  ;;  %3304 = vmatmul.msk.f32.vlgmr.msrb.gmra.mxu1 %vm1050_vm3, %v2374_v49  ;;  %v3267_v0 = vld [vmem:[%s5495_s7 + $0xa18] sm:$0xff]  ;;  %v5278_v32 = vpop.f32.mrf.mxu2  ;;  %v5280_v33 = vpop.f32.mrf.mxu3 }
 0x355   : > { %3305 = vmatmul.msk.f32.vlgmr.msra.gmra.mxu2 %vm1050_vm3, %v2374_v49  ;;  %3306 = vmatmul.msk.f32.vlgmr.msrb.gmra.mxu3 %vm1050_vm3, %v2374_v49 }
 0x356   : > { %2441 = vmatpush.msra.mxu0 %v3302_v50  ;;  %2461 = vmatpush.msra.mxu1 %v3303_v51  ;;  %v2507_v50 = vld [vmem:[%s5497_s9 + $0x18] sm:$0xff]  ;;  %v2526_v51 = vld [vmem:[%s5497_s9 + $0xb0] sm:$0xff] }
 0x357   : > { %2581 = vmatpush.msrb.mxu2 %v2519_v10  ;;  %2601 = vmatpush.msra.mxu3 %v2535_v13  ;;  %v5297_v39 = vpop.f32.mrf.mxu1  ;;  %v5317_v46 = vpop.f32.mrf.mxu0  ;;  %v2537_v10 = vld [vmem:[%s5497_s9 + $0x108] sm:$0xff]  ;;  %v2520_v13 = vld [vmem:[%s5497_s9 + $0x80] sm:$0xff] }
 0x358   : > { %2442 = vmatpush.msra.mxu0 %v3297_v57  ;;  %2462 = vmatpush.msra.mxu1 %v3298_v52  ;;  %v2542_v57 = vld [vmem:[%s5497_s9 + $0x130] sm:$0xff] }
 0x359   : > { %2582 = vmatpush.msrb.mxu2 %v2518_v11  ;;  %2602 = vmatpush.msra.mxu3 %v2534_v19  ;;  %v2566_v52 = vld [vmem:[%s5497_s9 + $0x1f0] sm:$0xff]  ;;  %v2575_v19 = vld [vmem:[%s5497_s9 + $0x238] sm:$0xff] }
 0x35a   : > { %2443 = vmatpush.msra.mxu0 %v3292_v53  ;;  %2463 = vmatpush.msra.mxu1 %v3293_v54  ;;  %v2506_v53 = vld [vmem:[%s5497_s9 + $0x10] sm:$0xff]  ;;  %v2525_v54 = vld [vmem:[%s5497_s9 + $0xa8] sm:$0xff] }
 0x35b   : > { %2583 = vmatpush.msrb.mxu2 %v2517_v12  ;;  %2603 = vmatpush.msra.mxu3 %v2533_v21  ;;  %v2561_v12 = vld [vmem:[%s5497_s9 + $0x1c8] sm:$0xff]  ;;  %v2574_v21 = vld [vmem:[%s5497_s9 + $0x230] sm:$0xff] }
 0x35c   : > { %2444 = vmatpush.msra.mxu0 %v3287_v55  ;;  %2464 = vmatpush.msra.mxu1 %v3288_v56  ;;  %v2541_v55 = vld [vmem:[%s5497_s9 + $0x128] sm:$0xff] }
 0x35d   : > { %2584 = vmatpush.msrb.mxu2 %v2516_v16  ;;  %2604 = vmatpush.msra.mxu3 %v2532_v24  ;;  %v2560_v16 = vld [vmem:[%s5497_s9 + $0x1c0] sm:$0xff]  ;;  %v2573_v24 = vld [vmem:[%s5497_s9 + $0x228] sm:$0xff] }
 0x35e   : > { %2445 = vmatpush.msra.mxu0 %v3282_v58  ;;  %2465 = vmatpush.msra.mxu1 %v3283_v59  ;;  %v5319_v47 = vpop.f32.mrf.mxu2  ;;  %v5321_v48 = vpop.f32.mrf.mxu3  ;;  %v2565_v58 = vld [vmem:[%s5497_s9 + $0x1e8] sm:$0xff] }
 0x35f   : > { %2585 = vmatpush.msrb.mxu2 %v2515_v18  ;;  %2605 = vmatpush.msra.mxu3 %v2531_v28  ;;  %v2505_v59 = vld [vmem:[%s5497_s9 + $0x8] sm:$0xff]  ;;  %v2559_v18 = vld [vmem:[%s5497_s9 + $0x1b8] sm:$0xff] }
 0x360   : > { %2446 = vmatpush.msra.mxu0 %v3277_v60  ;;  %2466 = vmatpush.msra.mxu1 %v3278_v61  ;;  %v2524_v60 = vld [vmem:[%s5497_s9 + $0xa0] sm:$0xff] }
 0x361   : > { %2586 = vmatpush.msrb.mxu2 %v2514_v20  ;;  %2606 = vmatpush.msra.mxu3 %v2530_v31  ;;  %v2540_v61 = vld [vmem:[%s5497_s9 + $0x120] sm:$0xff] }
 0x362   : > { %2447 = vmatpush.msra.mxu0 %v3272_v62  ;;  %2467 = vmatpush.msra.mxu1 %v3273_v63  ;;  %v2564_v62 = vld [vmem:[%s5497_s9 + $0x1e0] sm:$0xff] }
 0x363   : > { %2587 = vmatpush.msrb.mxu2 %v2513_v23  ;;  %2607 = vmatpush.msra.mxu3 %v2529_v36  ;;  %v2558_v23 = vld [vmem:[%s5497_s9 + $0x1b0] sm:$0xff]  ;;  %v2571_v36 = vld [vmem:[%s5497_s9 + $0x218] sm:$0xff] }
 0x364   : > { %2448 = vmatpush.msra.mxu0 %v3267_v0  ;;  %2468 = vmatpush.msra.mxu1 %v3268_v1  ;;  %v2504_v1 = vld [vmem:[%s5497_s9] sm:$0xff] }
 0x365   : > { %2588 = vmatpush.msrb.mxu2 %v2512_v27  ;;  %2608 = vmatpush.msra.mxu3 %v2528_v41  ;;  %v2572_v27 = vld [vmem:[%s5497_s9 + $0x220] sm:$0xff] }
 0x366   : > { %2449 = vmatpush.msra.mxu0 %v3262_v2  ;;  %2469 = vmatpush.msra.mxu1 %v3263_v3  ;;  %v2523_v2 = vld [vmem:[%s5497_s9 + $0x98] sm:$0xff] }
 0x367   : > { %2589 = vmatpush.msrb.mxu2 %v2511_v30  ;;  %2609 = vmatpush.msra.mxu3 %v2527_v44  ;;  %v2539_v3 = vld [vmem:[%s5497_s9 + $0x118] sm:$0xff] }
 0x368   : > { %2450 = vmatpush.msra.mxu0 %v3257_v4  ;;  %2470 = vmatpush.msra.mxu1 %v3258_v5  ;;  %v2563_v5 = vld [vmem:[%s5497_s9 + $0x1d8] sm:$0xff] }
 0x369   : > { %2590 = vmatpush.msrb.mxu2 %v2510_v35  ;;  %2610 = vmatpush.msra.mxu3 %v2526_v51  ;;  %v5346_v56 = vpop.f32.mrf.mxu0  ;;  %v2555_v35 = vld [vmem:[%s5497_s9 + $0x198] sm:$0xff] }
 0x36a   : > { %2451 = vmatpush.msra.mxu0 %v3252_v6  ;;  %2471 = vmatpush.msra.mxu1 %v3253_v9  ;;  %v2522_v6 = vld [vmem:[%s5497_s9 + $0x90] sm:$0xff] }
 0x36b   : > { %2591 = vmatpush.msrb.mxu2 %v2509_v40  ;;  %2611 = vmatpush.msra.mxu3 %v2525_v54  ;;  %v2538_v9 = vld [vmem:[%s5497_s9 + $0x110] sm:$0xff]  ;;  %v1744_v54 = vadd.f32 %v5319_v47, %v5232_v17 }
 0x36c   : > { %2452 = vmatpush.msra.mxu0 %v3247_v7  ;;  %2472 = vmatpush.msra.mxu1 %v3248_v8  ;;  %v2562_v7 = vld [vmem:[%s5497_s9 + $0x1d0] sm:$0xff]  ;;  %v2521_v8 = vld [vmem:[%s5497_s9 + $0x88] sm:$0xff] }
 0x36d   : > { %3307 = vmatmul.msk.f32.vlgmr.msra.gmra.mxu0 %vm1050_vm3, %v2374_v49  ;;  %3308 = vmatmul.msk.f32.vlgmr.msra.gmra.mxu1 %vm1050_vm3, %v2374_v49  ;;  %v5323_v49 = vpop.f32.mrf.mxu1  ;;  %v2570_v40 = vld [vmem:[%s5497_s9 + $0x210] sm:$0xff] }
 0x36e   : > { %2621 = vmatpush.msrb.mxu0 %v2551_v14  ;;  %2641 = vmatpush.msrb.mxu1 %v2567_v37  ;;  %v2536_v14 = vld [vmem:[%s5497_s9 + $0x100] sm:$0xff]  ;;  %v1724_v37 = vadd.f32 %v5297_v39, %v5261_v26  ;;  %v2553_v26 = vld [vmem:[%s5497_s9 + $0x188] sm:$0xff] }
 0x36f   : > { %2592 = vmatpush.msrb.mxu2 %v2508_v43  ;;  %2612 = vmatpush.msra.mxu3 %v2524_v60  ;;  %v2482_v43 = vld [vmem:[%s5496_s8] sm:$0x1f]  ;;  %v2569_v39 = vld [vmem:[%s5497_s9 + $0x208] sm:$0xff] }
 0x370   : > { %2622 = vmatpush.msrb.mxu0 %v2550_v15  ;;  %2642 = vmatpush.msrb.mxu1 %v2566_v52  ;;  %v1887_v63 = vpop.f32.mrf.mxu2  ;;  %v5363_v0 = vpop.f32.mrf.mxu3 }
 0x371   : > { %2593 = vmatpush.msrb.mxu2 %v2507_v50  ;;  %2613 = vmatpush.msra.mxu3 %v2523_v2  ;;  %v1970_v41 = vadd.f32 %v1887_v63, %v1724_v37  ;;  %v2568_v50 = vld [vmem:[%s5497_s9 + $0x200] sm:$0xff]  ;;  %v1971_v60 = vadd.f32 %v5363_v0, %v1744_v54 }
 0x372   : > { %2623 = vmatpush.msrb.mxu0 %v2549_v22  ;;  %2643 = vmatpush.msrb.mxu1 %v2565_v58 }
 0x373   : > { %2594 = vmatpush.msrb.mxu2 %v2506_v53  ;;  %2614 = vmatpush.msra.mxu3 %v2522_v6  ;;  %v2484_v53 = vperm.slane %v2482_v43, 0  ;;  %v2485_v6 = vperm.slane %v2482_v43, 1 }
 0x374   : > { %2624 = vmatpush.msrb.mxu0 %v2548_v25  ;;  %2644 = vmatpush.msrb.mxu1 %v2564_v62  ;;  %v2557_v25 = vld [vmem:[%s5497_s9 + $0x1a8] sm:$0xff] }
 0x375   : > { %2595 = vmatpush.msrb.mxu2 %v2505_v59  ;;  %2615 = vmatpush.msra.mxu3 %v2521_v8 }
 0x376   : > { %2625 = vmatpush.msrb.mxu0 %v2547_v29  ;;  %2645 = vmatpush.msrb.mxu1 %v2563_v5  ;;  %v2556_v29 = vld [vmem:[%s5497_s9 + $0x1a0] sm:$0xff] }
 0x377   : > { %2596 = vmatpush.msrb.mxu2 %v2504_v1  ;;  %2616 = vmatpush.msra.mxu3 %v2520_v13  ;;  %v1804_v13 = vadd.f32 %v5323_v49, %v5317_v46  ;;  %v2576_v46 = vld [vmem:[%s5498_s10] sm:$0x1] }
 0x378   : > { %2626 = vmatpush.msrb.mxu0 %v2546_v34  ;;  %2646 = vmatpush.msrb.mxu1 %v2562_v7 }
 0x379   : > { %2669 = vmatpush.msra.mxu2 %v2575_v19 }
 0x37a   : > { %2627 = vmatpush.msrb.mxu0 %v2545_v38  ;;  %2647 = vmatpush.msrb.mxu1 %v2561_v12  ;;  %v2554_v38 = vld [vmem:[%s5497_s9 + $0x190] sm:$0xff] }
 0x37b   : > { %2670 = vmatpush.msra.mxu2 %v2574_v21 }
 0x37c   : > { %2628 = vmatpush.msrb.mxu0 %v2544_v42  ;;  %2648 = vmatpush.msrb.mxu1 %v2560_v16 }
 0x37d   : > { %2671 = vmatpush.msra.mxu2 %v2573_v24 }
 0x37e   : > { %2629 = vmatpush.msrb.mxu0 %v2543_v45  ;;  %2649 = vmatpush.msrb.mxu1 %v2559_v18  ;;  %v2552_v45 = vld [vmem:[%s5497_s9 + $0x180] sm:$0xff] }
 0x37f   : > { %2672 = vmatpush.msra.mxu2 %v2572_v27 }
 0x380   : > { %2630 = vmatpush.msrb.mxu0 %v2542_v57  ;;  %2650 = vmatpush.msrb.mxu1 %v2558_v23  ;;  %v2488_v23 = vperm.slane %v2482_v43, 4 }
 0x381   : > { %2673 = vmatpush.msra.mxu2 %v2571_v36 }
 0x382   : > { %2631 = vmatpush.msrb.mxu0 %v2541_v55  ;;  %2651 = vmatpush.msrb.mxu1 %v2557_v25  ;;  %v1764_v55 = vadd.f32 %v5321_v48, %v5278_v32 }
 0x383   : > { %v5374_v4 = vpop.f32.mrf.mxu1  ;;  %v5394_v11 = vpop.f32.mrf.mxu0  ;;  %2674 = vmatpush.msra.mxu2 %v2570_v40 }
 0x384   : > { %2632 = vmatpush.msrb.mxu0 %v2540_v61  ;;  %2652 = vmatpush.msrb.mxu1 %v2556_v29  ;;  %v1972_v61 = vadd.f32 %v5394_v11, %v1764_v55  ;;  %v1784_v11 = vadd.f32 %v5346_v56, %v5280_v33 }
 0x385   : > { %2675 = vmatpush.msra.mxu2 %v2569_v39  ;;  %v2688_v39 = vld [vmem:[#allocation2] sm:$0x1] }
 0x386   : > { %2633 = vmatpush.msrb.mxu0 %v2539_v3  ;;  %2653 = vmatpush.msrb.mxu1 %v2555_v35 }
 0x387   : > { %2676 = vmatpush.msra.mxu2 %v2568_v50 }
 0x388   : > { %2634 = vmatpush.msrb.mxu0 %v2538_v9  ;;  %2654 = vmatpush.msrb.mxu1 %v2554_v38  ;;  %v2486_v9 = vperm.slane %v2482_v43, 2 }
 0x38a   : > { %2635 = vmatpush.msrb.mxu0 %v2537_v10  ;;  %v5414_v15 = vpop.f32.mrf.mxu2  ;;  %v2056_v20 = vpop.f32.mrf.mxu3  ;;  %2655 = vmatpush.msrb.mxu1 %v2553_v26 }
 0x38b   : > { %v2139_v44 = vadd.f32 %v2056_v20, %v1970_v41  ;;  %v1974_v16 = vadd.f32 %v5414_v15, %v1804_v13  ;;  %v2682_v41 = vld [vmem:[%s5499_s11] sm:$0x1] }
 0x38c   : > { %2636 = vmatpush.msrb.mxu0 %v2536_v14  ;;  %2656 = vmatpush.msrb.mxu1 %v2552_v45  ;;  %v1973_v14 = vadd.f32 %v5374_v4, %v1784_v11 }
 0x39d   : > { %v2096_v22 = vpop.f32.mrf.mxu1  ;;  %v2076_v28 = vpop.f32.mrf.mxu0 }
 0x39e   : > { %v2140_v63 = vadd.f32 %v2076_v28, %v1971_v60  ;;  %v2141_v1 = vadd.f32 %v2096_v22, %v1972_v61  ;;  %v2487_v22 = vperm.slane %v2482_v43, 3 }
 0x3a4   : > { %v2116_v30 = vpop.f32.mrf.mxu2  ;;  %v2136_v31 = vpop.f32.mrf.mxu3 }
 0x3a5   : > { %v2142_v18 = vadd.f32 %v2116_v30, %v1973_v14  ;;  %v2143_v19 = vadd.f32 %v2136_v31, %v1974_v16 }
 0x3b7   : > { %v2245_v34 = vpop.f32.mrf.mxu1  ;;  %v2225_v42 = vpop.f32.mrf.mxu0 }
 0x3b8   : > { %v2308_v51 = vadd.f32 %v2225_v42, %v2139_v44  ;;  %v2309_v3 = vadd.f32 %v2245_v34, %v2140_v63 }
 0x3be   : > { %v2265_v57 = vpop.f32.mrf.mxu2  ;;  %v2285_v52 = vpop.f32.mrf.mxu3 }
 0x3bf   : > { %v2310_v5 = vadd.f32 %v2265_v57, %v2141_v1  ;;  %v2311_v20 = vadd.f32 %v2285_v52, %v2142_v18 }
 0x3d1   : > { %v2394_v58 = vpop.f32.mrf.mxu1  ;;  %v2305_v0 = vpop.f32.mrf.mxu0 }
 0x3d2   : > { %v2477_v59 = vadd.f32 %v2394_v58, %v2308_v51  ;;  %v2312_v21 = vadd.f32 %v2305_v0, %v2143_v19 }
 0x3d4   : > { %v2494_v62 = vadd.f32 %v2484_v53, %v2477_v59 }
 0x3d6   : > { %v2499_v2 = vmax.f32 %v2494_v62, 0.0 }
 0x3d8   : > { %v2414_v7 = vpop.f32.mrf.mxu2  ;;  %v2434_v8 = vpop.f32.mrf.mxu3  ;;  %2597 = vmatmul.f32.vlgmr.msrb.gmra.mxu2 %v2499_v2 }
 0x3d9   : > { %v2478_v17 = vadd.f32 %v2414_v7, %v2309_v3  ;;  %v2479_v47 = vadd.f32 %v2434_v8, %v2310_v5 }
 0x3db   : > { %v2495_v32 = vadd.f32 %v2485_v6, %v2478_v17  ;;  %v2496_v48 = vadd.f32 %v2486_v9, %v2479_v47 }
 0x3dd   : > { %v2500_v10 = vmax.f32 %v2495_v32, 0.0  ;;  %v2501_v12 = vmax.f32 %v2496_v48, 0.0 }
 0x3df   : > { %2617 = vmatmul.f32.vlgmr.msra.gmra.mxu3 %v2500_v10  ;;  %2637 = vmatmul.f32.vlgmr.msrb.gmra.mxu0 %v2501_v12 }
 0x3ea   : > { %v2454_v24 = vpop.f32.mrf.mxu0  ;;  %v2474_v25 = vpop.f32.mrf.mxu1 }
 0x3eb   : > { %v2480_v27 = vadd.f32 %v2454_v24, %v2311_v20  ;;  %v2481_v28 = vadd.f32 %v2474_v25, %v2312_v21 }
 0x3ed   : > { %v2497_v29 = vadd.f32 %v2487_v22, %v2480_v27  ;;  %v2498_v34 = vadd.f32 %v2488_v23, %v2481_v28 }
 0x3ef   : > { %v2502_v33 = vmax.f32 %v2497_v29, 0.0  ;;  %v2503_v56 = vmax.f32 %v2498_v34, 0.0 }
 0x3f1   : > { %2657 = vmatmul.f32.vlgmr.msrb.gmra.mxu1 %v2502_v33  ;;  %3309 = vmatmul.msk.f32.vlgmr.msra.gmra.mxu2 %vm2577_vm8, %v2503_v56 }
 0x45b   : > { %v2598_v49 = vpop.f32.mrf.mxu2 }
 0x45c   : > { %v2599_v15 = vadd.f32 %v2598_v49, %v2576_v46  ;;  %v2638_v31 = vpop.f32.mrf.mxu0 }
 0x462   : > { %v2618_v4 = vpop.f32.mrf.mxu3 }
 0x463   : > { %v2619_v30 = vadd.f32 %v2618_v4, %v2599_v15 }
 0x465   : > { %v2639_v36 = vadd.f32 %v2638_v31, %v2619_v30 }
 0x46e   : > { %v2658_v35 = vpop.f32.mrf.mxu1 }
 0x46f   : > { %v2659_v37 = vadd.f32 %v2658_v35, %v2639_v36 }
 0x474   : > { %v2678_v38 = vpop.f32.mrf.mxu2 }
 0x475   : > { %v2679_v40 = vadd.f32 %v2678_v38, %v2659_v37 }
 0x477   : > { %v2681_v42 = vmax.f32 %v2679_v40, 0.0 }
 0x479   : > { %v2683_v43 = vmul.f32 %v2682_v41, %v2681_v42 }
 0x47b   : > { %v2685_v26 = vsel %vm2684_vm9, %v2683_v43, 0.0 }
 0x47c   : > { %2686 = vadd.xlane.f32.xlu0 %v2685_v26 }
 0x4ef   : > { %v2687_v44 = vpop.xlane.xlu0 %2686 }
 0x4f0   : > { %v2689_v45 = vadd.f32 %v2688_v39, %v2687_v44 }
 0x4f2   : > { %2691 = vst.msk [vmem:[%s438_s15] sm:$0x1] %vm2690_vm10, %v2689_v45 }
 0x4f3 PF: > { %s25_s27 = sadd.s32 1, %s3334_s27  }
 0x4f4   : > { %p22_p4 = scmp.ge.s32.totalorder %s25_s27, 4  }
 0x4f6   :  { %24 = sbr.rel (!%p22_p4) target bundleno = 3 (0x3), region = 127 }

</bundles_post_ra>
